<compile_context>
chip_gen: v6e
topology: v6e:2x2x1
jax: 0.10.0
libtpu: 0.0.40
codegen_flags: <defaults>
</compile_context>

<pallas_src>
import functools

import jax
import jax.numpy as jnp
from jax import lax
from jax.experimental import pallas as pl
from jax.experimental.pallas import tpu as pltpu

HEAD_SIZE = 64
LN_EPS = 1e-5
GN_EPS = (1e-5) * (8 ** 2)          # RWKV5 ln_x eps (head_size_divisor = 8)
PARAM_DTYPE = jnp.bfloat16

TILE_M = 512                        # flattened-matmul row tile
TILE_N = 512
TILE_K = 512
TILE_T = 256                        # per-batch sequence tile (token-shift matmuls)
NORM_ROWS = 256                     # keeps f32 temporaries comfortable on v7x (64 MiB VMEM)
VMEM_LIMIT = 48 * 1024 * 1024
WKV_CHUNK = 16                      # intra-chunk length (w^(+/-L/2) stays in f32 range)
WKV_SUBCHUNKS = 8                   # chunks processed per WKV grid step


# ----------------------------------------------------------------------------
# Small shape helpers
# ----------------------------------------------------------------------------
def _round_up(x, m):
    return (x + m - 1) // m * m


def _fit(dim, cap):
    if dim <= cap:
        return dim, dim
    return cap, _round_up(dim, cap)


def _pad_to(a, axis, size):
    pad = size - a.shape[axis]
    if pad == 0:
        return a
    widths = [(0, 0)] * a.ndim
    widths[axis] = (0, pad)
    return jnp.pad(a, widths)


def _largest_divisor_leq(n, cap, multiple_of=1):
    for d in range(min(n, cap), 0, -1):
        if n % d == 0 and (d % multiple_of == 0 or d == n):
            return d
    return n


def _pick_chunk(T, cap=WKV_CHUNK):
    if cap >= 16 and T % 16 == 0:
        return 16
    if T % 8 == 0:
        return 8
    # TODO(synk): long T not divisible by 8 would need an in-kernel masked tail.
    return T


def _pick_head_block(H):
    if H <= 8:
        return H
    for hb in (8, 6, 4, 2):
        if H % hb == 0:
            return hb
    return H


def _apply_act(y, activation):
    if activation == "relu2":
        r = jnp.maximum(y, 0.0)
        return r * r
    if activation == "sigmoid":
        return 1.0 / (1.0 + jnp.exp(-y))
    return y


# ----------------------------------------------------------------------------
# Tiled matmul with optional fused epilogue (activation and/or multiplier)
# ----------------------------------------------------------------------------
def _matmul_kernel(*refs, activation=None, has_mul=False):
    if has_mul:
        x_ref, w_ref, m_ref, o_ref, acc_ref = refs
    else:
        x_ref, w_ref, o_ref, acc_ref = refs

    @pl.when(pl.program_id(2) == 0)
    def _init():
        acc_ref[...] = jnp.zeros_like(acc_ref)

    acc_ref[...] += jnp.dot(x_ref[...], w_ref[...],
                            preferred_element_type=jnp.float32)

    @pl.when(pl.program_id(2) == pl.num_programs(2) - 1)
    def _store():
        y = _apply_act(acc_ref[...], activation)
        if has_mul:
            y = y * m_ref[...].astype(jnp.float32)
        o_ref[...] = y.astype(o_ref.dtype)


def pallas_matmul(x, w, mul=None, activation=None, out_dtype=None):
    """(M, K) @ (K, N) -> (M, N), fused epilogue `act(x@w) * mul` at the store."""
    M, K = x.shape
    K2, N = w.shape
    assert K == K2
    out_dtype = out_dtype or x.dtype
    tm, Mp = _fit(M, TILE_M)
    tk, Kp = _fit(K, TILE_K)
    tn, Np = _fit(N, TILE_N)
    xp = _pad_to(_pad_to(x, 0, Mp), 1, Kp)
    wp = _pad_to(_pad_to(w, 0, Kp), 1, Np)
    in_specs = [pl.BlockSpec((tm, tk), lambda i, j, k: (i, k)),
                pl.BlockSpec((tk, tn), lambda i, j, k: (k, j))]
    args = [xp, wp]
    if mul is not None:
        in_specs.append(pl.BlockSpec((tm, tn), lambda i, j, k: (i, j)))
        args.append(_pad_to(_pad_to(mul, 0, Mp), 1, Np))
    out = pl.pallas_call(
        functools.partial(_matmul_kernel, activation=activation,
                          has_mul=mul is not None),
        out_shape=jax.ShapeDtypeStruct((Mp, Np), out_dtype),
        grid=(Mp // tm, Np // tn, Kp // tk),
        in_specs=in_specs,
        out_specs=pl.BlockSpec((tm, tn), lambda i, j, k: (i, j)),
        scratch_shapes=[pltpu.VMEM((tm, tn), jnp.float32)],
        compiler_params=pltpu.CompilerParams(
            dimension_semantics=("parallel", "parallel", "arbitrary"),
            vmem_limit_bytes=VMEM_LIMIT),
    )(*args)
    if Mp != M or Np != N:
        out = out[:M, :N]
    return out


def linear(x, w_in_out, out_dtype=None):
    """Linear with weights stored pre-transposed as (in, out)."""
    lead = x.shape[:-1]
    y = pallas_matmul(x.reshape(-1, x.shape[-1]), w_in_out, out_dtype=out_dtype)
    return y.reshape(lead + (w_in_out.shape[1],))


# ----------------------------------------------------------------------------
# Fused token-shift (in-kernel) + stacked projections + epilogue
# ----------------------------------------------------------------------------
def _mix_matmul_kernel(x_ref, prev_ref, mix_ref, w_ref, o_ref, acc_ref, *,
                       activation):
    kk = pl.program_id(4)

    @pl.when(kk == 0)
    def _init():
        acc_ref[...] = jnp.zeros_like(acc_ref)

    xt = x_ref[0]                                  # (tt, tk)
    tt = xt.shape[0]
    prev_row = prev_ref[0, 0]                      # (1, tk) boundary (shifted) row
    if tt > 1:
        x_sh = jnp.concatenate([prev_row, xt[:tt - 1, :]], axis=0)
    else:
        x_sh = prev_row
    mix = mix_ref[0]                               # (1, tk)
    xb = x_sh + (xt - x_sh) * mix                  # == x*mix + xx*(1-mix)
    acc_ref[...] += jnp.dot(xb, w_ref[0], preferred_element_type=jnp.float32)

    @pl.when(kk == pl.num_programs(4) - 1)
    def _store():
        o_ref[0, 0] = _apply_act(acc_ref[...], activation).astype(o_ref.dtype)


def pallas_mix_matmul(x, shift_state, mix, w, activation=None, out_dtype=None):
    """out[p] = act( (x*mix[p] + token_shift(x)*(1-mix[p])) @ w[p] )

    x           : (B, T, C)
    shift_state : (B, C)        last row of the previous segment
    mix         : (P, 1, C)
    w           : (P, C, N)     stacked pre-transposed projection weights
    returns (P, B, T, N); only x (not a shifted copy) is streamed from HBM.
    """
    B, T, C = x.shape
    P, C2, N = w.shape
    assert C == C2 and mix.shape == (P, 1, C)
    out_dtype = out_dtype or x.dtype

    tt = _largest_divisor_leq(T, TILE_T, multiple_of=8)
    nT = T // tt
    if nT == 1:
        prev = shift_state[:, None, None, :]                       # (B, 1, 1, C)
    else:
        inner = x[:, tt - 1:T - 1:tt, :]                           # (B, nT-1, C)
        prev = jnp.concatenate([shift_state[:, None, :], inner],
                               axis=1)[:, :, None, :]              # (B, nT, 1, C)

    tk, Cp = _fit(C, TILE_K)
    tn, Np = _fit(N, TILE_N)
    xp = _pad_to(x, 2, Cp)
    prevp = _pad_to(prev, 3, Cp)
    mixp = _pad_to(mix, 2, Cp)
    wp = _pad_to(_pad_to(w, 1, Cp), 2, Np)

    out = pl.pallas_call(
        functools.partial(_mix_matmul_kernel, activation=activation),
        out_shape=jax.ShapeDtypeStruct((P, B, T, Np), out_dtype),
        grid=(P, B, nT, Np // tn, Cp // tk),
        in_specs=[
            pl.BlockSpec((1, tt, tk), lambda p, b, i, j, k: (b, i, k)),       # x
            pl.BlockSpec((1, 1, 1, tk), lambda p, b, i, j, k: (b, i, 0, k)),  # boundary
            pl.BlockSpec((1, 1, tk), lambda p, b, i, j, k: (p, 0, k)),        # mix
            pl.BlockSpec((1, tk, tn), lambda p, b, i, j, k: (p, k, j)),       # weight
        ],
        out_specs=pl.BlockSpec((1, 1, tt, tn), lambda p, b, i, j, k: (p, b, i, j)),
        scratch_shapes=[pltpu.VMEM((tt, tn), jnp.float32)],
        compiler_params=pltpu.CompilerParams(
            dimension_semantics=("parallel", "parallel", "parallel",
                                 "parallel", "arbitrary"),
            vmem_limit_bytes=VMEM_LIMIT),
    )(xp, prevp, mixp, wp)
    if Np != N:
        out = out[..., :N]
    return out


# ----------------------------------------------------------------------------
# Row-tiled LayerNorm
# ----------------------------------------------------------------------------
def _layernorm_kernel(x_ref, w_ref, b_ref, o_ref, *, eps):
    x = x_ref[...].astype(jnp.float32)
    mean = jnp.mean(x, axis=-1, keepdims=True)
    xc = x - mean
    var = jnp.mean(xc * xc, axis=-1, keepdims=True)
    y = xc * lax.rsqrt(var + eps)
    y = y * w_ref[...].astype(jnp.float32) + b_ref[...].astype(jnp.float32)
    o_ref[...] = y.astype(o_ref.dtype)


def pallas_layernorm(x, w, b, eps=LN_EPS):
    lead = x.shape[:-1]
    C = x.shape[-1]
    x2 = x.reshape(-1, C)
    M = x2.shape[0]
    tm, Mp = _fit(M, NORM_ROWS)
    x2p = _pad_to(x2, 0, Mp)
    out = pl.pallas_call(
        functools.partial(_layernorm_kernel, eps=eps),
        out_shape=jax.ShapeDtypeStruct((Mp, C), x.dtype),
        grid=(Mp // tm,),
        in_specs=[pl.BlockSpec((tm, C), lambda i: (i, 0)),
                  pl.BlockSpec((1, C), lambda i: (0, 0)),
                  pl.BlockSpec((1, C), lambda i: (0, 0))],
        out_specs=pl.BlockSpec((tm, C), lambda i: (i, 0)),
        compiler_params=pltpu.CompilerParams(
            dimension_semantics=("parallel",),
            vmem_limit_bytes=VMEM_LIMIT),
    )(x2p, w.reshape(1, C), b.reshape(1, C))
    if Mp != M:
        out = out[:M]
    return out.reshape(lead + (C,))


# ----------------------------------------------------------------------------
# Chunked RWKV5 WKV recurrence (fused ln_x GroupNorm + silu(g) multiply)
# ----------------------------------------------------------------------------
def _wkv_kernel(r_ref, k_ref, v_ref, g_ref,
                rdec_ref, kdec_ref, kst_ref, rcar_ref,
                wchk_ref, u_ref, lnxw_ref, lnxb_ref, s0_ref,
                out_ref, sT_ref, state_ref, *,
                chunk_len, n_sub, gn_eps):
    c = pl.program_id(2)

    @pl.when(c == 0)
    def _init():
        state_ref[...] = s0_ref[0].astype(jnp.float32)

    L = chunk_len
    Hb = rdec_ref.shape[0]
    K = rdec_ref.shape[2]

    rdec = rdec_ref[...]                               # (Hb, L, K)  w^(t-L/2)
    kdec = kdec_ref[...]                               # (Hb, L, K)  w^(L/2-1-s)
    kst = kst_ref[...]                                 # (Hb, L, K)  w^(L-1-s)
    rcar = rcar_ref[...]                               # (Hb, L, K)  w^t
    wchk = wchk_ref[...][:, :, None]                   # (Hb, K, 1)  w^L
    u = u_ref[...][:, None, :]                         # (Hb, 1, K)
    lnxw = lnxw_ref[...].astype(jnp.float32)           # (1, Hb*K)
    lnxb = lnxb_ref[...].astype(jnp.float32)

    ti = lax.broadcasted_iota(jnp.int32, (L, L), 0)
    si = lax.broadcasted_iota(jnp.int32, (L, L), 1)
    strict_lower = (si < ti)[None]
    diag = (si == ti)[None]

    def split_heads(m2d):                              # (L, Hb*K) -> (Hb, L, K)
        return jnp.transpose(m2d.reshape(L, Hb, K), (1, 0, 2))

    for i in range(n_sub):                             # static sub-chunk loop
        off = i * L
        rb = r_ref[0, pl.ds(off, L), :].astype(jnp.float32)
        kb = k_ref[0, pl.ds(off, L), :].astype(jnp.float32)
        vb = v_ref[0, pl.ds(off, L), :].astype(jnp.float32)
        gb = g_ref[0, pl.ds(off, L), :].astype(jnp.float32)

        r = split_heads(rb)
        km = split_heads(kb)
        v = split_heads(vb)

        # intra-chunk attention A[h, t, s] = sum_k r w^(t-1-s) k  (s < t)
        a = jnp.einsum('htk,hsk->hts', r * rdec, km * kdec,
                       preferred_element_type=jnp.float32)
        a = jnp.where(strict_lower, a, 0.0)
        bonus = jnp.sum(r * u * km, axis=-1)                       # (Hb, L)
        a = a + jnp.where(diag, bonus[:, :, None], 0.0)

        s = state_ref[...]                                         # (Hb, K, K) f32
        out = jnp.einsum('hts,hsk->htk', a, v,
                         preferred_element_type=jnp.float32)
        out = out + jnp.einsum('htk,hkj->htj', r * rcar, s,
                               preferred_element_type=jnp.float32)
        state_ref[...] = wchk * s + jnp.einsum(
            'hsk,hsj->hkj', km * kst, v, preferred_element_type=jnp.float32)

        # fused ln_x GroupNorm (per head, per row) + silu(g) multiply + store
        mean = jnp.mean(out, axis=-1, keepdims=True)
        xc = out - mean
        var = jnp.mean(xc * xc, axis=-1, keepdims=True)
        y = xc * lax.rsqrt(var + gn_eps)                           # (Hb, L, K)
        y = jnp.transpose(y, (1, 0, 2)).reshape(L, Hb * K)         # (L, C_blk)
        y = y * lnxw + lnxb
        y = y * (gb * (1.0 / (1.0 + jnp.exp(-gb))))                # * silu(g)
        out_ref[0, pl.ds(off, L), :] = y.astype(out_ref.dtype)

    @pl.when(c == pl.num_programs(2) - 1)
    def _final():
        sT_ref[0] = state_ref[...].astype(sT_ref.dtype)


def pallas_wkv(r, k, v, g, time_decay, time_faaaa, s0, lnx_w, lnx_b, out_dtype):
    """r/k/v/g: (B, T, C); time_decay/time_faaaa: (H, K); s0: (B, H, K, K).
    Returns (fused GN(wkv)*silu(g) output (B, T, C), final state (B, H, K, K))."""
    B, T, C = r.shape
    H = s0.shape[1]
    K = C // H

    L = _pick_chunk(T)
    n_sub = _largest_divisor_leq(max(T // L, 1), WKV_SUBCHUNKS)
    t_blk = L * n_sub
    n_tb = T // t_blk
    Hb = _pick_head_block(H)
    n_hb = H // Hb
    Cb = Hb * K

    # Loop-invariant decay tables hoisted out of the kernel (tiny, computed once
    # per layer in XLA).  TODO(synk): channels with |log w| > ~10 would need a
    # sub-chunked fallback for the symmetric w^(+/-L/2) split.
    logw = -jnp.exp(time_decay.astype(jnp.float32)).reshape(H, K)
    t_idx = jnp.arange(L, dtype=jnp.float32)[None, :, None]
    lw = logw[:, None, :]
    rdec = jnp.exp((t_idx - L / 2.0) * lw)
    kdec = jnp.exp((L / 2.0 - 1.0 - t_idx) * lw)
    kst = jnp.exp((L - 1.0 - t_idx) * lw)
    rcar = jnp.exp(t_idx * lw)
    wchk = jnp.exp(float(L) * logw)
    u = time_faaaa.astype(jnp.float32).reshape(H, K)
    lnw2 = lnx_w.reshape(1, C)
    lnb2 = lnx_b.reshape(1, C)

    out, s_final = pl.pallas_call(
        functools.partial(_wkv_kernel, chunk_len=L, n_sub=n_sub, gn_eps=GN_EPS),
        out_shape=(jax.ShapeDtypeStruct((B, T, C), out_dtype),
                   jax.ShapeDtypeStruct((B, H, K, K), s0.dtype)),
        grid=(B, n_hb, n_tb),
        in_specs=[
            pl.BlockSpec((1, t_blk, Cb), lambda b, h, c: (b, c, h)),   # r
            pl.BlockSpec((1, t_blk, Cb), lambda b, h, c: (b, c, h)),   # k
            pl.BlockSpec((1, t_blk, Cb), lambda b, h, c: (b, c, h)),   # v
            pl.BlockSpec((1, t_blk, Cb), lambda b, h, c: (b, c, h)),   # g (pre-silu)
            pl.BlockSpec((Hb, L, K), lambda b, h, c: (h, 0, 0)),       # w^(t-L/2)
            pl.BlockSpec((Hb, L, K), lambda b, h, c: (h, 0, 0)),       # w^(L/2-1-s)
            pl.BlockSpec((Hb, L, K), lambda b, h, c: (h, 0, 0)),       # w^(L-1-s)
            pl.BlockSpec((Hb, L, K), lambda b, h, c: (h, 0, 0)),       # w^t
            pl.BlockSpec((Hb, K), lambda b, h, c: (h, 0)),             # w^L
            pl.BlockSpec((Hb, K), lambda b, h, c: (h, 0)),             # bonus u
            pl.BlockSpec((1, Cb), lambda b, h, c: (0, h)),             # ln_x weight
            pl.BlockSpec((1, Cb), lambda b, h, c: (0, h)),             # ln_x bias
            pl.BlockSpec((1, Hb, K, K), lambda b, h, c: (b, h, 0, 0)), # init state
        ],
        out_specs=(
            pl.BlockSpec((1, t_blk, Cb), lambda b, h, c: (b, c, h)),
            pl.BlockSpec((1, Hb, K, K), lambda b, h, c: (b, h, 0, 0)),
        ),
        scratch_shapes=[pltpu.VMEM((Hb, K, K), jnp.float32)],
        compiler_params=pltpu.CompilerParams(
            dimension_semantics=("parallel", "parallel", "arbitrary"),
            vmem_limit_bytes=VMEM_LIMIT),
    )(r, k, v, g, rdec, kdec, kst, rcar, wchk, u, lnw2, lnb2, s0)
    return out, s_final


# ----------------------------------------------------------------------------
# Model forward (glue in plain JAX, compute in the kernels above)
# ----------------------------------------------------------------------------
def time_mix_forward(p, x_ln1, shift_in, wkv_in):
    B, T, C = x_ln1.shape
    # fused token-shift + r/k/v/g projections (one tiled pallas_call)
    rkvg = pallas_mix_matmul(x_ln1, shift_in, p['tm_mix'], p['rkvg_w'])
    r, k, v, g = rkvg[0], rkvg[1], rkvg[2], rkvg[3]
    # chunked recurrence with fused ln_x GroupNorm + silu(g) multiply
    y, wkv_out = pallas_wkv(r, k, v, g, p['time_decay'], p['time_faaaa'],
                            wkv_in, p['ln_x_w'], p['ln_x_b'],
                            out_dtype=x_ln1.dtype)
    xo = pallas_matmul(y.reshape(B * T, C), p['output_w'],
                       out_dtype=x_ln1.dtype).reshape(B, T, C)
    return xo, (x_ln1[:, -1], wkv_out)


def channel_mix_forward(p, x_ln2, shift_in):
    B, T, C = x_ln2.shape
    k2 = pallas_mix_matmul(x_ln2, shift_in, p['mix_k'], p['key_w'],
                           activation='relu2')[0]                  # (B, T, F)
    rr = pallas_mix_matmul(x_ln2, shift_in, p['mix_r'], p['recept_w'],
                           activation='sigmoid')[0]                # (B, T, C)
    F = k2.shape[-1]
    out = pallas_matmul(k2.reshape(B * T, F), p['value_w'],
                        mul=rr.reshape(B * T, C),
                        out_dtype=x_ln2.dtype).reshape(B, T, C)
    return out, x_ln2[:, -1]


def block_forward(blk, x, state):
    if blk['ln0'] is not None:                        # layer 0 only
        x = pallas_layernorm(x, blk['ln0']['w'], blk['ln0']['b'])
    x_ln1 = pallas_layernorm(x, blk['ln1']['w'], blk['ln1']['b'])
    att_out, (tshift, wkv) = time_mix_forward(blk['att'], x_ln1, state[0], state[1])
    x = x + att_out
    x_ln2 = pallas_layernorm(x, blk['ln2']['w'], blk['ln2']['b'])
    ffn_out, cshift = channel_mix_forward(blk['ffn'], x_ln2, state[2])
    x = x + ffn_out
    return x, (tshift, wkv, cshift)


def rwkv5_forward(params, idx, state_list):
    # TODO(synk): embedding gather stays in XLA (jnp.take); no rectangular tile
    # pattern worth a Pallas kernel at these vocab sizes.
    x = jnp.take(params['emb'], idx, axis=0)          # (B, T, C)
    new_states = []
    for i, blk in enumerate(params['blocks']):
        x, st = block_forward(blk, x, state_list[i])
        new_states.append(st)
    x = pallas_layernorm(x, params['ln_out']['w'], params['ln_out']['b'])
    logits = linear(x, params['head_w'])
    return logits, new_states


# ----------------------------------------------------------------------------
# Deterministic synthetic parameters / state (weights generated directly in the
# pre-transposed (in, out) layout a torch checkpoint would be converted to once)
# ----------------------------------------------------------------------------
def init_params(key, *, vocab_size, hidden_size, num_hidden_layers,
                head_size=HEAD_SIZE, dtype=PARAM_DTYPE):
    H = hidden_size // head_size
    dim_ffn = int((hidden_size * 3.5) // 32 * 32)
    keys = iter(jax.random.split(key, 8 + num_hidden_layers * 16))

    def nrm(shape, scale=0.02):
        return (scale * jax.random.normal(next(keys), shape, jnp.float32)).astype(dtype)

    def uni(shape):
        return jax.random.uniform(next(keys), shape, jnp.float32).astype(dtype)

    def ln():
        return {'w': jnp.ones((hidden_size,), dtype),
                'b': jnp.zeros((hidden_size,), dtype)}

    # realistic RWKV5 decay/bonus init (keeps the chunked decay split well
    # inside f32 range)
    n = jnp.arange(hidden_size, dtype=jnp.float32)
    ratio = n / max(hidden_size - 1, 1)
    time_decay = (-6.0 + 5.0 * ratio ** 0.85).reshape(H, head_size)
    time_faaaa = (0.5 * ratio + 0.1 * ((n % 3).astype(jnp.float32) - 1.0)
                  ).reshape(H, head_size)

    params = {
        'emb': nrm((vocab_size, hidden_size)),
        'ln_out': ln(),
        'head_w': nrm((hidden_size, vocab_size)),
        'blocks': [],
    }
    for i in range(num_hidden_layers):
        att = {
            'tm_mix': uni((4, 1, hidden_size)),            # r, k, v, g blends
            'rkvg_w': nrm((4, hidden_size, hidden_size)),
            'time_decay': time_decay,                      # (H, K) float32
            'time_faaaa': time_faaaa,                      # (H, K) float32
            'output_w': nrm((hidden_size, hidden_size)),
            'ln_x_w': jnp.ones((hidden_size,), dtype),
            'ln_x_b': jnp.zeros((hidden_size,), dtype),
        }
        ffn = {
            'mix_k': uni((1, 1, hidden_size)),
            'mix_r': uni((1, 1, hidden_size)),
            'key_w': nrm((1, hidden_size, dim_ffn)),
            'recept_w': nrm((1, hidden_size, hidden_size)),
            'value_w': nrm((dim_ffn, hidden_size)),
        }
        params['blocks'].append({
            'ln0': ln() if i == 0 else None,
            'ln1': ln(), 'ln2': ln(), 'att': att, 'ffn': ffn,
        })
    return params


def get_init_state(batch_size, hidden_size, num_hidden_layers,
                   head_size=HEAD_SIZE, dtype=PARAM_DTYPE):
    H = hidden_size // head_size
    return [(
        jnp.zeros((batch_size, hidden_size), dtype),                 # tmix shift
        jnp.zeros((batch_size, H, head_size, head_size), dtype),     # wkv state
        jnp.zeros((batch_size, hidden_size), dtype),                 # cmix shift
    ) for _ in range(num_hidden_layers)]


# ----------------------------------------------------------------------------
if __name__ == "__main__":
    B, T = 2, 8
    hidden_size = 64            # -> 1 head of size 64
    num_hidden_layers = 2
    vocab_size = 256

    key = jax.random.PRNGKey(0)
    pkey, ikey = jax.random.split(key)
    params = init_params(pkey, vocab_size=vocab_size, hidden_size=hidden_size,
                         num_hidden_layers=num_hidden_layers)
    idx = jax.random.randint(ikey, (B, T), 0, vocab_size, dtype=jnp.int32)
    states = get_init_state(B, hidden_size, num_hidden_layers)

    fwd = jax.jit(rwkv5_forward)
    logits, new_states = fwd(params, idx, states)
    jax.block_until_ready((logits, new_states))

    assert logits.shape == (B, T, vocab_size)
    assert logits.dtype == PARAM_DTYPE
    assert len(new_states) == num_hidden_layers
    assert new_states[0][0].shape == (B, hidden_size)
    assert new_states[0][1].shape == (B, hidden_size // HEAD_SIZE, HEAD_SIZE, HEAD_SIZE)
    assert new_states[0][2].shape == (B, hidden_size)
    for arr in (logits,) + tuple(new_states[0]):
        assert bool(jnp.all(jnp.isfinite(arr.astype(jnp.float32))))
    print("KERNEL_OK")
</pallas_src>

<mosaic_0001>
module attributes {stable_mosaic.version = 11 : i64} {
  func.func @_layernorm_kernel(%arg0: i32, %arg1: memref<16x64xbf16, #tpu.memory_space<vmem>>, %arg2: memref<1x64xbf16, #tpu.memory_space<vmem>>, %arg3: memref<1x64xbf16, #tpu.memory_space<vmem>>, %arg4: memref<16x64xbf16, #tpu.memory_space<vmem>>) attributes {dimension_semantics = [#tpu.dimension_semantics<parallel>], iteration_bounds = array<i64: 1>, scalar_prefetch = 0 : i64, scratch_operands = 0 : i64, tpu.core_type = #tpu.core_type<tc>, window_params = [{transform_indices = @transform_0, window_bounds = array<i64: 16, 64>}, {pipeline_mode = #tpu.pipeline_mode<synchronous>, transform_indices = @transform_1, window_bounds = array<i64: 1, 64>}, {pipeline_mode = #tpu.pipeline_mode<synchronous>, transform_indices = @transform_2, window_bounds = array<i64: 1, 64>}, {transform_indices = @transform_3, window_bounds = array<i64: 16, 64>}]} {
    %c0 = arith.constant 0 : index
    %c0_0 = arith.constant 0 : index
    %0 = vector.load %arg1[%c0, %c0_0] : memref<16x64xbf16, #tpu.memory_space<vmem>>, vector<16x64xbf16>
    %1 = arith.extf %0 : vector<16x64xbf16> to vector<16x64xf32>
    %cst = arith.constant dense<0.000000e+00> : vector<16xf32>
    %2 = vector.multi_reduction <add>, %1, %cst [1] : vector<16x64xf32> to vector<16xf32>
    %3 = vector.shape_cast %2 : vector<16xf32> to vector<16x1xf32>
    %cst_1 = arith.constant 6.400000e+01 : f32
    %4 = vector.broadcast %cst_1 : f32 to vector<16x1xf32>
    %5 = arith.divf %3, %4 : vector<16x1xf32>
    %6 = vector.broadcast %5 : vector<16x1xf32> to vector<16x64xf32>
    %7 = arith.subf %1, %6 : vector<16x64xf32>
    %8 = arith.mulf %7, %7 : vector<16x64xf32>
    %cst_2 = arith.constant dense<0.000000e+00> : vector<16xf32>
    %9 = vector.multi_reduction <add>, %8, %cst_2 [1] : vector<16x64xf32> to vector<16xf32>
    %10 = vector.shape_cast %9 : vector<16xf32> to vector<16x1xf32>
    %cst_3 = arith.constant 6.400000e+01 : f32
    %11 = vector.broadcast %cst_3 : f32 to vector<16x1xf32>
    %12 = arith.divf %10, %11 : vector<16x1xf32>
    %cst_4 = arith.constant 9.99999974E-6 : f32
    %13 = vector.broadcast %cst_4 : f32 to vector<16x1xf32>
    %14 = arith.addf %12, %13 : vector<16x1xf32>
    %15 = math.rsqrt %14 : vector<16x1xf32>
    %16 = vector.broadcast %15 : vector<16x1xf32> to vector<16x64xf32>
    %17 = arith.mulf %7, %16 : vector<16x64xf32>
    %c0_5 = arith.constant 0 : index
    %c0_6 = arith.constant 0 : index
    %18 = vector.load %arg2[%c0_5, %c0_6] : memref<1x64xbf16, #tpu.memory_space<vmem>>, vector<1x64xbf16>
    %19 = arith.extf %18 : vector<1x64xbf16> to vector<1x64xf32>
    %20 = vector.broadcast %19 : vector<1x64xf32> to vector<16x64xf32>
    %21 = arith.mulf %17, %20 : vector<16x64xf32>
    %c0_7 = arith.constant 0 : index
    %c0_8 = arith.constant 0 : index
    %22 = vector.load %arg3[%c0_7, %c0_8] : memref<1x64xbf16, #tpu.memory_space<vmem>>, vector<1x64xbf16>
    %23 = arith.extf %22 : vector<1x64xbf16> to vector<1x64xf32>
    %24 = vector.broadcast %23 : vector<1x64xf32> to vector<16x64xf32>
    %25 = arith.addf %21, %24 : vector<16x64xf32>
    %26 = arith.truncf %25 : vector<16x64xf32> to vector<16x64xbf16>
    %c0_9 = arith.constant 0 : index
    %c0_10 = arith.constant 0 : index
    %27 = vector.load %arg4[%c0_9, %c0_10] : memref<16x64xbf16, #tpu.memory_space<vmem>>, vector<16x64xbf16>
    tpu.vector_store %arg4[%c0_9, %c0_10], %26 {strides = array<i32>} : memref<16x64xbf16, #tpu.memory_space<vmem>>, vector<16x64xbf16>,
    return
  }
  func.func @transform_0(%arg0: i32) -> (i32, i32) {
    %c0_i32 = arith.constant 0 : i32
    %c0_i32_0 = arith.constant 0 : i32
    return %arg0, %c0_i32 : i32, i32
  }
  func.func @transform_1(%arg0: i32) -> (i32, i32) {
    %c0_i32 = arith.constant 0 : i32
    %c0_i32_0 = arith.constant 0 : i32
    %c0_i32_1 = arith.constant 0 : i32
    return %c0_i32, %c0_i32_0 : i32, i32
  }
  func.func @transform_2(%arg0: i32) -> (i32, i32) {
    %c0_i32 = arith.constant 0 : i32
    %c0_i32_0 = arith.constant 0 : i32
    %c0_i32_1 = arith.constant 0 : i32
    return %c0_i32, %c0_i32_0 : i32, i32
  }
  func.func @transform_3(%arg0: i32) -> (i32, i32) {
    %c0_i32 = arith.constant 0 : i32
    %c0_i32_0 = arith.constant 0 : i32
    return %arg0, %c0_i32 : i32, i32
  }
}

module attributes {stable_mosaic.version = 11 : i64} {
  func.func @_mix_matmul_kernel(%arg0: i32, %arg1: i32, %arg2: i32, %arg3: i32, %arg4: i32, %arg5: memref<1x8x64xbf16, #tpu.memory_space<vmem>>, %arg6: memref<1x1x1x64xbf16, #tpu.memory_space<vmem>>, %arg7: memref<1x1x64xbf16, #tpu.memory_space<vmem>>, %arg8: memref<1x64x64xbf16, #tpu.memory_space<vmem>>, %arg9: memref<1x1x8x64xbf16, #tpu.memory_space<vmem>>, %arg10: memref<8x64xf32, #tpu.memory_space<vmem>>) attributes {dimension_semantics = [#tpu.dimension_semantics<parallel>, #tpu.dimension_semantics<parallel>, #tpu.dimension_semantics<parallel>, #tpu.dimension_semantics<parallel>, #tpu.dimension_semantics<arbitrary>], iteration_bounds = array<i64: 4, 2, 1, 1, 1>, scalar_prefetch = 0 : i64, scratch_operands = 1 : i64, tpu.core_type = #tpu.core_type<tc>, window_params = [{transform_indices = @transform_0, window_bounds = array<i64: 1, 8, 64>}, {transform_indices = @transform_1, window_bounds = array<i64: 1, 1, 1, 64>}, {transform_indices = @transform_2, window_bounds = array<i64: 1, 1, 64>}, {transform_indices = @transform_3, window_bounds = array<i64: 1, 64, 64>}, {transform_indices = @transform_4, window_bounds = array<i64: 1, 1, 8, 64>}]} {
    %c0_i32 = arith.constant 0 : i32
    %0 = arith.cmpi eq, %arg4, %c0_i32 : i32
    %1 = arith.extui %0 : i1 to i32
    %c0_i32_0 = arith.constant 0 : i32
    %2 = arith.cmpi ne, %1, %c0_i32_0 : i32
    scf.if %2 {
      %cst_19 = arith.constant 0.000000e+00 : f32
      %24 = vector.broadcast %cst_19 : f32 to vector<8x64xf32>
      %c0_20 = arith.constant 0 : index
      %c0_21 = arith.constant 0 : index
      %25 = vector.load %arg10[%c0_20, %c0_21] : memref<8x64xf32, #tpu.memory_space<vmem>>, vector<8x64xf32>
      tpu.vector_store %arg10[%c0_20, %c0_21], %24 {strides = array<i32>} : memref<8x64xf32, #tpu.memory_space<vmem>>, vector<8x64xf32>,
    } else {
    }
    %c0 = arith.constant 0 : index
    %c0_1 = arith.constant 0 : index
    %c0_2 = arith.constant 0 : index
    %3 = vector.load %arg5[%c0, %c0_1, %c0_2] : memref<1x8x64xbf16, #tpu.memory_space<vmem>>, vector<1x8x64xbf16>
    %4 = vector.shape_cast %3 : vector<1x8x64xbf16> to vector<8x64xbf16>
    %c0_3 = arith.constant 0 : index
    %c0_4 = arith.constant 0 : index
    %c0_5 = arith.constant 0 : index
    %c0_6 = arith.constant 0 : index
    %5 = vector.load %arg6[%c0_3, %c0_4, %c0_5, %c0_6] : memref<1x1x1x64xbf16, #tpu.memory_space<vmem>>, vector<1x1x1x64xbf16>
    %6 = vector.shape_cast %5 : vector<1x1x1x64xbf16> to vector<1x64xbf16>
    %7 = vector.extract_strided_slice %4 {offsets = [0, 0], sizes = [7, 64], strides = [1, 1]} : vector<8x64xbf16> to vector<7x64xbf16>
    %8 = tpu.concatenate %6, %7 in 0 : vector<1x64xbf16>, vector<7x64xbf16> -> vector<8x64xbf16>
    %c0_7 = arith.constant 0 : index
    %c0_8 = arith.constant 0 : index
    %c0_9 = arith.constant 0 : index
    %9 = vector.load %arg7[%c0_7, %c0_8, %c0_9] : memref<1x1x64xbf16, #tpu.memory_space<vmem>>, vector<1x1x64xbf16>
    %10 = vector.shape_cast %9 : vector<1x1x64xbf16> to vector<1x64xbf16>
    %11 = arith.subf %4, %8 : vector<8x64xbf16>
    %12 = vector.broadcast %10 : vector<1x64xbf16> to vector<8x64xbf16>
    %13 = arith.mulf %11, %12 : vector<8x64xbf16>
    %14 = arith.addf %8, %13 : vector<8x64xbf16>
    %c0_10 = arith.constant 0 : index
    %c0_11 = arith.constant 0 : index
    %15 = vector.load %arg10[%c0_10, %c0_11] : memref<8x64xf32, #tpu.memory_space<vmem>>, vector<8x64xf32>
    %c0_12 = arith.constant 0 : index
    %c0_13 = arith.constant 0 : index
    %c0_14 = arith.constant 0 : index
    %16 = vector.load %arg8[%c0_12, %c0_13, %c0_14] : memref<1x64x64xbf16, #tpu.memory_space<vmem>>, vector<1x64x64xbf16>
    %17 = vector.shape_cast %16 : vector<1x64x64xbf16> to vector<64x64xbf16>
    %cst = arith.constant dense<0.000000e+00> : vector<8x64xf32>
    %18 = tpu.matmul %14, %17, %cst {dimension_numbers = #tpu.dot_dimension_numbers<[1], [0], [0], [1], [0, 0, 1, 1], [], []>} : vector<8x64xbf16>, vector<64x64xbf16>, vector<8x64xf32> -> vector<8x64xf32>
    %19 = arith.addf %15, %18 : vector<8x64xf32>
    %c0_15 = arith.constant 0 : index
    %c0_16 = arith.constant 0 : index
    %20 = vector.load %arg10[%c0_15, %c0_16] : memref<8x64xf32, #tpu.memory_space<vmem>>, vector<8x64xf32>
    tpu.vector_store %arg10[%c0_15, %c0_16], %19 {strides = array<i32>} : memref<8x64xf32, #tpu.memory_space<vmem>>, vector<8x64xf32>,
    %c0_i32_17 = arith.constant 0 : i32
    %21 = arith.cmpi eq, %arg4, %c0_i32_17 : i32
    %22 = arith.extui %21 : i1 to i32
    %c0_i32_18 = arith.constant 0 : i32
    %23 = arith.cmpi ne, %22, %c0_i32_18 : i32
    scf.if %23 {
      %c0_19 = arith.constant 0 : index
      %c0_20 = arith.constant 0 : index
      %24 = vector.load %arg10[%c0_19, %c0_20] : memref<8x64xf32, #tpu.memory_space<vmem>>, vector<8x64xf32>
      %25 = arith.truncf %24 : vector<8x64xf32> to vector<8x64xbf16>
      %c0_21 = arith.constant 0 : index
      %c0_22 = arith.constant 0 : index
      %c0_23 = arith.constant 0 : index
      %c0_24 = arith.constant 0 : index
      %26 = vector.load %arg9[%c0_21, %c0_22, %c0_23, %c0_24] : memref<1x1x8x64xbf16, #tpu.memory_space<vmem>>, vector<1x1x8x64xbf16>
      %27 = vector.shape_cast %26 : vector<1x1x8x64xbf16> to vector<8x64xbf16>
      %28 = vector.shape_cast %25 : vector<8x64xbf16> to vector<1x1x8x64xbf16>
      tpu.vector_store %arg9[%c0_21, %c0_22, %c0_23, %c0_24], %28 {strides = array<i32>} : memref<1x1x8x64xbf16, #tpu.memory_space<vmem>>, vector<1x1x8x64xbf16>,
    } else {
    }
    return
  }
  func.func @transform_0(%arg0: i32, %arg1: i32, %arg2: i32, %arg3: i32, %arg4: i32) -> (i32, i32, i32) {
    %c0_i32 = arith.constant 0 : i32
    return %arg1, %arg2, %arg4 : i32, i32, i32
  }
  func.func @transform_1(%arg0: i32, %arg1: i32, %arg2: i32, %arg3: i32, %arg4: i32) -> (i32, i32, i32, i32) {
    %c0_i32 = arith.constant 0 : i32
    %c0_i32_0 = arith.constant 0 : i32
    return %arg1, %arg2, %c0_i32, %arg4 : i32, i32, i32, i32
  }
  func.func @transform_2(%arg0: i32, %arg1: i32, %arg2: i32, %arg3: i32, %arg4: i32) -> (i32, i32, i32) {
    %c0_i32 = arith.constant 0 : i32
    %c0_i32_0 = arith.constant 0 : i32
    return %arg0, %c0_i32, %arg4 : i32, i32, i32
  }
  func.func @transform_3(%arg0: i32, %arg1: i32, %arg2: i32, %arg3: i32, %arg4: i32) -> (i32, i32, i32) {
    %c0_i32 = arith.constant 0 : i32
    return %arg0, %arg4, %arg3 : i32, i32, i32
  }
  func.func @transform_4(%arg0: i32, %arg1: i32, %arg2: i32, %arg3: i32, %arg4: i32) -> (i32, i32, i32, i32) {
    %c0_i32 = arith.constant 0 : i32
    return %arg0, %arg1, %arg2, %arg3 : i32, i32, i32, i32
  }
}

module attributes {stable_mosaic.version = 11 : i64} {
  func.func @_matmul_kernel(%arg0: i32, %arg1: i32, %arg2: i32, %arg3: memref<16x64xbf16, #tpu.memory_space<vmem>>, %arg4: memref<64x64xbf16, #tpu.memory_space<vmem>>, %arg5: memref<16x64xbf16, #tpu.memory_space<vmem>>, %arg6: memref<16x64xf32, #tpu.memory_space<vmem>>) attributes {dimension_semantics = [#tpu.dimension_semantics<parallel>, #tpu.dimension_semantics<parallel>, #tpu.dimension_semantics<arbitrary>], iteration_bounds = array<i64: 1, 1, 1>, scalar_prefetch = 0 : i64, scratch_operands = 1 : i64, tpu.core_type = #tpu.core_type<tc>, window_params = [{transform_indices = @transform_0, window_bounds = array<i64: 16, 64>}, {transform_indices = @transform_1, window_bounds = array<i64: 64, 64>}, {transform_indices = @transform_2, window_bounds = array<i64: 16, 64>}]} {
    %c0_i32 = arith.constant 0 : i32
    %0 = arith.cmpi eq, %arg2, %c0_i32 : i32
    %1 = arith.extui %0 : i1 to i32
    %c0_i32_0 = arith.constant 0 : i32
    %2 = arith.cmpi ne, %1, %c0_i32_0 : i32
    scf.if %2 {
      %cst_10 = arith.constant 0.000000e+00 : f32
      %12 = vector.broadcast %cst_10 : f32 to vector<16x64xf32>
      %c0_11 = arith.constant 0 : index
      %c0_12 = arith.constant 0 : index
      %13 = vector.load %arg6[%c0_11, %c0_12] : memref<16x64xf32, #tpu.memory_space<vmem>>, vector<16x64xf32>
      tpu.vector_store %arg6[%c0_11, %c0_12], %12 {strides = array<i32>} : memref<16x64xf32, #tpu.memory_space<vmem>>, vector<16x64xf32>,
    } else {
    }
    %c0 = arith.constant 0 : index
    %c0_1 = arith.constant 0 : index
    %3 = vector.load %arg6[%c0, %c0_1] : memref<16x64xf32, #tpu.memory_space<vmem>>, vector<16x64xf32>
    %c0_2 = arith.constant 0 : index
    %c0_3 = arith.constant 0 : index
    %4 = vector.load %arg3[%c0_2, %c0_3] : memref<16x64xbf16, #tpu.memory_space<vmem>>, vector<16x64xbf16>
    %c0_4 = arith.constant 0 : index
    %c0_5 = arith.constant 0 : index
    %5 = vector.load %arg4[%c0_4, %c0_5] : memref<64x64xbf16, #tpu.memory_space<vmem>>, vector<64x64xbf16>
    %cst = arith.constant dense<0.000000e+00> : vector<16x64xf32>
    %6 = tpu.matmul %4, %5, %cst {dimension_numbers = #tpu.dot_dimension_numbers<[1], [0], [0], [1], [0, 0, 1, 1], [], []>} : vector<16x64xbf16>, vector<64x64xbf16>, vector<16x64xf32> -> vector<16x64xf32>
    %7 = arith.addf %3, %6 : vector<16x64xf32>
    %c0_6 = arith.constant 0 : index
    %c0_7 = arith.constant 0 : index
    %8 = vector.load %arg6[%c0_6, %c0_7] : memref<16x64xf32, #tpu.memory_space<vmem>>, vector<16x64xf32>
    tpu.vector_store %arg6[%c0_6, %c0_7], %7 {strides = array<i32>} : memref<16x64xf32, #tpu.memory_space<vmem>>, vector<16x64xf32>,
    %c0_i32_8 = arith.constant 0 : i32
    %9 = arith.cmpi eq, %arg2, %c0_i32_8 : i32
    %10 = arith.extui %9 : i1 to i32
    %c0_i32_9 = arith.constant 0 : i32
    %11 = arith.cmpi ne, %10, %c0_i32_9 : i32
    scf.if %11 {
      %c0_10 = arith.constant 0 : index
      %c0_11 = arith.constant 0 : index
      %12 = vector.load %arg6[%c0_10, %c0_11] : memref<16x64xf32, #tpu.memory_space<vmem>>, vector<16x64xf32>
      %13 = arith.truncf %12 : vector<16x64xf32> to vector<16x64xbf16>
      %c0_12 = arith.constant 0 : index
      %c0_13 = arith.constant 0 : index
      %14 = vector.load %arg5[%c0_12, %c0_13] : memref<16x64xbf16, #tpu.memory_space<vmem>>, vector<16x64xbf16>
      tpu.vector_store %arg5[%c0_12, %c0_13], %13 {strides = array<i32>} : memref<16x64xbf16, #tpu.memory_space<vmem>>, vector<16x64xbf16>,
    } else {
    }
    return
  }
  func.func @transform_0(%arg0: i32, %arg1: i32, %arg2: i32) -> (i32, i32) {
    %c0_i32 = arith.constant 0 : i32
    return %arg0, %arg2 : i32, i32
  }
  func.func @transform_1(%arg0: i32, %arg1: i32, %arg2: i32) -> (i32, i32) {
    %c0_i32 = arith.constant 0 : i32
    return %arg2, %arg1 : i32, i32
  }
  func.func @transform_2(%arg0: i32, %arg1: i32, %arg2: i32) -> (i32, i32) {
    %c0_i32 = arith.constant 0 : i32
    return %arg0, %arg1 : i32, i32
  }
}

module attributes {stable_mosaic.version = 11 : i64} {
  func.func @_wkv_kernel(%arg0: i32, %arg1: i32, %arg2: i32, %arg3: memref<1x8x64xbf16, #tpu.memory_space<vmem>>, %arg4: memref<1x8x64xbf16, #tpu.memory_space<vmem>>, %arg5: memref<1x8x64xbf16, #tpu.memory_space<vmem>>, %arg6: memref<1x8x64xbf16, #tpu.memory_space<vmem>>, %arg7: memref<1x8x64xf32, #tpu.memory_space<vmem>>, %arg8: memref<1x8x64xf32, #tpu.memory_space<vmem>>, %arg9: memref<1x8x64xf32, #tpu.memory_space<vmem>>, %arg10: memref<1x8x64xf32, #tpu.memory_space<vmem>>, %arg11: memref<1x64xf32, #tpu.memory_space<vmem>>, %arg12: memref<1x64xf32, #tpu.memory_space<vmem>>, %arg13: memref<1x64xbf16, #tpu.memory_space<vmem>>, %arg14: memref<1x64xbf16, #tpu.memory_space<vmem>>, %arg15: memref<1x1x64x64xbf16, #tpu.memory_space<vmem>>, %arg16: memref<1x8x64xbf16, #tpu.memory_space<vmem>>, %arg17: memref<1x1x64x64xbf16, #tpu.memory_space<vmem>>, %arg18: memref<1x64x64xf32, #tpu.memory_space<vmem>>) attributes {dimension_semantics = [#tpu.dimension_semantics<parallel>, #tpu.dimension_semantics<parallel>, #tpu.dimension_semantics<arbitrary>], iteration_bounds = array<i64: 2, 1, 1>, scalar_prefetch = 0 : i64, scratch_operands = 1 : i64, tpu.core_type = #tpu.core_type<tc>, window_params = [{transform_indices = @transform_0, window_bounds = array<i64: 1, 8, 64>}, {transform_indices = @transform_1, window_bounds = array<i64: 1, 8, 64>}, {transform_indices = @transform_2, window_bounds = array<i64: 1, 8, 64>}, {transform_indices = @transform_3, window_bounds = array<i64: 1, 8, 64>}, {transform_indices = @transform_4, window_bounds = array<i64: 1, 8, 64>}, {transform_indices = @transform_5, window_bounds = array<i64: 1, 8, 64>}, {transform_indices = @transform_6, window_bounds = array<i64: 1, 8, 64>}, {transform_indices = @transform_7, window_bounds = array<i64: 1, 8, 64>}, {transform_indices = @transform_8, window_bounds = array<i64: 1, 64>}, {transform_indices = @transform_9, window_bounds = array<i64: 1, 64>}, {transform_indices = @transform_10, window_bounds = array<i64: 1, 64>}, {transform_indices = @transform_11, window_bounds = array<i64: 1, 64>}, {transform_indices = @transform_12, window_bounds = array<i64: 1, 1, 64, 64>}, {transform_indices = @transform_13, window_bounds = array<i64: 1, 8, 64>}, {transform_indices = @transform_14, window_bounds = array<i64: 1, 1, 64, 64>}]} {
    %c0_i32 = arith.constant 0 : i32
    %0 = arith.cmpi eq, %arg2, %c0_i32 : i32
    %1 = arith.extui %0 : i1 to i32
    %c0_i32_0 = arith.constant 0 : i32
    %2 = arith.cmpi ne, %1, %c0_i32_0 : i32
    scf.if %2 {
      %c0_57 = arith.constant 0 : index
      %c0_58 = arith.constant 0 : index
      %c0_59 = arith.constant 0 : index
      %c0_60 = arith.constant 0 : index
      %103 = vector.load %arg15[%c0_57, %c0_58, %c0_59, %c0_60] : memref<1x1x64x64xbf16, #tpu.memory_space<vmem>>, vector<1x1x64x64xbf16>
      %104 = vector.shape_cast %103 : vector<1x1x64x64xbf16> to vector<1x64x64xbf16>
      %105 = arith.extf %104 : vector<1x64x64xbf16> to vector<1x64x64xf32>
      %c0_61 = arith.constant 0 : index
      %c0_62 = arith.constant 0 : index
      %c0_63 = arith.constant 0 : index
      %106 = vector.load %arg18[%c0_61, %c0_62, %c0_63] : memref<1x64x64xf32, #tpu.memory_space<vmem>>, vector<1x64x64xf32>
      tpu.vector_store %arg18[%c0_61, %c0_62, %c0_63], %105 {strides = array<i32>} : memref<1x64x64xf32, #tpu.memory_space<vmem>>, vector<1x64x64xf32>,
    } else {
    }
    %c0 = arith.constant 0 : index
    %c0_1 = arith.constant 0 : index
    %c0_2 = arith.constant 0 : index
    %3 = vector.load %arg7[%c0, %c0_1, %c0_2] : memref<1x8x64xf32, #tpu.memory_space<vmem>>, vector<1x8x64xf32>
    %c0_3 = arith.constant 0 : index
    %c0_4 = arith.constant 0 : index
    %c0_5 = arith.constant 0 : index
    %4 = vector.load %arg8[%c0_3, %c0_4, %c0_5] : memref<1x8x64xf32, #tpu.memory_space<vmem>>, vector<1x8x64xf32>
    %c0_6 = arith.constant 0 : index
    %c0_7 = arith.constant 0 : index
    %c0_8 = arith.constant 0 : index
    %5 = vector.load %arg9[%c0_6, %c0_7, %c0_8] : memref<1x8x64xf32, #tpu.memory_space<vmem>>, vector<1x8x64xf32>
    %c0_9 = arith.constant 0 : index
    %c0_10 = arith.constant 0 : index
    %c0_11 = arith.constant 0 : index
    %6 = vector.load %arg10[%c0_9, %c0_10, %c0_11] : memref<1x8x64xf32, #tpu.memory_space<vmem>>, vector<1x8x64xf32>
    %c0_12 = arith.constant 0 : index
    %c0_13 = arith.constant 0 : index
    %7 = vector.load %arg11[%c0_12, %c0_13] : memref<1x64xf32, #tpu.memory_space<vmem>>, vector<1x64xf32>
    %8 = vector.shape_cast %7 : vector<1x64xf32> to vector<1x64x1xf32>
    %c0_14 = arith.constant 0 : index
    %c0_15 = arith.constant 0 : index
    %9 = vector.load %arg12[%c0_14, %c0_15] : memref<1x64xf32, #tpu.memory_space<vmem>>, vector<1x64xf32>
    %10 = vector.shape_cast %9 : vector<1x64xf32> to vector<1x1x64xf32>
    %c0_16 = arith.constant 0 : index
    %c0_17 = arith.constant 0 : index
    %11 = vector.load %arg13[%c0_16, %c0_17] : memref<1x64xbf16, #tpu.memory_space<vmem>>, vector<1x64xbf16>
    %12 = arith.extf %11 : vector<1x64xbf16> to vector<1x64xf32>
    %c0_18 = arith.constant 0 : index
    %c0_19 = arith.constant 0 : index
    %13 = vector.load %arg14[%c0_18, %c0_19] : memref<1x64xbf16, #tpu.memory_space<vmem>>, vector<1x64xbf16>
    %14 = arith.extf %13 : vector<1x64xbf16> to vector<1x64xf32>
    %15 = tpu.iota {dimensions = array<i32: 0>} : vector<8x8xi32>
    %16 = tpu.iota {dimensions = array<i32: 1>} : vector<8x8xi32>
    %17 = arith.cmpi slt, %16, %15 : vector<8x8xi32>
    %18 = vector.shape_cast %17 : vector<8x8xi1> to vector<1x8x8xi1>
    %19 = arith.cmpi eq, %16, %15 : vector<8x8xi32>
    %20 = vector.shape_cast %19 : vector<8x8xi1> to vector<1x8x8xi1>
    %c0_20 = arith.constant 0 : index
    %c0_21 = arith.constant 0 : index
    %c0_22 = arith.constant 0 : index
    %21 = vector.load %arg3[%c0_20, %c0_21, %c0_22] : memref<1x8x64xbf16, #tpu.memory_space<vmem>>, vector<1x8x64xbf16>
    %22 = vector.shape_cast %21 : vector<1x8x64xbf16> to vector<8x64xbf16>
    %23 = arith.extf %22 : vector<8x64xbf16> to vector<8x64xf32>
    %c0_23 = arith.constant 0 : index
    %c0_24 = arith.constant 0 : index
    %c0_25 = arith.constant 0 : index
    %24 = vector.load %arg4[%c0_23, %c0_24, %c0_25] : memref<1x8x64xbf16, #tpu.memory_space<vmem>>, vector<1x8x64xbf16>
    %25 = vector.shape_cast %24 : vector<1x8x64xbf16> to vector<8x64xbf16>
    %26 = arith.extf %25 : vector<8x64xbf16> to vector<8x64xf32>
    %c0_26 = arith.constant 0 : index
    %c0_27 = arith.constant 0 : index
    %c0_28 = arith.constant 0 : index
    %27 = vector.load %arg5[%c0_26, %c0_27, %c0_28] : memref<1x8x64xbf16, #tpu.memory_space<vmem>>, vector<1x8x64xbf16>
    %28 = vector.shape_cast %27 : vector<1x8x64xbf16> to vector<8x64xbf16>
    %29 = arith.extf %28 : vector<8x64xbf16> to vector<8x64xf32>
    %c0_29 = arith.constant 0 : index
    %c0_30 = arith.constant 0 : index
    %c0_31 = arith.constant 0 : index
    %30 = vector.load %arg6[%c0_29, %c0_30, %c0_31] : memref<1x8x64xbf16, #tpu.memory_space<vmem>>, vector<1x8x64xbf16>
    %31 = vector.shape_cast %30 : vector<1x8x64xbf16> to vector<8x64xbf16>
    %32 = arith.extf %31 : vector<8x64xbf16> to vector<8x64xf32>
    %33 = vector.shape_cast %23 : vector<8x64xf32> to vector<8x1x64xf32>
    %34 = tpu.transpose %33, [1, 0, 2] : vector<8x1x64xf32> -> vector<1x8x64xf32>
    %35 = vector.shape_cast %26 : vector<8x64xf32> to vector<8x1x64xf32>
    %36 = tpu.transpose %35, [1, 0, 2] : vector<8x1x64xf32> -> vector<1x8x64xf32>
    %37 = vector.shape_cast %29 : vector<8x64xf32> to vector<8x1x64xf32>
    %38 = tpu.transpose %37, [1, 0, 2] : vector<8x1x64xf32> -> vector<1x8x64xf32>
    %39 = arith.mulf %34, %3 : vector<1x8x64xf32>
    %40 = arith.mulf %36, %4 : vector<1x8x64xf32>
    "tpu.trace_start"() <{level = 10 : i32, message = "htk,hsk->hts"}> : () -> ()
    %cst = arith.constant dense<0.000000e+00> : vector<1x8x8xf32>
    %41 = tpu.matmul %39, %40, %cst {dimension_numbers = #tpu.dot_dimension_numbers<[2], [2], [1], [1], [0, 0, 0, 1, 1, 1], [0], [0]>} : vector<1x8x64xf32>, vector<1x8x64xf32>, vector<1x8x8xf32> -> vector<1x8x8xf32>
    %cst_32 = arith.constant 0.000000e+00 : f32
    "tpu.trace_stop"() : () -> ()
    %42 = vector.broadcast %cst_32 : f32 to vector<1x8x8xf32>
    %43 = arith.select %18, %41, %42 : vector<1x8x8xi1>, vector<1x8x8xf32>
    %44 = vector.broadcast %10 : vector<1x1x64xf32> to vector<1x8x64xf32>
    %45 = arith.mulf %34, %44 : vector<1x8x64xf32>
    %46 = arith.mulf %45, %36 : vector<1x8x64xf32>
    %cst_33 = arith.constant dense<0.000000e+00> : vector<1x8xf32>
    %47 = vector.multi_reduction <add>, %46, %cst_33 [2] : vector<1x8x64xf32> to vector<1x8xf32>
    %48 = vector.shape_cast %47 : vector<1x8xf32> to vector<1x8x1xf32>
    %cst_34 = arith.constant 0.000000e+00 : f32
    %49 = vector.shape_cast %48 : vector<1x8x1xf32> to vector<1x8x1xf32>
    %50 = vector.broadcast %49 : vector<1x8x1xf32> to vector<1x8x8xf32>
    %51 = vector.broadcast %cst_34 : f32 to vector<1x8x8xf32>
    %52 = arith.select %20, %50, %51 : vector<1x8x8xi1>, vector<1x8x8xf32>
    %53 = arith.addf %43, %52 : vector<1x8x8xf32>
    %c0_35 = arith.constant 0 : index
    %c0_36 = arith.constant 0 : index
    %c0_37 = arith.constant 0 : index
    %54 = vector.load %arg18[%c0_35, %c0_36, %c0_37] : memref<1x64x64xf32, #tpu.memory_space<vmem>>, vector<1x64x64xf32>
    "tpu.trace_start"() <{level = 10 : i32, message = "hts,hsk->htk"}> : () -> ()
    %cst_38 = arith.constant dense<0.000000e+00> : vector<1x8x64xf32>
    %55 = tpu.matmul %53, %38, %cst_38 {dimension_numbers = #tpu.dot_dimension_numbers<[2], [1], [1], [2], [0, 0, 0, 1, 1, 2], [0], [0]>} : vector<1x8x8xf32>, vector<1x8x64xf32>, vector<1x8x64xf32> -> vector<1x8x64xf32>
    "tpu.trace_stop"() : () -> ()
    %56 = arith.mulf %34, %6 : vector<1x8x64xf32>
    "tpu.trace_start"() <{level = 10 : i32, message = "htk,hkj->htj"}> : () -> ()
    %cst_39 = arith.constant dense<0.000000e+00> : vector<1x8x64xf32>
    %57 = tpu.matmul %56, %54, %cst_39 {dimension_numbers = #tpu.dot_dimension_numbers<[2], [1], [1], [2], [0, 0, 0, 1, 1, 2], [0], [0]>} : vector<1x8x64xf32>, vector<1x64x64xf32>, vector<1x8x64xf32> -> vector<1x8x64xf32>
    "tpu.trace_stop"() : () -> ()
    %58 = arith.addf %55, %57 : vector<1x8x64xf32>
    %59 = vector.broadcast %8 : vector<1x64x1xf32> to vector<1x64x64xf32>
    %60 = arith.mulf %59, %54 : vector<1x64x64xf32>
    %61 = arith.mulf %36, %5 : vector<1x8x64xf32>
    "tpu.trace_start"() <{level = 10 : i32, message = "hsk,hsj->hkj"}> : () -> ()
    %cst_40 = arith.constant dense<0.000000e+00> : vector<1x64x64xf32>
    %62 = tpu.matmul %61, %38, %cst_40 {dimension_numbers = #tpu.dot_dimension_numbers<[1], [1], [2], [2], [0, 0, 0, 2, 1, 2], [0], [0]>} : vector<1x8x64xf32>, vector<1x8x64xf32>, vector<1x64x64xf32> -> vector<1x64x64xf32>
    "tpu.trace_stop"() : () -> ()
    %63 = arith.addf %60, %62 : vector<1x64x64xf32>
    %c0_41 = arith.constant 0 : index
    %c0_42 = arith.constant 0 : index
    %c0_43 = arith.constant 0 : index
    %64 = vector.load %arg18[%c0_41, %c0_42, %c0_43] : memref<1x64x64xf32, #tpu.memory_space<vmem>>, vector<1x64x64xf32>
    tpu.vector_store %arg18[%c0_41, %c0_42, %c0_43], %63 {strides = array<i32>} : memref<1x64x64xf32, #tpu.memory_space<vmem>>, vector<1x64x64xf32>,
    %cst_44 = arith.constant dense<0.000000e+00> : vector<1x8xf32>
    %65 = vector.multi_reduction <add>, %58, %cst_44 [2] : vector<1x8x64xf32> to vector<1x8xf32>
    %66 = vector.shape_cast %65 : vector<1x8xf32> to vector<1x8x1xf32>
    %cst_45 = arith.constant 6.400000e+01 : f32
    %67 = vector.broadcast %cst_45 : f32 to vector<1x8x1xf32>
    %68 = arith.divf %66, %67 : vector<1x8x1xf32>
    %69 = vector.broadcast %68 : vector<1x8x1xf32> to vector<1x8x64xf32>
    %70 = arith.subf %58, %69 : vector<1x8x64xf32>
    %71 = arith.mulf %70, %70 : vector<1x8x64xf32>
    %cst_46 = arith.constant dense<0.000000e+00> : vector<1x8xf32>
    %72 = vector.multi_reduction <add>, %71, %cst_46 [2] : vector<1x8x64xf32> to vector<1x8xf32>
    %73 = vector.shape_cast %72 : vector<1x8xf32> to vector<1x8x1xf32>
    %cst_47 = arith.constant 6.400000e+01 : f32
    %74 = vector.broadcast %cst_47 : f32 to vector<1x8x1xf32>
    %75 = arith.divf %73, %74 : vector<1x8x1xf32>
    %cst_48 = arith.constant 6.400000e-04 : f32
    %76 = vector.broadcast %cst_48 : f32 to vector<1x8x1xf32>
    %77 = arith.addf %75, %76 : vector<1x8x1xf32>
    %78 = math.rsqrt %77 : vector<1x8x1xf32>
    %79 = vector.broadcast %78 : vector<1x8x1xf32> to vector<1x8x64xf32>
    %80 = arith.mulf %70, %79 : vector<1x8x64xf32>
    %81 = tpu.transpose %80, [1, 0, 2] : vector<1x8x64xf32> -> vector<8x1x64xf32>
    %82 = vector.shape_cast %81 : vector<8x1x64xf32> to vector<8x64xf32>
    %83 = vector.broadcast %12 : vector<1x64xf32> to vector<8x64xf32>
    %84 = arith.mulf %82, %83 : vector<8x64xf32>
    %85 = vector.broadcast %14 : vector<1x64xf32> to vector<8x64xf32>
    %86 = arith.addf %84, %85 : vector<8x64xf32>
    %cst_49 = arith.constant 0.000000e+00 : f32
    %87 = vector.broadcast %cst_49 : f32 to vector<8x64xf32>
    %88 = arith.subf %87, %32 : vector<8x64xf32>
    %89 = math.exp %88 : vector<8x64xf32>
    %cst_50 = arith.constant 1.000000e+00 : f32
    %90 = vector.broadcast %cst_50 : f32 to vector<8x64xf32>
    %91 = arith.addf %90, %89 : vector<8x64xf32>
    %cst_51 = arith.constant 1.000000e+00 : f32
    %92 = vector.broadcast %cst_51 : f32 to vector<8x64xf32>
    %93 = arith.divf %92, %91 : vector<8x64xf32>
    %94 = arith.mulf %32, %93 : vector<8x64xf32>
    %95 = arith.mulf %86, %94 : vector<8x64xf32>
    %96 = arith.truncf %95 : vector<8x64xf32> to vector<8x64xbf16>
    %c0_52 = arith.constant 0 : index
    %c0_53 = arith.constant 0 : index
    %c0_54 = arith.constant 0 : index
    %97 = vector.load %arg16[%c0_52, %c0_53, %c0_54] : memref<1x8x64xbf16, #tpu.memory_space<vmem>>, vector<1x8x64xbf16>
    %98 = vector.shape_cast %97 : vector<1x8x64xbf16> to vector<8x64xbf16>
    %99 = vector.shape_cast %96 : vector<8x64xbf16> to vector<1x8x64xbf16>
    tpu.vector_store %arg16[%c0_52, %c0_53, %c0_54], %99 {strides = array<i32>} : memref<1x8x64xbf16, #tpu.memory_space<vmem>>, vector<1x8x64xbf16>,
    %c0_i32_55 = arith.constant 0 : i32
    %100 = arith.cmpi eq, %arg2, %c0_i32_55 : i32
    %101 = arith.extui %100 : i1 to i32
    %c0_i32_56 = arith.constant 0 : i32
    %102 = arith.cmpi ne, %101, %c0_i32_56 : i32
    scf.if %102 {
      %c0_57 = arith.constant 0 : index
      %c0_58 = arith.constant 0 : index
      %c0_59 = arith.constant 0 : index
      %103 = vector.load %arg18[%c0_57, %c0_58, %c0_59] : memref<1x64x64xf32, #tpu.memory_space<vmem>>, vector<1x64x64xf32>
      %104 = arith.truncf %103 : vector<1x64x64xf32> to vector<1x64x64xbf16>
      %c0_60 = arith.constant 0 : index
      %c0_61 = arith.constant 0 : index
      %c0_62 = arith.constant 0 : index
      %c0_63 = arith.constant 0 : index
      %105 = vector.load %arg17[%c0_60, %c0_61, %c0_62, %c0_63] : memref<1x1x64x64xbf16, #tpu.memory_space<vmem>>, vector<1x1x64x64xbf16>
      %106 = vector.shape_cast %105 : vector<1x1x64x64xbf16> to vector<1x64x64xbf16>
      %107 = vector.shape_cast %104 : vector<1x64x64xbf16> to vector<1x1x64x64xbf16>
      tpu.vector_store %arg17[%c0_60, %c0_61, %c0_62, %c0_63], %107 {strides = array<i32>} : memref<1x1x64x64xbf16, #tpu.memory_space<vmem>>, vector<1x1x64x64xbf16>,
    } else {
    }
    return
  }
  func.func @transform_0(%arg0: i32, %arg1: i32, %arg2: i32) -> (i32, i32, i32) {
    %c0_i32 = arith.constant 0 : i32
    return %arg0, %arg2, %arg1 : i32, i32, i32
  }
  func.func @transform_1(%arg0: i32, %arg1: i32, %arg2: i32) -> (i32, i32, i32) {
    %c0_i32 = arith.constant 0 : i32
    return %arg0, %arg2, %arg1 : i32, i32, i32
  }
  func.func @transform_2(%arg0: i32, %arg1: i32, %arg2: i32) -> (i32, i32, i32) {
    %c0_i32 = arith.constant 0 : i32
    return %arg0, %arg2, %arg1 : i32, i32, i32
  }
  func.func @transform_3(%arg0: i32, %arg1: i32, %arg2: i32) -> (i32, i32, i32) {
    %c0_i32 = arith.constant 0 : i32
    return %arg0, %arg2, %arg1 : i32, i32, i32
  }
  func.func @transform_4(%arg0: i32, %arg1: i32, %arg2: i32) -> (i32, i32, i32) {
    %c0_i32 = arith.constant 0 : i32
    %c0_i32_0 = arith.constant 0 : i32
    %c0_i32_1 = arith.constant 0 : i32
    return %arg1, %c0_i32, %c0_i32_0 : i32, i32, i32
  }
  func.func @transform_5(%arg0: i32, %arg1: i32, %arg2: i32) -> (i32, i32, i32) {
    %c0_i32 = arith.constant 0 : i32
    %c0_i32_0 = arith.constant 0 : i32
    %c0_i32_1 = arith.constant 0 : i32
    return %arg1, %c0_i32, %c0_i32_0 : i32, i32, i32
  }
  func.func @transform_6(%arg0: i32, %arg1: i32, %arg2: i32) -> (i32, i32, i32) {
    %c0_i32 = arith.constant 0 : i32
    %c0_i32_0 = arith.constant 0 : i32
    %c0_i32_1 = arith.constant 0 : i32
    return %arg1, %c0_i32, %c0_i32_0 : i32, i32, i32
  }
  func.func @transform_7(%arg0: i32, %arg1: i32, %arg2: i32) -> (i32, i32, i32) {
    %c0_i32 = arith.constant 0 : i32
    %c0_i32_0 = arith.constant 0 : i32
    %c0_i32_1 = arith.constant 0 : i32
    return %arg1, %c0_i32, %c0_i32_0 : i32, i32, i32
  }
  func.func @transform_8(%arg0: i32, %arg1: i32, %arg2: i32) -> (i32, i32) {
    %c0_i32 = arith.constant 0 : i32
    %c0_i32_0 = arith.constant 0 : i32
    return %arg1, %c0_i32 : i32, i32
  }
  func.func @transform_9(%arg0: i32, %arg1: i32, %arg2: i32) -> (i32, i32) {
    %c0_i32 = arith.constant 0 : i32
    %c0_i32_0 = arith.constant 0 : i32
    return %arg1, %c0_i32 : i32, i32
  }
  func.func @transform_10(%arg0: i32, %arg1: i32, %arg2: i32) -> (i32, i32) {
    %c0_i32 = arith.constant 0 : i32
    %c0_i32_0 = arith.constant 0 : i32
    return %c0_i32, %arg1 : i32, i32
  }
  func.func @transform_11(%arg0: i32, %arg1: i32, %arg2: i32) -> (i32, i32) {
    %c0_i32 = arith.constant 0 : i32
    %c0_i32_0 = arith.constant 0 : i32
    return %c0_i32, %arg1 : i32, i32
  }
  func.func @transform_12(%arg0: i32, %arg1: i32, %arg2: i32) -> (i32, i32, i32, i32) {
    %c0_i32 = arith.constant 0 : i32
    %c0_i32_0 = arith.constant 0 : i32
    %c0_i32_1 = arith.constant 0 : i32
    return %arg0, %arg1, %c0_i32, %c0_i32_0 : i32, i32, i32, i32
  }
  func.func @transform_13(%arg0: i32, %arg1: i32, %arg2: i32) -> (i32, i32, i32) {
    %c0_i32 = arith.constant 0 : i32
    return %arg0, %arg2, %arg1 : i32, i32, i32
  }
  func.func @transform_14(%arg0: i32, %arg1: i32, %arg2: i32) -> (i32, i32, i32, i32) {
    %c0_i32 = arith.constant 0 : i32
    %c0_i32_0 = arith.constant 0 : i32
    %c0_i32_1 = arith.constant 0 : i32
    return %arg0, %arg1, %c0_i32, %c0_i32_0 : i32, i32, i32, i32
  }
}

module attributes {stable_mosaic.version = 11 : i64} {
  func.func @_mix_matmul_kernel(%arg0: i32, %arg1: i32, %arg2: i32, %arg3: i32, %arg4: i32, %arg5: memref<1x8x64xbf16, #tpu.memory_space<vmem>>, %arg6: memref<1x1x1x64xbf16, #tpu.memory_space<vmem>>, %arg7: memref<1x1x64xbf16, #tpu.memory_space<vmem>>, %arg8: memref<1x64x64xbf16, #tpu.memory_space<vmem>>, %arg9: memref<1x1x8x64xbf16, #tpu.memory_space<vmem>>, %arg10: memref<8x64xf32, #tpu.memory_space<vmem>>) attributes {dimension_semantics = [#tpu.dimension_semantics<parallel>, #tpu.dimension_semantics<parallel>, #tpu.dimension_semantics<parallel>, #tpu.dimension_semantics<parallel>, #tpu.dimension_semantics<arbitrary>], iteration_bounds = array<i64: 1, 2, 1, 1, 1>, scalar_prefetch = 0 : i64, scratch_operands = 1 : i64, tpu.core_type = #tpu.core_type<tc>, window_params = [{transform_indices = @transform_0, window_bounds = array<i64: 1, 8, 64>}, {transform_indices = @transform_1, window_bounds = array<i64: 1, 1, 1, 64>}, {transform_indices = @transform_2, window_bounds = array<i64: 1, 1, 64>}, {transform_indices = @transform_3, window_bounds = array<i64: 1, 64, 64>}, {transform_indices = @transform_4, window_bounds = array<i64: 1, 1, 8, 64>}]} {
    %c0_i32 = arith.constant 0 : i32
    %0 = arith.cmpi eq, %arg4, %c0_i32 : i32
    %1 = arith.extui %0 : i1 to i32
    %c0_i32_0 = arith.constant 0 : i32
    %2 = arith.cmpi ne, %1, %c0_i32_0 : i32
    scf.if %2 {
      %cst_19 = arith.constant 0.000000e+00 : f32
      %24 = vector.broadcast %cst_19 : f32 to vector<8x64xf32>
      %c0_20 = arith.constant 0 : index
      %c0_21 = arith.constant 0 : index
      %25 = vector.load %arg10[%c0_20, %c0_21] : memref<8x64xf32, #tpu.memory_space<vmem>>, vector<8x64xf32>
      tpu.vector_store %arg10[%c0_20, %c0_21], %24 {strides = array<i32>} : memref<8x64xf32, #tpu.memory_space<vmem>>, vector<8x64xf32>,
    } else {
    }
    %c0 = arith.constant 0 : index
    %c0_1 = arith.constant 0 : index
    %c0_2 = arith.constant 0 : index
    %3 = vector.load %arg5[%c0, %c0_1, %c0_2] : memref<1x8x64xbf16, #tpu.memory_space<vmem>>, vector<1x8x64xbf16>
    %4 = vector.shape_cast %3 : vector<1x8x64xbf16> to vector<8x64xbf16>
    %c0_3 = arith.constant 0 : index
    %c0_4 = arith.constant 0 : index
    %c0_5 = arith.constant 0 : index
    %c0_6 = arith.constant 0 : index
    %5 = vector.load %arg6[%c0_3, %c0_4, %c0_5, %c0_6] : memref<1x1x1x64xbf16, #tpu.memory_space<vmem>>, vector<1x1x1x64xbf16>
    %6 = vector.shape_cast %5 : vector<1x1x1x64xbf16> to vector<1x64xbf16>
    %7 = vector.extract_strided_slice %4 {offsets = [0, 0], sizes = [7, 64], strides = [1, 1]} : vector<8x64xbf16> to vector<7x64xbf16>
    %8 = tpu.concatenate %6, %7 in 0 : vector<1x64xbf16>, vector<7x64xbf16> -> vector<8x64xbf16>
    %c0_7 = arith.constant 0 : index
    %c0_8 = arith.constant 0 : index
    %c0_9 = arith.constant 0 : index
    %9 = vector.load %arg7[%c0_7, %c0_8, %c0_9] : memref<1x1x64xbf16, #tpu.memory_space<vmem>>, vector<1x1x64xbf16>
    %10 = vector.shape_cast %9 : vector<1x1x64xbf16> to vector<1x64xbf16>
    %11 = arith.subf %4, %8 : vector<8x64xbf16>
    %12 = vector.broadcast %10 : vector<1x64xbf16> to vector<8x64xbf16>
    %13 = arith.mulf %11, %12 : vector<8x64xbf16>
    %14 = arith.addf %8, %13 : vector<8x64xbf16>
    %c0_10 = arith.constant 0 : index
    %c0_11 = arith.constant 0 : index
    %15 = vector.load %arg10[%c0_10, %c0_11] : memref<8x64xf32, #tpu.memory_space<vmem>>, vector<8x64xf32>
    %c0_12 = arith.constant 0 : index
    %c0_13 = arith.constant 0 : index
    %c0_14 = arith.constant 0 : index
    %16 = vector.load %arg8[%c0_12, %c0_13, %c0_14] : memref<1x64x64xbf16, #tpu.memory_space<vmem>>, vector<1x64x64xbf16>
    %17 = vector.shape_cast %16 : vector<1x64x64xbf16> to vector<64x64xbf16>
    %cst = arith.constant dense<0.000000e+00> : vector<8x64xf32>
    %18 = tpu.matmul %14, %17, %cst {dimension_numbers = #tpu.dot_dimension_numbers<[1], [0], [0], [1], [0, 0, 1, 1], [], []>} : vector<8x64xbf16>, vector<64x64xbf16>, vector<8x64xf32> -> vector<8x64xf32>
    %19 = arith.addf %15, %18 : vector<8x64xf32>
    %c0_15 = arith.constant 0 : index
    %c0_16 = arith.constant 0 : index
    %20 = vector.load %arg10[%c0_15, %c0_16] : memref<8x64xf32, #tpu.memory_space<vmem>>, vector<8x64xf32>
    tpu.vector_store %arg10[%c0_15, %c0_16], %19 {strides = array<i32>} : memref<8x64xf32, #tpu.memory_space<vmem>>, vector<8x64xf32>,
    %c0_i32_17 = arith.constant 0 : i32
    %21 = arith.cmpi eq, %arg4, %c0_i32_17 : i32
    %22 = arith.extui %21 : i1 to i32
    %c0_i32_18 = arith.constant 0 : i32
    %23 = arith.cmpi ne, %22, %c0_i32_18 : i32
    scf.if %23 {
      %c0_19 = arith.constant 0 : index
      %c0_20 = arith.constant 0 : index
      %24 = vector.load %arg10[%c0_19, %c0_20] : memref<8x64xf32, #tpu.memory_space<vmem>>, vector<8x64xf32>
      %cst_21 = arith.constant 0.000000e+00 : f32
      %25 = vector.broadcast %cst_21 : f32 to vector<8x64xf32>
      %26 = arith.subf %25, %24 : vector<8x64xf32>
      %27 = math.exp %26 : vector<8x64xf32>
      %cst_22 = arith.constant 1.000000e+00 : f32
      %28 = vector.broadcast %cst_22 : f32 to vector<8x64xf32>
      %29 = arith.addf %28, %27 : vector<8x64xf32>
      %cst_23 = arith.constant 1.000000e+00 : f32
      %30 = vector.broadcast %cst_23 : f32 to vector<8x64xf32>
      %31 = arith.divf %30, %29 : vector<8x64xf32>
      %32 = arith.truncf %31 : vector<8x64xf32> to vector<8x64xbf16>
      %c0_24 = arith.constant 0 : index
      %c0_25 = arith.constant 0 : index
      %c0_26 = arith.constant 0 : index
      %c0_27 = arith.constant 0 : index
      %33 = vector.load %arg9[%c0_24, %c0_25, %c0_26, %c0_27] : memref<1x1x8x64xbf16, #tpu.memory_space<vmem>>, vector<1x1x8x64xbf16>
      %34 = vector.shape_cast %33 : vector<1x1x8x64xbf16> to vector<8x64xbf16>
      %35 = vector.shape_cast %32 : vector<8x64xbf16> to vector<1x1x8x64xbf16>
      tpu.vector_store %arg9[%c0_24, %c0_25, %c0_26, %c0_27], %35 {strides = array<i32>} : memref<1x1x8x64xbf16, #tpu.memory_space<vmem>>, vector<1x1x8x64xbf16>,
    } else {
    }
    return
  }
  func.func @transform_0(%arg0: i32, %arg1: i32, %arg2: i32, %arg3: i32, %arg4: i32) -> (i32, i32, i32) {
    %c0_i32 = arith.constant 0 : i32
    return %arg1, %arg2, %arg4 : i32, i32, i32
  }
  func.func @transform_1(%arg0: i32, %arg1: i32, %arg2: i32, %arg3: i32, %arg4: i32) -> (i32, i32, i32, i32) {
    %c0_i32 = arith.constant 0 : i32
    %c0_i32_0 = arith.constant 0 : i32
    return %arg1, %arg2, %c0_i32, %arg4 : i32, i32, i32, i32
  }
  func.func @transform_2(%arg0: i32, %arg1: i32, %arg2: i32, %arg3: i32, %arg4: i32) -> (i32, i32, i32) {
    %c0_i32 = arith.constant 0 : i32
    %c0_i32_0 = arith.constant 0 : i32
    return %arg0, %c0_i32, %arg4 : i32, i32, i32
  }
  func.func @transform_3(%arg0: i32, %arg1: i32, %arg2: i32, %arg3: i32, %arg4: i32) -> (i32, i32, i32) {
    %c0_i32 = arith.constant 0 : i32
    return %arg0, %arg4, %arg3 : i32, i32, i32
  }
  func.func @transform_4(%arg0: i32, %arg1: i32, %arg2: i32, %arg3: i32, %arg4: i32) -> (i32, i32, i32, i32) {
    %c0_i32 = arith.constant 0 : i32
    return %arg0, %arg1, %arg2, %arg3 : i32, i32, i32, i32
  }
}

module attributes {stable_mosaic.version = 11 : i64} {
  func.func @_mix_matmul_kernel(%arg0: i32, %arg1: i32, %arg2: i32, %arg3: i32, %arg4: i32, %arg5: memref<1x8x64xbf16, #tpu.memory_space<vmem>>, %arg6: memref<1x1x1x64xbf16, #tpu.memory_space<vmem>>, %arg7: memref<1x1x64xbf16, #tpu.memory_space<vmem>>, %arg8: memref<1x64x224xbf16, #tpu.memory_space<vmem>>, %arg9: memref<1x1x8x224xbf16, #tpu.memory_space<vmem>>, %arg10: memref<8x224xf32, #tpu.memory_space<vmem>>) attributes {dimension_semantics = [#tpu.dimension_semantics<parallel>, #tpu.dimension_semantics<parallel>, #tpu.dimension_semantics<parallel>, #tpu.dimension_semantics<parallel>, #tpu.dimension_semantics<arbitrary>], iteration_bounds = array<i64: 1, 2, 1, 1, 1>, scalar_prefetch = 0 : i64, scratch_operands = 1 : i64, tpu.core_type = #tpu.core_type<tc>, window_params = [{transform_indices = @transform_0, window_bounds = array<i64: 1, 8, 64>}, {transform_indices = @transform_1, window_bounds = array<i64: 1, 1, 1, 64>}, {transform_indices = @transform_2, window_bounds = array<i64: 1, 1, 64>}, {transform_indices = @transform_3, window_bounds = array<i64: 1, 64, 224>}, {transform_indices = @transform_4, window_bounds = array<i64: 1, 1, 8, 224>}]} {
    %c0_i32 = arith.constant 0 : i32
    %0 = arith.cmpi eq, %arg4, %c0_i32 : i32
    %1 = arith.extui %0 : i1 to i32
    %c0_i32_0 = arith.constant 0 : i32
    %2 = arith.cmpi ne, %1, %c0_i32_0 : i32
    scf.if %2 {
      %cst_19 = arith.constant 0.000000e+00 : f32
      %24 = vector.broadcast %cst_19 : f32 to vector<8x224xf32>
      %c0_20 = arith.constant 0 : index
      %c0_21 = arith.constant 0 : index
      %25 = vector.load %arg10[%c0_20, %c0_21] : memref<8x224xf32, #tpu.memory_space<vmem>>, vector<8x224xf32>
      tpu.vector_store %arg10[%c0_20, %c0_21], %24 {strides = array<i32>} : memref<8x224xf32, #tpu.memory_space<vmem>>, vector<8x224xf32>,
    } else {
    }
    %c0 = arith.constant 0 : index
    %c0_1 = arith.constant 0 : index
    %c0_2 = arith.constant 0 : index
    %3 = vector.load %arg5[%c0, %c0_1, %c0_2] : memref<1x8x64xbf16, #tpu.memory_space<vmem>>, vector<1x8x64xbf16>
    %4 = vector.shape_cast %3 : vector<1x8x64xbf16> to vector<8x64xbf16>
    %c0_3 = arith.constant 0 : index
    %c0_4 = arith.constant 0 : index
    %c0_5 = arith.constant 0 : index
    %c0_6 = arith.constant 0 : index
    %5 = vector.load %arg6[%c0_3, %c0_4, %c0_5, %c0_6] : memref<1x1x1x64xbf16, #tpu.memory_space<vmem>>, vector<1x1x1x64xbf16>
    %6 = vector.shape_cast %5 : vector<1x1x1x64xbf16> to vector<1x64xbf16>
    %7 = vector.extract_strided_slice %4 {offsets = [0, 0], sizes = [7, 64], strides = [1, 1]} : vector<8x64xbf16> to vector<7x64xbf16>
    %8 = tpu.concatenate %6, %7 in 0 : vector<1x64xbf16>, vector<7x64xbf16> -> vector<8x64xbf16>
    %c0_7 = arith.constant 0 : index
    %c0_8 = arith.constant 0 : index
    %c0_9 = arith.constant 0 : index
    %9 = vector.load %arg7[%c0_7, %c0_8, %c0_9] : memref<1x1x64xbf16, #tpu.memory_space<vmem>>, vector<1x1x64xbf16>
    %10 = vector.shape_cast %9 : vector<1x1x64xbf16> to vector<1x64xbf16>
    %11 = arith.subf %4, %8 : vector<8x64xbf16>
    %12 = vector.broadcast %10 : vector<1x64xbf16> to vector<8x64xbf16>
    %13 = arith.mulf %11, %12 : vector<8x64xbf16>
    %14 = arith.addf %8, %13 : vector<8x64xbf16>
    %c0_10 = arith.constant 0 : index
    %c0_11 = arith.constant 0 : index
    %15 = vector.load %arg10[%c0_10, %c0_11] : memref<8x224xf32, #tpu.memory_space<vmem>>, vector<8x224xf32>
    %c0_12 = arith.constant 0 : index
    %c0_13 = arith.constant 0 : index
    %c0_14 = arith.constant 0 : index
    %16 = vector.load %arg8[%c0_12, %c0_13, %c0_14] : memref<1x64x224xbf16, #tpu.memory_space<vmem>>, vector<1x64x224xbf16>
    %17 = vector.shape_cast %16 : vector<1x64x224xbf16> to vector<64x224xbf16>
    %cst = arith.constant dense<0.000000e+00> : vector<8x224xf32>
    %18 = tpu.matmul %14, %17, %cst {dimension_numbers = #tpu.dot_dimension_numbers<[1], [0], [0], [1], [0, 0, 1, 1], [], []>} : vector<8x64xbf16>, vector<64x224xbf16>, vector<8x224xf32> -> vector<8x224xf32>
    %19 = arith.addf %15, %18 : vector<8x224xf32>
    %c0_15 = arith.constant 0 : index
    %c0_16 = arith.constant 0 : index
    %20 = vector.load %arg10[%c0_15, %c0_16] : memref<8x224xf32, #tpu.memory_space<vmem>>, vector<8x224xf32>
    tpu.vector_store %arg10[%c0_15, %c0_16], %19 {strides = array<i32>} : memref<8x224xf32, #tpu.memory_space<vmem>>, vector<8x224xf32>,
    %c0_i32_17 = arith.constant 0 : i32
    %21 = arith.cmpi eq, %arg4, %c0_i32_17 : i32
    %22 = arith.extui %21 : i1 to i32
    %c0_i32_18 = arith.constant 0 : i32
    %23 = arith.cmpi ne, %22, %c0_i32_18 : i32
    scf.if %23 {
      %c0_19 = arith.constant 0 : index
      %c0_20 = arith.constant 0 : index
      %24 = vector.load %arg10[%c0_19, %c0_20] : memref<8x224xf32, #tpu.memory_space<vmem>>, vector<8x224xf32>
      %cst_21 = arith.constant 0.000000e+00 : f32
      %25 = vector.broadcast %cst_21 : f32 to vector<8x224xf32>
      %26 = arith.maximumf %24, %25 : vector<8x224xf32>
      %27 = arith.mulf %26, %26 : vector<8x224xf32>
      %28 = arith.truncf %27 : vector<8x224xf32> to vector<8x224xbf16>
      %c0_22 = arith.constant 0 : index
      %c0_23 = arith.constant 0 : index
      %c0_24 = arith.constant 0 : index
      %c0_25 = arith.constant 0 : index
      %29 = vector.load %arg9[%c0_22, %c0_23, %c0_24, %c0_25] : memref<1x1x8x224xbf16, #tpu.memory_space<vmem>>, vector<1x1x8x224xbf16>
      %30 = vector.shape_cast %29 : vector<1x1x8x224xbf16> to vector<8x224xbf16>
      %31 = vector.shape_cast %28 : vector<8x224xbf16> to vector<1x1x8x224xbf16>
      tpu.vector_store %arg9[%c0_22, %c0_23, %c0_24, %c0_25], %31 {strides = array<i32>} : memref<1x1x8x224xbf16, #tpu.memory_space<vmem>>, vector<1x1x8x224xbf16>,
    } else {
    }
    return
  }
  func.func @transform_0(%arg0: i32, %arg1: i32, %arg2: i32, %arg3: i32, %arg4: i32) -> (i32, i32, i32) {
    %c0_i32 = arith.constant 0 : i32
    return %arg1, %arg2, %arg4 : i32, i32, i32
  }
  func.func @transform_1(%arg0: i32, %arg1: i32, %arg2: i32, %arg3: i32, %arg4: i32) -> (i32, i32, i32, i32) {
    %c0_i32 = arith.constant 0 : i32
    %c0_i32_0 = arith.constant 0 : i32
    return %arg1, %arg2, %c0_i32, %arg4 : i32, i32, i32, i32
  }
  func.func @transform_2(%arg0: i32, %arg1: i32, %arg2: i32, %arg3: i32, %arg4: i32) -> (i32, i32, i32) {
    %c0_i32 = arith.constant 0 : i32
    %c0_i32_0 = arith.constant 0 : i32
    return %arg0, %c0_i32, %arg4 : i32, i32, i32
  }
  func.func @transform_3(%arg0: i32, %arg1: i32, %arg2: i32, %arg3: i32, %arg4: i32) -> (i32, i32, i32) {
    %c0_i32 = arith.constant 0 : i32
    return %arg0, %arg4, %arg3 : i32, i32, i32
  }
  func.func @transform_4(%arg0: i32, %arg1: i32, %arg2: i32, %arg3: i32, %arg4: i32) -> (i32, i32, i32, i32) {
    %c0_i32 = arith.constant 0 : i32
    return %arg0, %arg1, %arg2, %arg3 : i32, i32, i32, i32
  }
}

module attributes {stable_mosaic.version = 11 : i64} {
  func.func @_matmul_kernel(%arg0: i32, %arg1: i32, %arg2: i32, %arg3: memref<16x224xbf16, #tpu.memory_space<vmem>>, %arg4: memref<224x64xbf16, #tpu.memory_space<vmem>>, %arg5: memref<16x64xbf16, #tpu.memory_space<vmem>>, %arg6: memref<16x64xbf16, #tpu.memory_space<vmem>>, %arg7: memref<16x64xf32, #tpu.memory_space<vmem>>) attributes {dimension_semantics = [#tpu.dimension_semantics<parallel>, #tpu.dimension_semantics<parallel>, #tpu.dimension_semantics<arbitrary>], iteration_bounds = array<i64: 1, 1, 1>, scalar_prefetch = 0 : i64, scratch_operands = 1 : i64, tpu.core_type = #tpu.core_type<tc>, window_params = [{transform_indices = @transform_0, window_bounds = array<i64: 16, 224>}, {transform_indices = @transform_1, window_bounds = array<i64: 224, 64>}, {transform_indices = @transform_2, window_bounds = array<i64: 16, 64>}, {transform_indices = @transform_3, window_bounds = array<i64: 16, 64>}]} {
    %c0_i32 = arith.constant 0 : i32
    %0 = arith.cmpi eq, %arg2, %c0_i32 : i32
    %1 = arith.extui %0 : i1 to i32
    %c0_i32_0 = arith.constant 0 : i32
    %2 = arith.cmpi ne, %1, %c0_i32_0 : i32
    scf.if %2 {
      %cst_10 = arith.constant 0.000000e+00 : f32
      %12 = vector.broadcast %cst_10 : f32 to vector<16x64xf32>
      %c0_11 = arith.constant 0 : index
      %c0_12 = arith.constant 0 : index
      %13 = vector.load %arg7[%c0_11, %c0_12] : memref<16x64xf32, #tpu.memory_space<vmem>>, vector<16x64xf32>
      tpu.vector_store %arg7[%c0_11, %c0_12], %12 {strides = array<i32>} : memref<16x64xf32, #tpu.memory_space<vmem>>, vector<16x64xf32>,
    } else {
    }
    %c0 = arith.constant 0 : index
    %c0_1 = arith.constant 0 : index
    %3 = vector.load %arg7[%c0, %c0_1] : memref<16x64xf32, #tpu.memory_space<vmem>>, vector<16x64xf32>
    %c0_2 = arith.constant 0 : index
    %c0_3 = arith.constant 0 : index
    %4 = vector.load %arg3[%c0_2, %c0_3] : memref<16x224xbf16, #tpu.memory_space<vmem>>, vector<16x224xbf16>
    %c0_4 = arith.constant 0 : index
    %c0_5 = arith.constant 0 : index
    %5 = vector.load %arg4[%c0_4, %c0_5] : memref<224x64xbf16, #tpu.memory_space<vmem>>, vector<224x64xbf16>
    %cst = arith.constant dense<0.000000e+00> : vector<16x64xf32>
    %6 = tpu.matmul %4, %5, %cst {dimension_numbers = #tpu.dot_dimension_numbers<[1], [0], [0], [1], [0, 0, 1, 1], [], []>} : vector<16x224xbf16>, vector<224x64xbf16>, vector<16x64xf32> -> vector<16x64xf32>
    %7 = arith.addf %3, %6 : vector<16x64xf32>
    %c0_6 = arith.constant 0 : index
    %c0_7 = arith.constant 0 : index
    %8 = vector.load %arg7[%c0_6, %c0_7] : memref<16x64xf32, #tpu.memory_space<vmem>>, vector<16x64xf32>
    tpu.vector_store %arg7[%c0_6, %c0_7], %7 {strides = array<i32>} : memref<16x64xf32, #tpu.memory_space<vmem>>, vector<16x64xf32>,
    %c0_i32_8 = arith.constant 0 : i32
    %9 = arith.cmpi eq, %arg2, %c0_i32_8 : i32
    %10 = arith.extui %9 : i1 to i32
    %c0_i32_9 = arith.constant 0 : i32
    %11 = arith.cmpi ne, %10, %c0_i32_9 : i32
    scf.if %11 {
      %c0_10 = arith.constant 0 : index
      %c0_11 = arith.constant 0 : index
      %12 = vector.load %arg7[%c0_10, %c0_11] : memref<16x64xf32, #tpu.memory_space<vmem>>, vector<16x64xf32>
      %c0_12 = arith.constant 0 : index
      %c0_13 = arith.constant 0 : index
      %13 = vector.load %arg5[%c0_12, %c0_13] : memref<16x64xbf16, #tpu.memory_space<vmem>>, vector<16x64xbf16>
      %14 = arith.extf %13 : vector<16x64xbf16> to vector<16x64xf32>
      %15 = arith.mulf %12, %14 : vector<16x64xf32>
      %16 = arith.truncf %15 : vector<16x64xf32> to vector<16x64xbf16>
      %c0_14 = arith.constant 0 : index
      %c0_15 = arith.constant 0 : index
      %17 = vector.load %arg6[%c0_14, %c0_15] : memref<16x64xbf16, #tpu.memory_space<vmem>>, vector<16x64xbf16>
      tpu.vector_store %arg6[%c0_14, %c0_15], %16 {strides = array<i32>} : memref<16x64xbf16, #tpu.memory_space<vmem>>, vector<16x64xbf16>,
    } else {
    }
    return
  }
  func.func @transform_0(%arg0: i32, %arg1: i32, %arg2: i32) -> (i32, i32) {
    %c0_i32 = arith.constant 0 : i32
    return %arg0, %arg2 : i32, i32
  }
  func.func @transform_1(%arg0: i32, %arg1: i32, %arg2: i32) -> (i32, i32) {
    %c0_i32 = arith.constant 0 : i32
    return %arg2, %arg1 : i32, i32
  }
  func.func @transform_2(%arg0: i32, %arg1: i32, %arg2: i32) -> (i32, i32) {
    %c0_i32 = arith.constant 0 : i32
    return %arg0, %arg1 : i32, i32
  }
  func.func @transform_3(%arg0: i32, %arg1: i32, %arg2: i32) -> (i32, i32) {
    %c0_i32 = arith.constant 0 : i32
    return %arg0, %arg1 : i32, i32
  }
}

module attributes {stable_mosaic.version = 11 : i64} {
  func.func @_matmul_kernel(%arg0: i32, %arg1: i32, %arg2: i32, %arg3: memref<16x64xbf16, #tpu.memory_space<vmem>>, %arg4: memref<64x256xbf16, #tpu.memory_space<vmem>>, %arg5: memref<16x256xbf16, #tpu.memory_space<vmem>>, %arg6: memref<16x256xf32, #tpu.memory_space<vmem>>) attributes {dimension_semantics = [#tpu.dimension_semantics<parallel>, #tpu.dimension_semantics<parallel>, #tpu.dimension_semantics<arbitrary>], iteration_bounds = array<i64: 1, 1, 1>, scalar_prefetch = 0 : i64, scratch_operands = 1 : i64, tpu.core_type = #tpu.core_type<tc>, window_params = [{transform_indices = @transform_0, window_bounds = array<i64: 16, 64>}, {transform_indices = @transform_1, window_bounds = array<i64: 64, 256>}, {transform_indices = @transform_2, window_bounds = array<i64: 16, 256>}]} {
    %c0_i32 = arith.constant 0 : i32
    %0 = arith.cmpi eq, %arg2, %c0_i32 : i32
    %1 = arith.extui %0 : i1 to i32
    %c0_i32_0 = arith.constant 0 : i32
    %2 = arith.cmpi ne, %1, %c0_i32_0 : i32
    scf.if %2 {
      %cst_10 = arith.constant 0.000000e+00 : f32
      %12 = vector.broadcast %cst_10 : f32 to vector<16x256xf32>
      %c0_11 = arith.constant 0 : index
      %c0_12 = arith.constant 0 : index
      %13 = vector.load %arg6[%c0_11, %c0_12] : memref<16x256xf32, #tpu.memory_space<vmem>>, vector<16x256xf32>
      tpu.vector_store %arg6[%c0_11, %c0_12], %12 {strides = array<i32>} : memref<16x256xf32, #tpu.memory_space<vmem>>, vector<16x256xf32>,
    } else {
    }
    %c0 = arith.constant 0 : index
    %c0_1 = arith.constant 0 : index
    %3 = vector.load %arg6[%c0, %c0_1] : memref<16x256xf32, #tpu.memory_space<vmem>>, vector<16x256xf32>
    %c0_2 = arith.constant 0 : index
    %c0_3 = arith.constant 0 : index
    %4 = vector.load %arg3[%c0_2, %c0_3] : memref<16x64xbf16, #tpu.memory_space<vmem>>, vector<16x64xbf16>
    %c0_4 = arith.constant 0 : index
    %c0_5 = arith.constant 0 : index
    %5 = vector.load %arg4[%c0_4, %c0_5] : memref<64x256xbf16, #tpu.memory_space<vmem>>, vector<64x256xbf16>
    %cst = arith.constant dense<0.000000e+00> : vector<16x256xf32>
    %6 = tpu.matmul %4, %5, %cst {dimension_numbers = #tpu.dot_dimension_numbers<[1], [0], [0], [1], [0, 0, 1, 1], [], []>} : vector<16x64xbf16>, vector<64x256xbf16>, vector<16x256xf32> -> vector<16x256xf32>
    %7 = arith.addf %3, %6 : vector<16x256xf32>
    %c0_6 = arith.constant 0 : index
    %c0_7 = arith.constant 0 : index
    %8 = vector.load %arg6[%c0_6, %c0_7] : memref<16x256xf32, #tpu.memory_space<vmem>>, vector<16x256xf32>
    tpu.vector_store %arg6[%c0_6, %c0_7], %7 {strides = array<i32>} : memref<16x256xf32, #tpu.memory_space<vmem>>, vector<16x256xf32>,
    %c0_i32_8 = arith.constant 0 : i32
    %9 = arith.cmpi eq, %arg2, %c0_i32_8 : i32
    %10 = arith.extui %9 : i1 to i32
    %c0_i32_9 = arith.constant 0 : i32
    %11 = arith.cmpi ne, %10, %c0_i32_9 : i32
    scf.if %11 {
      %c0_10 = arith.constant 0 : index
      %c0_11 = arith.constant 0 : index
      %12 = vector.load %arg6[%c0_10, %c0_11] : memref<16x256xf32, #tpu.memory_space<vmem>>, vector<16x256xf32>
      %13 = arith.truncf %12 : vector<16x256xf32> to vector<16x256xbf16>
      %c0_12 = arith.constant 0 : index
      %c0_13 = arith.constant 0 : index
      %14 = vector.load %arg5[%c0_12, %c0_13] : memref<16x256xbf16, #tpu.memory_space<vmem>>, vector<16x256xbf16>
      tpu.vector_store %arg5[%c0_12, %c0_13], %13 {strides = array<i32>} : memref<16x256xbf16, #tpu.memory_space<vmem>>, vector<16x256xbf16>,
    } else {
    }
    return
  }
  func.func @transform_0(%arg0: i32, %arg1: i32, %arg2: i32) -> (i32, i32) {
    %c0_i32 = arith.constant 0 : i32
    return %arg0, %arg2 : i32, i32
  }
  func.func @transform_1(%arg0: i32, %arg1: i32, %arg2: i32) -> (i32, i32) {
    %c0_i32 = arith.constant 0 : i32
    return %arg2, %arg1 : i32, i32
  }
  func.func @transform_2(%arg0: i32, %arg1: i32, %arg2: i32) -> (i32, i32) {
    %c0_i32 = arith.constant 0 : i32
    return %arg0, %arg1 : i32, i32
  }
}

</mosaic_0001>

<bundles_post_ra>
// kernel: rwkv5_forward.19
= control target key start
LH: loop header
LB: loop body
LE: loop exit
PB: predicated region body
PF: predicated region fallthrough
CT: control target
= control target key end

     0   :  { %vm18_vm0 = vcmask 523264   ;;  %v48_v19 = vlaneseq  ;;  %vm70_vm1 = vcmask 519168   ;;  %s128_s0 = inlined_call_operand.vmem [shape: bf16[16,64], index: 0, kind: input, shape index: {}]   ;;  %s129_s1 = inlined_call_operand.vmem [shape: bf16[1,64], index: 1, kind: input, shape index: {}]   ;;  %s130_s2 = inlined_call_operand.vmem [shape: bf16[1,64], index: 2, kind: input, shape index: {}]   ;;  %s131_s3 = inlined_call_operand.vmem [shape: bf16[16,64], index: 3, kind: output, shape index: {}]  }
   0x1   :  { %v82_v0 = vld [vmem:[%s128_s0] sm:$0xff]  }
   0x2   :  { %v83_v1 = vunpack.c.l.bf16 %v82_v0  ;;  %v84_v2 = vunpack.c.h.bf16 %v82_v0  ;;  %v49_v22 = vshrl.u32 %v48_v19, 7  ;;  %v46_v23 = vld [vmem:[%s129_s1] sm:$0x1] }
   0x3   :  { %v54_v24 = vld [vmem:[%s130_s2] sm:$0x1]  ;;  %v47_v25 = vunpack.c.l.bf16 %v46_v23 }
   0x4   :  { %v19_v3 = vsel %vm18_vm0, %v83_v1, 0.0  ;;  %v22_v4 = vsel %vm18_vm0, %v84_v2, 0.0  ;;  %v50_v26 = vsub.s32 0, %v49_v22  ;;  %v55_v27 = vunpack.c.l.bf16 %v54_v24 }
   0x5   :  { %20 = vadd.xlane.f32.xlu0 %v19_v3 }
   0x6   :  { %v51_v28 = vrot.slane %v47_v25, %v50_v26  ;;  %v59_v30 = vrot.slane %v55_v27, %v50_v26 }
   0x9   :  { %23 = vadd.xlane.f32.xlu0 %v22_v4 }
  0x8e   :  { %v21_v5 = vpop.xlane.xlu0 %20 }
  0x8f   :  { %v26_v6 = vmul.f32 0.015625, %v21_v5 }
  0x91   :  { %v28_v7 = vsub.f32 %v83_v1, %v26_v6 }
  0x92   :  { %v24_v8 = vpop.xlane.xlu0 %23 }
  0x93   :  { %v27_v9 = vmul.f32 0.015625, %v24_v8  ;;  %v30_v10 = vmul.f32 %v28_v7, %v28_v7 }
  0x95   :  { %v29_v11 = vsub.f32 %v84_v2, %v27_v9  ;;  %v32_v12 = vsel %vm18_vm0, %v30_v10, 0.0 }
  0x96   :  { %33 = vadd.xlane.f32.xlu1 %v32_v12 }
  0x97   :  { %v31_v13 = vmul.f32 %v29_v11, %v29_v11 }
  0x99   :  { %v35_v14 = vsel %vm18_vm0, %v31_v13, 0.0 }
  0x9a   :  { %36 = vadd.xlane.f32.xlu1 %v35_v14 }
 0x11f   :  { %v34_v15 = vpop.xlane.xlu1 %33 }
 0x120   :  { %v38_v16 = vmul.f32 0.015625, %v34_v15 }
 0x122   :  { %v40_v17 = vadd.f32 1e-05, %v38_v16 }
 0x123   :  { %v37_v18 = vpop.xlane.xlu1 %36 }
 0x124   :  { %85 = vrsqrt.f32 %v40_v17  ;;  %v39_v20 = vmul.f32 0.015625, %v37_v18 }
 0x126   :  { %v41_v21 = vadd.f32 1e-05, %v39_v20 }
 0x128   :  { %87 = vrsqrt.f32 %v41_v21 }
 0x131   :  { %v86_v29 = vpop.eup %85 }
 0x132   :  { %v44_v31 = vmul.f32 %v86_v29, %v28_v7 }
 0x134   :  { %v52_v32 = vmul.f32 %v51_v28, %v44_v31 }
 0x135   :  { %v88_v33 = vpop.eup %87 }
 0x136   :  { %v60_v34 = vadd.f32 %v59_v30, %v52_v32  ;;  %v45_v35 = vmul.f32 %v88_v33, %v29_v11 }
 0x138   :  { %v79_v36 = vpack.c.bf16 %v60_v34, %v60_v34  ;;  %v53_v37 = vmul.f32 %v51_v28, %v45_v35 }
 0x13a   :  { %71 = vst.msk [vmem:[%s131_s3] sm:$0xf] %vm70_vm1, %v79_v36  ;;  %v61_v38 = vadd.f32 %v59_v30, %v53_v37 }
 0x13c   :  { %v80_v39 = vpack.c.bf16 %v61_v38, %v61_v38 }
 0x13e   :  { %72 = vst.msk [vmem:[%s131_s3 + $0x4] sm:$0xf] %vm70_vm1, %v80_v39 }

// kernel: rwkv5_forward.21
= control target key start
LH: loop header
LB: loop body
LE: loop exit
PB: predicated region body
PF: predicated region fallthrough
CT: control target
= control target key end

     0   :  { %s816_s15 = smov 0   ;;  %s818_s16 = smov 0   ;;  %s887_s0 = inlined_call_operand.vmem [shape: bf16[2,8,64], index: 0, kind: input, shape index: {}]   ;;  %s888_s1 = inlined_call_operand.vmem [shape: bf16[2,1,1,64], index: 1, kind: input, shape index: {}]   ;;  %s889_s2 = inlined_call_operand.vmem [shape: bf16[4,1,64], index: 2, kind: input, shape index: {}]   ;;  %s890_s3 = inlined_call_operand.vmem [shape: bf16[4,64,64], index: 3, kind: input, shape index: {}]   ;;  %s891_s4 = inlined_call_operand.vmem [shape: bf16[4,2,8,64], index: 4, kind: output, shape index: {}]  }
   0x1   :  { %s820_s17 = smov 0   ;;  %s822_s18 = smov 0  }
   0x2   :  { %s824_s19 = smov 0  }
   0x3 LB: > { %s43_s20 = sadd.s32 1, %s779_s17  ;;  %s47_s21 = sadd.s32 1, %s783_s18  ;;  %s787_s19 = sphi %s824_s19, %s14_s19   ;;  %s783_s18 = sphi %s822_s18, %s895_s18   ;;  %s779_s17 = sphi %s820_s17, %s894_s17   ;;  %s775_s16 = sphi %s818_s16, %s893_s16   ;;  %s771_s15 = sphi %s816_s15, %s892_s15  }
   0x4   : > { %p45_p0 = scmp.ge.s32.totalorder %s43_s20, 2  ;;  %p670_p1 = scmp.ge.s32.totalorder %s787_s19, 1 }
   0x5   : > { %p263_p2 = scmp.lt.s32.totalorder %s787_s19, 9 }
   0x6   : > { %s897_s20 = smov (%p45_p0, %s43_s20), 0  ;;  %s899_s21 = smov (!%p45_p0, %s47_s21), %s783_s18 }
   0x7   : > { %p264_p3 = pnand %p670_p1, %p263_p2  ;;  %p49_p4 = scmp.ge.s32.totalorder %s899_s21, 4 }
   0x8   : > { %p349_p5 = scmp.lt.s32.totalorder (!%p264_p3), %s775_s16, 3  ;;  %p330_p6 = scmp.lt.s32.totalorder (!%p264_p3), %s771_s15, 1 }
   0x9   : > { %s901_s21 = smov (%p49_p4, %s899_s21), 0  ;;  %267 = sbr.rel (%p264_p3) target bundleno = 239 (0xef), region = 36 }
   0xe   : > { %vm387_vm0 = vcmask 523264   ;;  %v789_v0 = vmov 0.0   ;;  %vm790_vm1 = vmmov 0   ;;  %s903_s16 = smov (!%p349_p5, %s775_s16), 3  ;;  %s905_s15 = smov (!%p330_p6, %s771_s15), 1  ;;  %v411_v2 = vlaneseq }
   0xf   : > { %690 = vmatprep.subr.bf16.mxu0 %v789_v0  ;;  %698 = vmatprep.mubr.msk.bf16.mxu0 %vm790_vm1, %v789_v0  ;;  %388 = vst.msk [vmem:[#allocation2] sm:$0xff] %vm387_vm0, %v789_v0  ;;  %s684_s22 = sshll.u32 %s903_s16, 5  ;;  %s671_s26 = sshll.u32 %s905_s15, 2  ;;  %vm402_vm2 = vcmask 1040384   ;;  %vm403_vm3 = vsmask.f32 256 }
  0x10   : > { %s366_s25 = scalar_lea.vmem %s890_s3, %s684_s22  ;;  %s339_s29 = scalar_lea.vmem %s887_s0, %s671_s26  ;;  %v412_v5 = vshrl.u32 %v411_v2, 7  ;;  %vm404_vm4 = vmand %vm402_vm2, %vm403_vm3  ;;  %vm501_vm5 = vcmask 519168  }
  0x11   : > { %v744_v1 = vld [vmem:[%s366_s25 + $0x18] sm:$0xff]   ;;  %s674_s30 = sshll.u32 %s903_s16, 1  ;;  %v745_v3 = vld [vmem:[%s366_s25 + $0x10] sm:$0xff]   ;;  %s354_s7 = scalar_lea.vmem %s889_s2, %s903_s16  ;;  %v389_v4 = vld [vmem:[%s339_s29] sm:$0xf] }
  0x12   : > { %691 = vmatpush3.bf16.msra.mxu0 %v744_v1  ;;  %s860_s8 = sadd.s32 %s674_s30, %s905_s15  ;;  %v676_v6 = vcombine.low %v389_v4, %v389_v4  ;;  %v406_v7 = vld [vmem:[%s354_s7] sm:$0x1]  ;;  %v746_v8 = vld [vmem:[%s366_s25 + $0x8] sm:$0xff]   ;;  %s348_s11 = scalar_lea.vmem %s888_s1, %s905_s15  ;;  %v413_v12 = vsub.s32 0, %v412_v5 }
  0x13   : > { %692 = vmatprep.subr.bf16.mxu0 %v789_v0  ;;  %v409_v11 = vpack.i.b16 %v406_v7, %v406_v7  ;;  %v747_v14 = vld [vmem:[%s366_s25] sm:$0xff]   ;;  %s675_s12 = sshll.u32 %s860_s8, 2 }
  0x14   : > { %v395_v9 = vshrl.u32 %v676_v6, 16  ;;  %v398_v10 = vshll.u32 %v676_v6, 16  ;;  %v390_v15 = vld [vmem:[%s348_s11] sm:$0x1]  ;;  %s381_s15 = scalar_lea.vmem %s891_s4, %s675_s12 }
  0x15   : > { %v414_v17 = vrot.slane %v409_v11, %v413_v12 }
  0x16   : > { %693 = vmatpush3.bf16.msra.mxu0 %v745_v3  ;;  %v397_v13 = vrot.slane %v395_v9, 7  ;;  %v417_v22 = vld [vmem:[#allocation2] sm:$0xff] }
  0x17   : > { %694 = vmatprep.subr.bf16.mxu0 %v789_v0 }
  0x18   : > { %v400_v16 = vor.u32 %v398_v10, %v397_v13 }
  0x1a   : > { %695 = vmatpush3.bf16.msra.mxu0 %v746_v8  ;;  %v405_v18 = vsel %vm404_vm4, %v390_v15, %v400_v16 }
  0x1b   : > { %696 = vmatprep.subr.bf16.mxu0 %v789_v0  ;;  %v407_v19 = vsub.bf16 %v389_v4, %v405_v18 }
  0x1d   : > { %v415_v20 = vmul.bf16 %v414_v17, %v407_v19 }
  0x1e   : > { %697 = vmatpush3.bf16.msra.mxu0 %v747_v14 }
  0x1f   : > { %v416_v21 = vadd.bf16 %v415_v20, %v405_v18 }
  0x21   : > { %699 = vmatmul.mubr.msk.bf16.vlgmr.msra.gmra.mxu0 %vm387_vm0, %v416_v21 }
  0xe1   : > { %v488_v23 = vpop.f32.mrf.mxu0 }
  0xe2   : > { %v494_v24 = vadd.f32 %v488_v23, %v417_v22 }
  0xe3   : > { %v700_v25 = vpop.f32.mrf.mxu0 }
  0xe4   : > { %495 = vst.msk [vmem:[#allocation2] sm:$0xff] %vm387_vm0, %v494_v24 }
  0xe5   : > { %v491_v26 = vpop.f32.mrf.mxu0 }
  0xe7   : > { %v701_v27 = vpop.f32.mrf.mxu0 }
  0xeb   : > { %v499_v28 = vld [vmem:[#allocation2] sm:$0xff] }
  0xec   : > { %v500_v29 = vpack.c.bf16 %v499_v28, %v499_v28 }
  0xee   : > { %502 = vst.msk [vmem:[%s381_s15] sm:$0xf] %vm501_vm5, %v500_v29 }
  0xef PF: > { %s14_s19 = sadd.s32 1, %s787_s19   ;;  %s892_s15 = smov %s779_s17 }
  0xf0   : > { %p11_p7 = scmp.ge.s32.totalorder %s14_s19, 10   ;;  %s893_s16 = smov %s783_s18 }
  0xf1   : > { %s894_s17 = smov %s897_s20  ;;  %s895_s18 = smov %s901_s21 }
  0xf2   :  { %13 = sbr.rel (!%p11_p7) target bundleno = 3 (0x3), region = 83 }

// kernel: rwkv5_forward.23
= control target key start
LH: loop header
LB: loop body
LE: loop exit
PB: predicated region body
PF: predicated region fallthrough
CT: control target
= control target key end

     0   :  { %vm16_vm0 = vcmask 523264   ;;  %v163_v0 = vmov 0.0   ;;  %vm164_vm1 = vmmov 0   ;;  %vm122_vm2 = vcmask 519168   ;;  %s206_s1 = inlined_call_operand.vmem [shape: bf16[64,64], index: 1, kind: input, shape index: {}]   ;;  %s207_s0 = inlined_call_operand.vmem [shape: bf16[16,64], index: 0, kind: input, shape index: {}]   ;;  %s208_s2 = inlined_call_operand.vmem [shape: bf16[16,64], index: 2, kind: output, shape index: {}]  }
   0x1   :  { %144 = vmatprep.subr.bf16.mxu0 %v163_v0  ;;  %v158_v1 = vld [vmem:[%s206_s1 + $0x18] sm:$0xff]   ;;  %152 = vmatprep.mubr.msk.bf16.mxu0 %vm164_vm1, %v163_v0  ;;  %17 = vst.msk [vmem:[#allocation2] sm:$0xff] %vm16_vm0, %v163_v0  ;;  %18 = vst.msk [vmem:[#allocation2 + $0x8] sm:$0xff] %vm16_vm0, %v163_v0  ;;  %v159_v2 = vld [vmem:[%s206_s1 + $0x10] sm:$0xff]  }
   0x2   :  { %145 = vmatpush3.bf16.msra.mxu0 %v158_v1  ;;  %v160_v3 = vld [vmem:[%s206_s1 + $0x8] sm:$0xff]   ;;  %v161_v4 = vld [vmem:[%s206_s1] sm:$0xff]  }
   0x3   :  { %146 = vmatprep.subr.bf16.mxu0 %v163_v0  ;;  %v162_v5 = vld [vmem:[%s207_s0] sm:$0xff]  }
   0x6   :  { %147 = vmatpush3.bf16.msra.mxu0 %v159_v2 }
   0x7   :  { %148 = vmatprep.subr.bf16.mxu0 %v163_v0 }
   0x8   :  { %v19_v6 = vld [vmem:[#allocation2] sm:$0xff]  ;;  %v20_v10 = vld [vmem:[#allocation2 + $0x8] sm:$0xff] }
   0xa   :  { %149 = vmatpush3.bf16.msra.mxu0 %v160_v3 }
   0xb   :  { %150 = vmatprep.subr.bf16.mxu0 %v163_v0 }
   0xe   :  { %151 = vmatpush3.bf16.msra.mxu0 %v161_v4 }
  0x11   :  { %153 = vmatmul.mubr.msk.bf16.vlgmr.msra.gmra.mxu0 %vm16_vm0, %v162_v5 }
  0xd1   :  { %v98_v7 = vpop.f32.mrf.mxu0 }
  0xd2   :  { %v105_v8 = vadd.f32 %v98_v7, %v19_v6 }
  0xd3   :  { %v154_v9 = vpop.f32.mrf.mxu0 }
  0xd4   :  { %107 = vst.msk [vmem:[#allocation2] sm:$0xff] %vm16_vm0, %v105_v8 }
  0xd5   :  { %v101_v11 = vpop.f32.mrf.mxu0 }
  0xd6   :  { %v106_v12 = vadd.f32 %v101_v11, %v20_v10 }
  0xd7   :  { %v155_v13 = vpop.f32.mrf.mxu0 }
  0xd8   :  { %108 = vst.msk [vmem:[#allocation2 + $0x8] sm:$0xff] %vm16_vm0, %v106_v12 }
  0xdb   :  { %v112_v14 = vld [vmem:[#allocation2] sm:$0xff] }
  0xdc   :  { %v137_v15 = vpack.c.bf16 %v112_v14, %v112_v14 }
  0xde   :  { %123 = vst.msk [vmem:[%s208_s2] sm:$0xf] %vm122_vm2, %v137_v15 }
  0xdf   :  { %v113_v16 = vld [vmem:[#allocation2 + $0x8] sm:$0xff] }
  0xe0   :  { %v138_v17 = vpack.c.bf16 %v113_v16, %v113_v16 }
  0xe2   :  { %124 = vst.msk [vmem:[%s208_s2 + $0x4] sm:$0xf] %vm122_vm2, %v138_v17 }

// kernel: rwkv5_forward.26
= control target key start
LH: loop header
LB: loop body
LE: loop exit
PB: predicated region body
PF: predicated region fallthrough
CT: control target
= control target key end

     0   :  { %s796_s15 = smov 0   ;;  %s798_s16 = smov 0   ;;  %s858_s0 = inlined_call_operand.vmem [shape: bf16[2,8,64], index: 0, kind: input, shape index: {}]   ;;  %s859_s1 = inlined_call_operand.vmem [shape: bf16[2,1,1,64], index: 1, kind: input, shape index: {}]   ;;  %s860_s2 = inlined_call_operand.vmem [shape: bf16[1,1,64], index: 2, kind: input, shape index: {}]   ;;  %s861_s3 = inlined_call_operand.vmem [shape: bf16[1,64,64], index: 3, kind: input, shape index: {}]   ;;  %s862_s4 = inlined_call_operand.vmem [shape: bf16[1,2,8,64], index: 4, kind: output, shape index: {}]  }
   0x1   :  { %s800_s17 = smov 0  }
   0x2 LB: > { %s43_s18 = sadd.s32 1, %s763_s16  ;;  %p682_p0 = scmp.ge.s32.totalorder %s767_s17, 1  ;;  %s767_s17 = sphi %s800_s17, %s14_s17   ;;  %s763_s16 = sphi %s798_s16, %s864_s16   ;;  %s759_s15 = sphi %s796_s15, %s863_s15  }
   0x3   : > { %p45_p1 = scmp.ge.s32.totalorder %s43_s18, 2  ;;  %p263_p2 = scmp.lt.s32.totalorder %s767_s17, 3 }
   0x5   : > { %s866_s18 = smov (%p45_p1, %s43_s18), 0  ;;  %p264_p3 = pnand %p682_p0, %p263_p2 }
   0x6   : > { %p330_p4 = scmp.lt.s32.totalorder (!%p264_p3), %s759_s15, 1 }
   0x7   : > { %267 = sbr.rel (%p264_p3) target bundleno = 271 (0x10f), region = 36 }
   0xc   : > { %v736_v0 = vld [vmem:[%s861_s3 + $0x18] sm:$0xff]   ;;  %v769_v1 = vmov 0.0   ;;  %v737_v2 = vld [vmem:[%s861_s3 + $0x10] sm:$0xff]   ;;  %vm770_vm0 = vmmov 0   ;;  %vm387_vm1 = vcmask 523264   ;;  %s868_s15 = smov (!%p330_p4, %s759_s15), 1  ;;  %v411_v3 = vlaneseq }
   0xd   : > { %698 = vmatprep.subr.bf16.mxu0 %v769_v1  ;;  %706 = vmatprep.mubr.msk.bf16.mxu0 %vm770_vm0, %v769_v1  ;;  %388 = vst.msk [vmem:[#allocation2] sm:$0xff] %vm387_vm1, %v769_v1  ;;  %v738_v4 = vld [vmem:[%s861_s3 + $0x8] sm:$0xff]   ;;  %s683_s25 = sshll.u32 %s868_s15, 2  ;;  %v406_v8 = vld [vmem:[%s860_s2] sm:$0x1]  ;;  %s348_s9 = scalar_lea.vmem %s859_s1, %s868_s15  ;;  %vm402_vm2 = vcmask 1040384  }
   0xe   : > { %699 = vmatpush3.bf16.msra.mxu0 %v736_v0  ;;  %s339_s28 = scalar_lea.vmem %s858_s0, %s683_s25  ;;  %v412_v6 = vshrl.u32 %v411_v3, 7  ;;  %v739_v9 = vld [vmem:[%s861_s3] sm:$0xff]   ;;  %vm403_vm3 = vsmask.f32 256  ;;  %v409_v12 = vpack.i.b16 %v406_v8, %v406_v8  ;;  %s381_s12 = scalar_lea.vmem %s862_s4, %s683_s25  ;;  %vm507_vm5 = vcmask 519168  }
   0xf   : > { %700 = vmatprep.subr.bf16.mxu0 %v769_v1  ;;  %v389_v5 = vld [vmem:[%s339_s28] sm:$0xf]  ;;  %vm404_vm4 = vmand %vm402_vm2, %vm403_vm3 }
  0x10   : > { %v685_v7 = vcombine.low %v389_v5, %v389_v5  ;;  %v413_v13 = vsub.s32 0, %v412_v6  ;;  %v390_v15 = vld [vmem:[%s348_s9] sm:$0x1] }
  0x12   : > { %701 = vmatpush3.bf16.msra.mxu0 %v737_v2  ;;  %v395_v10 = vshrl.u32 %v685_v7, 16  ;;  %v398_v11 = vshll.u32 %v685_v7, 16  ;;  %v414_v17 = vrot.slane %v409_v12, %v413_v13 }
  0x13   : > { %702 = vmatprep.subr.bf16.mxu0 %v769_v1 }
  0x14   : > { %v397_v14 = vrot.slane %v395_v10, 7  ;;  %v417_v22 = vld [vmem:[#allocation2] sm:$0xff] }
  0x16   : > { %703 = vmatpush3.bf16.msra.mxu0 %v738_v4  ;;  %v400_v16 = vor.u32 %v398_v11, %v397_v14 }
  0x17   : > { %704 = vmatprep.subr.bf16.mxu0 %v769_v1 }
  0x18   : > { %v405_v18 = vsel %vm404_vm4, %v390_v15, %v400_v16 }
  0x19   : > { %v407_v19 = vsub.bf16 %v389_v5, %v405_v18 }
  0x1a   : > { %705 = vmatpush3.bf16.msra.mxu0 %v739_v9 }
  0x1b   : > { %v415_v20 = vmul.bf16 %v414_v17, %v407_v19 }
  0x1d   : > { %v416_v21 = vadd.bf16 %v415_v20, %v405_v18 }
  0x1f   : > { %707 = vmatmul.mubr.msk.bf16.vlgmr.msra.gmra.mxu0 %vm387_vm1, %v416_v21 }
  0xdf   : > { %v488_v23 = vpop.f32.mrf.mxu0 }
  0xe0   : > { %v494_v24 = vadd.f32 %v488_v23, %v417_v22 }
  0xe1   : > { %v708_v25 = vpop.f32.mrf.mxu0 }
  0xe2   : > { %495 = vst.msk [vmem:[#allocation2] sm:$0xff] %vm387_vm1, %v494_v24 }
  0xe3   : > { %v491_v26 = vpop.f32.mrf.mxu0 }
  0xe5   : > { %v709_v27 = vpop.f32.mrf.mxu0 }
  0xe9   : > { %v499_v28 = vld [vmem:[#allocation2] sm:$0xff] }
  0xea   : > { %v500_v29 = vsub.f32 0.0, %v499_v28 }
  0xec   : > { %v501_v30 = vmul.f32 1.442695, %v500_v29 }
  0xee   : > { %741 = vpow2.f32 %v501_v30 }
  0xfb   : > { %v742_v31 = vpop.eup %741 }
  0xfc   : > { %v503_v32 = vadd.f32 1.0, %v742_v31 }
  0xfe   : > { %743 = vrcp.f32 %v503_v32 }
 0x10b   : > { %v744_v33 = vpop.eup %743 }
 0x10c   : > { %v506_v34 = vpack.c.bf16 %v744_v33, %v744_v33 }
 0x10e   : > { %508 = vst.msk [vmem:[%s381_s12] sm:$0xf] %vm507_vm5, %v506_v34 }
 0x10f PF: > { %s14_s17 = sadd.s32 1, %s767_s17   ;;  %s863_s15 = smov %s763_s16 }
 0x110   : > { %p11_p5 = scmp.ge.s32.totalorder %s14_s17, 4   ;;  %s864_s16 = smov %s866_s18 }
 0x112   :  { %13 = sbr.rel (!%p11_p5) target bundleno = 2 (0x2), region = 83 }

// kernel: rwkv5_forward.22
= control target key start
LH: loop header
LB: loop body
LE: loop exit
PB: predicated region body
PF: predicated region fallthrough
CT: control target
= control target key end

     0   :  { %s3663_s0 = inlined_call_operand.vmem [shape: bf16[2,8,64], index: 0, kind: input, shape index: {}]   ;;  %s3664_s1 = inlined_call_operand.vmem [shape: bf16[2,8,64], index: 1, kind: input, shape index: {}]   ;;  %s3665_s2 = inlined_call_operand.vmem [shape: bf16[2,8,64], index: 2, kind: input, shape index: {}]   ;;  %s3666_s3 = inlined_call_operand.vmem [shape: bf16[2,8,64], index: 3, kind: input, shape index: {}]   ;;  %s3667_s4 = inlined_call_operand.vmem [shape: f32[1,8,64], index: 4, kind: input, shape index: {}]   ;;  %s3668_s5 = inlined_call_operand.vmem [shape: f32[1,8,64], index: 5, kind: input, shape index: {}]   ;;  %s3669_s6 = inlined_call_operand.vmem [shape: f32[1,8,64], index: 6, kind: input, shape index: {}]   ;;  %s3670_s7 = inlined_call_operand.vmem [shape: f32[1,8,64], index: 7, kind: input, shape index: {}]   ;;  %s3671_s8 = inlined_call_operand.vmem [shape: f32[1,64], index: 8, kind: input, shape index: {}]   ;;  %s3672_s9 = inlined_call_operand.vmem [shape: f32[1,64], index: 9, kind: input, shape index: {}]   ;;  %s3673_s10 = inlined_call_operand.vmem [shape: bf16[1,64], index: 10, kind: input, shape index: {}]   ;;  %s3674_s11 = inlined_call_operand.vmem [shape: bf16[1,64], index: 11, kind: input, shape index: {}]   ;;  %s3675_s12 = inlined_call_operand.vmem [shape: bf16[2,1,64,64], index: 12, kind: input, shape index: {}]   ;;  %s3676_s13 = inlined_call_operand.vmem [shape: bf16[2,8,64], index: 13, kind: output, shape index: {0}]   ;;  %s3677_s14 = inlined_call_operand.hbm [shape: bf16[2,1,64,64], index: 14, kind: output, shape index: {1}]  }
   0x1   :  { %3680 = sst [smem:[#allocation8_spill]] %s3663_s0 }
   0x2   :  { %3681 = sst [smem:[#allocation9_spill]] %s3664_s1 }
   0x3   :  { %3682 = sst [smem:[#allocation10_spill]] %s3665_s2 }
   0x4   :  { %3683 = sst [smem:[#allocation11_spill]] %s3668_s5 }
   0x5   :  { %20 = vsyncpa [#allocation4], 0 }
   0x6   :  { %22 = vsyncpa [#allocation4 + $0x1], 0  ;;  %s3120_s29 = smov 0   ;;  %s3122_s30 = smov 0  }
   0x7   :  { %s3124_s15 = smov 0   ;;  %s3126_s16 = smov 0  }
   0x8   :  { %s3128_s17 = smov 0   ;;  %s3130_s18 = smov 0  }
   0x9 LB: > { %3684 = sst [smem:[#allocation6_spill]] %s3031_s17  ;;  %s2727_s19 = sadd.s32 4294967295, %s3035_s18   ;;  %s3035_s18 = sphi %s3130_s18, %s28_s18   ;;  %s3031_s17 = sphi %s3128_s17, %s3693_s17   ;;  %s3027_s16 = sphi %s3126_s16, %s3692_s16   ;;  %s3023_s15 = sphi %s3124_s15, %s3696_s15   ;;  %s3019_s30 = sphi %s3122_s30, %s3695_s30   ;;  %s3015_s29 = sphi %s3120_s29, %s3694_s29  }
   0xa   : > { %s2728_s20 = sadd.s32 4294967294, %s3035_s18   ;;  %s47_s21 = sadd.s32 1, %s3031_s17 }
   0xb   : > { %s442_s22 = sadd.s32 1, %s3023_s15  ;;  %p49_p0 = scmp.ge.s32.totalorder %s47_s21, 2 }
   0xc   : > { %p452_p1 = scmp.ne.s32.totalorder %s3023_s15, %s3019_s30  ;;  %p453_p2 = scmp.eq.s32.totalorder %s2727_s19, 1 }
   0xd   : > { %p458_p3 = scmp.ne.s32.totalorder %s3019_s30, %s3015_s29  ;;  %s3698_s21 = smov (%p49_p0, %s47_s21), 0 }
   0xe   : > { %3685 = sst [smem:[#allocation7_spill]] %s3698_s21  ;;  %p3160_p4 = por %p453_p2, %p452_p1 }
   0xf   : > { %p459_p5 = scmp.eq.s32.totalorder %s2728_s20, 1  ;;  %s437_s24 = ssub.s32 %s3031_s17, %s3698_s21 }
  0x10   : > { %p2739_p6 = scmp.ge.s32.totalorder %s3035_s18, 1  ;;  %p440_p7 = scmp.eq.s32.totalorder %s437_s24, 0 }
  0x11   : > { %p3167_p8 = por %p459_p5, %p458_p3  ;;  %p593_p9 = scmp.lt.s32.totalorder %s3035_s18, 3 }
  0x12   : > { %s3173_s26 = scalar_select %p440_p7, %s3023_s15, %s442_s22  }
  0x13   : > { %p594_p10 = pnand %p2739_p6, %p593_p9 }
  0x14   : > { %p721_p11 = scmp.lt.s32.totalorder (!%p594_p10), %s3027_s16, 1  ;;  %s3688_s5 = sld [smem:[#allocation11_spill]] (!%p594_p10) }
  0x15   : > { %597 = sbr.rel (%p594_p10) target bundleno = 805 (0x325), region = 72  ;;  %s3689_s1 = sld [smem:[#allocation9_spill]] (!%p594_p10) }
  0x16   : > { %s3690_s0 = sld [smem:[#allocation8_spill]] (!%p594_p10)  ;;  %s718_s20 = sand.u32 (!%p594_p10), 1, %s3019_s30  }
  0x17   : > { %s3691_s2 = sld [smem:[#allocation10_spill]] (!%p594_p10)  ;;  %s2740_s22 = sshll.u32 (!%p594_p10), %s718_s20, 5 }
  0x18   : > { %s2802_s17 = sshll.u32 (!%p594_p10), %s3027_s16, 9 }
  0x19   : > { %s3575_s28 = scalar_lea.hbm (!%p594_p10), %s3677_s14, %s2802_s17  ;;  %s3042_s17 = smov (!%p594_p10), [#allocation3]  }
  0x1a   : > { %v838_v0 = vld [vmem:[%s3688_s5] sm:$0xff]  ;;  %v882_v1 = vlaneseq  ;;  %v3037_v2 = vmov 0.0   ;;  %v3038_v3 = vmov 1966171168   ;;  %s3182_s19 = scalar_select %p721_p11, %s3027_s16, 1  ;;  %vm3039_vm0 = vmmov 0  }
  0x1b   : > { %2844 = vmatprep.subr.mxu1 %v3037_v2  ;;  %v899_v4 = vunpack.c.l.s4 %v3038_v3  ;;  %2868 = vmatprep.subr.mxu0 %v3037_v2  ;;  %v1129_v7 = vcombine.high %v838_v0, %v838_v0  ;;  %v837_v8 = vld [vmem:[%s3667_s4] sm:$0xff]  ;;  %vm828_vm1 = vcmask 523264   ;;  %vm1778_vm4 = vcmask 64512   ;;  %s2963_s16 = sshll.u32 %s3042_s17, 4  ;;  %s2964_s16 = int_to_ptr.vmem [resolvable:$false] %s2963_s16 }
  0x1c   : > { %v3185_v5 = vshrl.u32 %v882_v1, 7  ;;  %2846 = vmatprep.mubr.msk.f32.mxu1 %vm3039_vm0, %v3037_v2  ;;  %2870 = vmatprep.mubr.msk.f32.mxu0 %vm3039_vm0, %v3037_v2  ;;  %s3195_s24 = sshll.u32 %s3182_s19, 2  ;;  %v2751_v10 = vld [vmem:[%s3672_s9] ss:$0 sm:$0xff]  ;;  %v1063_v12 = vcombine.high %v837_v8, %v837_v8  ;;  %vm2342_vm5 = vcmask 519168  }
  0x1d   : > { %v900_v6 = vunpack.c.0.s8 %v899_v4  ;;  %s740_s5 = scalar_lea.vmem %s3689_s1, %s3195_s24  ;;  %s730_s27 = scalar_lea.vmem %s3690_s0, %s3195_s24  ;;  %v1389_v17 = vcombine.high %v2751_v10, %v2751_v10 }
  0x1e   : > { %v890_v11 = vld [vmem:[%s740_s5] sm:$0xf]  ;;  %s2785_s5 = sshll.u32 %s3182_s19, 5  ;;  %s760_s21 = scalar_lea.vmem %s3666_s3, %s3195_s24 }
  0x1f   : > { %v3202_v9 = vsub.s32 %v900_v6, %v3185_v5  ;;  %v891_v13 = vunpack.c.l.bf16 %v890_v11  ;;  %v888_v22 = vld [vmem:[%s730_s27] sm:$0xf]  ;;  %s3336_s19 = scalar_lea.vmem %s3675_s12, %s2785_s5  ;;  %s750_s5 = scalar_lea.vmem %s3691_s2, %s3195_s24 }
  0x20   : > { %v889_v34 = vunpack.c.l.bf16 %v888_v22  ;;  %s3514_s27 = scalar_lea.vmem [#allocation3], %s2740_s22  ;;  %s3597_s22 = scalar_lea.sflag [#allocation4], %s718_s20 }
  0x21   : > { %v1136_v14 = vrot.slane %v838_v0, %v3202_v9  ;;  %v1143_v15 = vrot.slane %v1129_v7, %v3202_v9  ;;  %v3214_v16 = vrot.slane %v837_v8, %v3202_v9  ;;  %v955_v18 = vcombine.high %v891_v13, %v891_v13 }
  0x22   : > { %v962_v19 = vrot.slane %v891_v13, %v3202_v9  ;;  %v1077_v25 = vrot.slane %v1063_v12, %v3202_v9  ;;  %v3221_v26 = vrot.slane %v2751_v10, %v3202_v9  ;;  %v3241_v42 = vrot.slane %v1389_v17, %v3202_v9 }
  0x23   : > { %v1144_v20 = vcombine.high %v1136_v14, %v1136_v14  ;;  %v1145_v21 = vcombine.high %v1143_v15, %v1143_v15  ;;  %v1152_v23 = vrot.slane %v1136_v14, %v3202_v9  ;;  %v1159_v24 = vrot.slane %v1143_v15, %v3202_v9 }
  0x24   : > { %v969_v27 = vrot.slane %v955_v18, %v3202_v9  ;;  %v970_v28 = vcombine.high %v962_v19, %v962_v19  ;;  %v3225_v29 = vrot.slane %v962_v19, %v3202_v9  ;;  %v897_v49 = vcombine.high %v889_v34, %v889_v34 }
  0x25   : > { %v1166_v30 = vrot.slane %v1144_v20, %v3202_v9  ;;  %v1173_v31 = vrot.slane %v1145_v21, %v3202_v9  ;;  %v1174_v32 = vcombine.high %v1152_v23, %v1152_v23  ;;  %v1175_v33 = vcombine.high %v1159_v24, %v1159_v24 }
  0x26   : > { %v971_v35 = vcombine.high %v969_v27, %v969_v27  ;;  %v3230_v36 = vrot.slane %v969_v27, %v3202_v9  ;;  %v3233_v37 = vrot.slane %v970_v28, %v3202_v9  ;;  %v3237_v38 = vcombine.high %v3225_v29, %v3225_v29 }
  0x27   : > { %v1176_v39 = vcombine.high %v1166_v30, %v1166_v30  ;;  %v1177_v40 = vcombine.high %v1173_v31, %v1173_v31  ;;  %v1186_v41 = vmul.f32 %v1152_v23, %v3225_v29  ;;  %v904_v50 = vrot.slane %v889_v34, %v3202_v9 }
  0x28   : > { %v3244_v43 = vrot.slane %v971_v35, %v3202_v9  ;;  %v3248_v44 = vcombine.high %v3230_v36, %v3230_v36  ;;  %v3252_v45 = vcombine.high %v3233_v37, %v3233_v37  ;;  %v1187_v46 = vmul.f32 %v1166_v30, %v3233_v37 }
  0x29   : > { %v1188_v47 = vmul.f32 %v1174_v32, %v3237_v38  ;;  %v1190_v48 = vmul.f32 %v1159_v24, %v3230_v36  ;;  %v911_v56 = vrot.slane %v897_v49, %v3202_v9  ;;  %v912_v57 = vcombine.high %v904_v50, %v904_v50 }
  0x2a   : > { %v3260_v51 = vcombine.high %v3244_v43, %v3244_v43  ;;  %v1189_v52 = vmul.f32 %v1176_v39, %v3252_v45  ;;  %v1191_v53 = vmul.f32 %v1173_v31, %v3244_v43  ;;  %v1192_v54 = vmul.f32 %v1175_v33, %v3248_v44 }
  0x2b   : > { %v1259_v55 = vcombine.low %v1186_v41, %v1187_v46  ;;  %v3267_v58 = vrot.slane %v904_v50, %v3202_v9  ;;  %v1078_v62 = vcombine.high %v3214_v16, %v3214_v16  ;;  %v913_v0 = vcombine.high %v911_v56, %v911_v56 }
  0x2c   : > { %v1193_v59 = vmul.f32 %v1177_v40, %v3260_v51  ;;  %v1260_v60 = vcombine.low %v1188_v47, %v1189_v52  ;;  %v1261_v61 = vcombine.low %v1190_v48, %v1191_v53  ;;  %v3274_v3 = vrot.slane %v911_v56, %v3202_v9 }
  0x2d   : > { %v1269_v63 = vrot.slane %v1259_v55, %v3202_v9  ;;  %v3277_v4 = vrot.slane %v912_v57, %v3202_v9  ;;  %v3283_v10 = vcombine.high %v3267_v58, %v3267_v58  ;;  %v3286_v11 = vrot.slane %v913_v0, %v3202_v9 }
  0x2e   : > { %v1262_v6 = vcombine.low %v1192_v54, %v1193_v59  ;;  %v1276_v7 = vrot.slane %v1260_v60, %v3202_v9  ;;  %v1283_v8 = vrot.slane %v1261_v61, %v3202_v9  ;;  %v3290_v12 = vcombine.high %v3274_v3, %v3274_v3 }
  0x2f   : > { %v3294_v13 = vcombine.high %v3277_v4, %v3277_v4  ;;  %v1079_v14 = vcombine.high %v1077_v25, %v1077_v25  ;;  %v1086_v18 = vrot.slane %v3214_v16, %v3202_v9  ;;  %v1093_v19 = vrot.slane %v1077_v25, %v3202_v9 }
  0x30   : > { %v1290_v15 = vrot.slane %v1262_v6, %v3202_v9  ;;  %v1291_v17 = vcombine.low %v1269_v63, %v1276_v7  ;;  %v3302_v20 = vcombine.high %v3286_v11, %v3286_v11  ;;  %v1100_v21 = vrot.slane %v1078_v62, %v3202_v9 }
  0x31   : > { %v1107_v22 = vrot.slane %v1079_v14, %v3202_v9  ;;  %v1404_v23 = vcombine.high %v3221_v26, %v3221_v26  ;;  %v1108_v28 = vcombine.high %v1086_v18, %v1086_v18  ;;  %v1109_v30 = vcombine.high %v1093_v19, %v1093_v19 }
  0x32   : > { %v1292_v24 = vcombine.low %v1283_v8, %v1290_v15  ;;  %v1299_v27 = vrot.slane %v1291_v17, %v3202_v9  ;;  %v1110_v31 = vcombine.high %v1100_v21, %v1100_v21  ;;  %v1120_v25 = vmul.f32 %v1086_v18, %v3267_v58 }
  0x33   : > { %v1111_v16 = vcombine.high %v1107_v22, %v1107_v22  ;;  %v1121_v32 = vmul.f32 %v1100_v21, %v3277_v4  ;;  %v1122_v34 = vmul.f32 %v1108_v28, %v3283_v10  ;;  %v1124_v35 = vmul.f32 %v1093_v19, %v3274_v3  ;;  %v2821_v28 = vld [vmem:[%s3336_s19 + $0x18] sm:$0xff]  }
  0x34   : > { %v1306_v33 = vrot.slane %v1292_v24, %v3202_v9  ;;  %v1125_v39 = vmul.f32 %v1107_v22, %v3286_v11  ;;  %v1123_v40 = vmul.f32 %v1110_v31, %v3294_v13  ;;  %v1126_v41 = vmul.f32 %v1109_v30, %v3290_v12 }
  0x35   : > { %v1127_v46 = vmul.f32 %v1111_v16, %v3302_v20  ;;  %v1202_v48 = vcombine.low %v1120_v25, %v1121_v32  ;;  %v1405_v50 = vcombine.high %v3241_v42, %v3241_v42  ;;  %v1412_v54 = vrot.slane %v3221_v26, %v3202_v9  ;;  %v2820_v32 = vld [vmem:[%s3336_s19 + $0x10] sm:$0xff]  }
  0x36   : > { %v1307_v47 = vcombine.low %v1299_v27, %v1306_v33  ;;  %v1204_v49 = vcombine.low %v1124_v35, %v1125_v39  ;;  %v1203_v52 = vcombine.low %v1122_v34, %v1123_v40  ;;  %v1419_v57 = vrot.slane %v3241_v42, %v3202_v9  ;;  %v2819_v40 = vld [vmem:[%s3336_s19 + $0x8] sm:$0xff]  }
  0x37   : > { %v1205_v53 = vcombine.low %v1126_v41, %v1127_v46  ;;  %v1212_v55 = vrot.slane %v1202_v48, %v3202_v9  ;;  %v1426_v59 = vrot.slane %v1404_v23, %v3202_v9  ;;  %v1433_v62 = vrot.slane %v1405_v50, %v3202_v9 }
  0x38   : > { %2845 = vmatpush3.xpose.msk.msra.mxu1 %vm828_vm1, %v1307_v47  ;;  %v1226_v56 = vrot.slane %v1204_v49, %v3202_v9  ;;  %v1219_v60 = vrot.slane %v1203_v52, %v3202_v9  ;;  %v1434_v63 = vcombine.high %v1412_v54, %v1412_v54  ;;  %v1435_v26 = vcombine.high %v1419_v57, %v1419_v57  ;;  %v3360_v49 = vld [vmem:[%s3336_s19] sm:$0xff]  }
  0x39   : > { %v1233_v61 = vrot.slane %v1205_v53, %v3202_v9  ;;  %2849 = vmatprep.subr.mxu1 %v3037_v2  ;;  %v1436_v0 = vcombine.high %v1426_v59, %v1426_v59  ;;  %v1446_v42 = vmul.f32 %v1412_v54, %v3267_v58  ;;  %v1447_v6 = vmul.f32 %v1426_v59, %v3277_v4 }
  0x3a   : > { %v1234_v7 = vcombine.low %v1212_v55, %v1219_v60  ;;  %v1437_v14 = vcombine.high %v1433_v62, %v1433_v62  ;;  %v1448_v15 = vmul.f32 %v1434_v63, %v3283_v10  ;;  %v1450_v18 = vmul.f32 %v1419_v57, %v3274_v3 }
  0x3b   : > { %v1235_v8 = vcombine.low %v1226_v56, %v1233_v61  ;;  %v1449_v17 = vmul.f32 %v1436_v0, %v3294_v13  ;;  %v1451_v19 = vmul.f32 %v1433_v62, %v3286_v11  ;;  %v1452_v21 = vmul.f32 %v1435_v26, %v3290_v12 }
  0x3c   : > { %v1242_v22 = vrot.slane %v1234_v7, %v3202_v9  ;;  %v1453_v24 = vmul.f32 %v1437_v14, %v3302_v20  ;;  %v1454_v27 = vmul.f32 %v1446_v42, %v3225_v29  ;;  %v1455_v30 = vmul.f32 %v1447_v6, %v3233_v37 }
  0x3d   : > { %v1249_v23 = vrot.slane %v1235_v8, %v3202_v9  ;;  %v1456_v31 = vmul.f32 %v1448_v15, %v3237_v38  ;;  %v1457_v16 = vmul.f32 %v1449_v17, %v3252_v45  ;;  %v1458_v25 = vmul.f32 %v1450_v18, %v3230_v36 }
  0x3e   : > { %v1459_v34 = vmul.f32 %v1451_v19, %v3244_v43  ;;  %v1460_v35 = vmul.f32 %v1452_v21, %v3248_v44  ;;  %v1461_v39 = vmul.f32 %v1453_v24, %v3260_v51  ;;  %v1470_v41 = vcombine.low %v1454_v27, %v1455_v30 }
  0x3f   : > { %v1250_v33 = vcombine.low %v1242_v22, %v1249_v23  ;;  %v1471_v46 = vcombine.low %v1456_v31, %v1457_v16  ;;  %v2818_v47 = vunpack.c.h.bf16 %v2821_v28  ;;  %v2817_v48 = vunpack.c.l.bf16 %v2821_v28  ;;  %v840_v22 = vld [vmem:[%s3670_s7] sm:$0xff] }
  0x40   : > { %v1472_v50 = vcombine.low %v1458_v25, %v1459_v34  ;;  %v1473_v52 = vcombine.low %v1460_v35, %v1461_v39  ;;  %v2814_v53 = vunpack.c.h.bf16 %v2820_v32  ;;  %v2813_v54 = vunpack.c.l.bf16 %v2820_v32  ;;  %v892_v28 = vld [vmem:[%s750_s5] sm:$0xf] }
  0x41   : > { %2847 = vmatmul.mubr.msk.f32.vlgmr.msra.gmra.mxu1 %vm828_vm1, %v1250_v33  ;;  %v1480_v55 = vrot.slane %v1470_v41, %v3202_v9  ;;  %v1487_v56 = vrot.slane %v1471_v46, %v3202_v9  ;;  %836 = vst.msk [vmem:[#allocation2 + $0x38] sm:$0xff] %vm828_vm1, %v2818_v47  ;;  %835 = vst.msk [vmem:[#allocation2 + $0x30] sm:$0xff] %vm828_vm1, %v2817_v48  ;;  %v2810_v57 = vunpack.c.h.bf16 %v2819_v40  ;;  %v2809_v59 = vunpack.c.l.bf16 %v2819_v40 }
  0x42   : > { %2865 = vmatprep.mubr.msk.f32.mxu1 %vm3039_vm0, %v3037_v2  ;;  %v1494_v60 = vrot.slane %v1472_v50, %v3202_v9  ;;  %v1501_v61 = vrot.slane %v1473_v52, %v3202_v9  ;;  %834 = vst.msk [vmem:[#allocation2 + $0x28] sm:$0xff] %vm828_vm1, %v2814_v53  ;;  %833 = vst.msk [vmem:[#allocation2 + $0x20] sm:$0xff] %vm828_vm1, %v2813_v54  ;;  %v2806_v62 = vunpack.c.h.bf16 %v3360_v49  ;;  %v893_v30 = vunpack.c.l.bf16 %v892_v28 }
  0x43   : > { %v1502_v63 = vcombine.low %v1480_v55, %v1487_v56  ;;  %832 = vst.msk [vmem:[#allocation2 + $0x18] sm:$0xff] %vm828_vm1, %v2810_v57  ;;  %831 = vst.msk [vmem:[#allocation2 + $0x10] sm:$0xff] %vm828_vm1, %v2809_v59  ;;  %v1534_v23 = vcombine.high %v840_v22, %v840_v22  ;;  %v1541_v24 = vrot.slane %v840_v22, %v3202_v9  ;;  %v2805_v57 = vunpack.c.l.bf16 %v3360_v49 }
  0x44   : > { %v1503_v26 = vcombine.low %v1494_v60, %v1501_v61  ;;  %830 = vst.msk [vmem:[#allocation2 + $0x8] sm:$0xff] %vm828_vm1, %v2806_v62  ;;  %v1013_v25 = vcombine.high %v893_v30, %v893_v30  ;;  %v1020_v39 = vrot.slane %v893_v30, %v3202_v9 }
  0x45   : > { %v1510_v0 = vrot.slane %v1502_v63, %v3202_v9  ;;  %v1548_v27 = vrot.slane %v1534_v23, %v3202_v9  ;;  %v1549_v31 = vcombine.high %v1541_v24, %v1541_v24  ;;  %v1557_v32 = vrot.slane %v1541_v24, %v3202_v9  ;;  %829 = vst.msk [vmem:[#allocation2] sm:$0xff] %vm828_vm1, %v2805_v57 }
  0x46   : > { %v1517_v42 = vrot.slane %v1503_v26, %v3202_v9  ;;  %v1027_v40 = vrot.slane %v1013_v25, %v3202_v9  ;;  %v1028_v50 = vcombine.high %v1020_v39, %v1020_v39 }
  0x47   : > { %v1550_v16 = vcombine.high %v1548_v27, %v1548_v27  ;;  %v1564_v33 = vrot.slane %v1548_v27, %v3202_v9  ;;  %v1571_v34 = vrot.slane %v1549_v31, %v3202_v9  ;;  %v1579_v41 = vcombine.high %v1557_v32, %v1557_v32 }
  0x48   : > { %v1518_v6 = vcombine.low %v1510_v0, %v1517_v42  ;;  %v3379_v7 = vld [vmem:[#allocation2 + $0x38] sm:$0xff]  ;;  %v3381_v8 = vld [vmem:[#allocation2 + $0x30] sm:$0xff]  ;;  %v1029_v52 = vcombine.high %v1027_v40, %v1027_v40  ;;  %v1591_v53 = vmul.f32 %v1557_v32, %v3267_v58  ;;  %v1036_v58 = vrot.slane %v1020_v39, %v3202_v9 }
  0x49   : > { %2850 = vmatpush3.msra.mxu1 %v3379_v7  ;;  %v3386_v15 = vld [vmem:[#allocation2 + $0x28] sm:$0xff]  ;;  %v3390_v17 = vld [vmem:[#allocation2 + $0x20] sm:$0xff]  ;;  %v1578_v35 = vrot.slane %v1550_v16, %v3202_v9  ;;  %v1580_v46 = vcombine.high %v1564_v33, %v1564_v33  ;;  %v1581_v47 = vcombine.high %v1571_v34, %v1571_v34  ;;  %v1592_v54 = vmul.f32 %v1571_v34, %v3277_v4 }
  0x4a   : > { %v1520_v14 = vsel %vm828_vm1, %v1518_v6, 0.0  ;;  %2851 = vmatprep.subr.mxu1 %v3037_v2  ;;  %v3394_v18 = vld [vmem:[#allocation2 + $0x18] sm:$0xff]  ;;  %v3398_v19 = vld [vmem:[#allocation2 + $0x10] sm:$0xff]  ;;  %v1593_v55 = vmul.f32 %v1579_v41, %v3283_v10  ;;  %v1595_v59 = vmul.f32 %v1564_v33, %v3274_v3  ;;  %v1043_v10 = vrot.slane %v1027_v40, %v3202_v9 }
  0x4b   : > { %1521 = vadd.xlane.f32.xlu0 %v1520_v14  ;;  %2852 = vmatpush3.msra.mxu1 %v3381_v8  ;;  %v3402_v21 = vld [vmem:[#allocation2 + $0x8] sm:$0xff]  ;;  %v1582_v48 = vcombine.high %v1578_v35, %v1578_v35  ;;  %v1594_v56 = vmul.f32 %v1581_v47, %v3294_v13  ;;  %v1596_v60 = vmul.f32 %v1578_v35, %v3286_v11 }
  0x4c   : > { %2853 = vmatprep.subr.mxu1 %v3037_v2  ;;  %v1597_v61 = vmul.f32 %v1580_v46, %v3290_v12  ;;  %v1607_v63 = vcombine.low %v1591_v53, %v1592_v54  ;;  %v1050_v13 = vrot.slane %v1028_v50, %v3202_v9  ;;  %v1057_v49 = vrot.slane %v1029_v52, %v3202_v9  ;;  %v3446_v32 = vld [vmem:[#allocation2] sm:$0xff] }
  0x4d   : > { %2854 = vmatpush3.msra.mxu1 %v3386_v15  ;;  %v1598_v62 = vmul.f32 %v1582_v48, %v3302_v20  ;;  %v1608_v26 = vcombine.low %v1593_v55, %v1594_v56  ;;  %v1609_v4 = vcombine.low %v1595_v59, %v1596_v60  ;;  %v839_v46 = vld [vmem:[%s3669_s6] sm:$0xff] }
  0x4e   : > { %2855 = vmatprep.subr.mxu1 %v3037_v2  ;;  %v1617_v11 = vrot.slane %v1607_v63, %v3202_v9  ;;  %v1728_v0 = vcombine.low %v1036_v58, %v1050_v13  ;;  %v2753_v42 = vcombine.high %v1036_v58, %v1050_v13  ;;  %v1730_v6 = vcombine.low %v1043_v10, %v1057_v49 }
  0x4f   : > { %2856 = vmatpush3.msra.mxu1 %v3390_v17  ;;  %v1610_v3 = vcombine.low %v1597_v61, %v1598_v62  ;;  %v1624_v12 = vrot.slane %v1608_v26, %v3202_v9  ;;  %v1631_v20 = vrot.slane %v1609_v4, %v3202_v9  ;;  %v2754_v23 = vcombine.high %v1043_v10, %v1057_v49 }
  0x50   : > { %2857 = vmatprep.subr.mxu1 %v3037_v2  ;;  %v1738_v24 = vrot.slane %v1728_v0, %v3202_v9  ;;  %v1745_v27 = vrot.slane %v2753_v42, %v3202_v9  ;;  %v1752_v28 = vrot.slane %v1730_v6, %v3202_v9  ;;  %v1861_v47 = vcombine.high %v839_v46, %v839_v46 }
  0x51   : > { %2858 = vmatpush3.msra.mxu1 %v3394_v18  ;;  %v1638_v14 = vrot.slane %v1610_v3, %v3202_v9  ;;  %v1639_v22 = vcombine.low %v1617_v11, %v1624_v12  ;;  %v1759_v16 = vrot.slane %v2754_v23, %v3202_v9  ;;  %v1868_v48 = vrot.slane %v839_v46, %v3202_v9 }
  0x52   : > { %2859 = vmatprep.subr.mxu1 %v3037_v2  ;;  %v1760_v25 = vcombine.low %v1738_v24, %v1745_v27  ;;  %v1875_v50 = vrot.slane %v1861_v47, %v3202_v9 }
  0x53   : > { %2860 = vmatpush3.msra.mxu1 %v3398_v19  ;;  %v1640_v30 = vcombine.low %v1631_v20, %v1638_v14  ;;  %v1647_v31 = vrot.slane %v1639_v22, %v3202_v9  ;;  %v1761_v34 = vcombine.low %v1752_v28, %v1759_v16  ;;  %v1876_v52 = vcombine.high %v1868_v48, %v1868_v48 }
  0x54   : > { %2861 = vmatprep.subr.mxu1 %v3037_v2  ;;  %v1768_v35 = vrot.slane %v1760_v25, %v3202_v9  ;;  %v1884_v53 = vrot.slane %v1868_v48, %v3202_v9  ;;  %v1877_v54 = vcombine.high %v1875_v50, %v1875_v50  ;;  %v1891_v55 = vrot.slane %v1875_v50, %v3202_v9 }
  0x55   : > { %2862 = vmatpush3.msra.mxu1 %v3402_v21  ;;  %v1654_v33 = vrot.slane %v1640_v30, %v3202_v9  ;;  %v1775_v40 = vrot.slane %v1761_v34, %v3202_v9  ;;  %v1898_v56 = vrot.slane %v1876_v52, %v3202_v9 }
  0x56   : > { %2863 = vmatprep.subr.mxu1 %v3037_v2  ;;  %v1906_v57 = vcombine.high %v1884_v53, %v1884_v53  ;;  %v1918_v59 = vmul.f32 %v1884_v53, %v3225_v29  ;;  %v1905_v60 = vrot.slane %v1877_v54, %v3202_v9  ;;  %v1907_v61 = vcombine.high %v1891_v55, %v1891_v55 }
  0x57   : > { %2864 = vmatpush3.msra.mxu1 %v3446_v32  ;;  %v1655_v39 = vcombine.low %v1647_v31, %v1654_v33  ;;  %v1776_v41 = vcombine.low %v1768_v35, %v1775_v40  ;;  %v1908_v62 = vcombine.high %v1898_v56, %v1898_v56  ;;  %v1919_v63 = vmul.f32 %v1898_v56, %v3233_v37 }
  0x58   : > { %v1920_v26 = vmul.f32 %v1906_v57, %v3237_v38  ;;  %v1922_v58 = vmul.f32 %v1891_v55, %v3230_v36  ;;  %v1909_v4 = vcombine.high %v1905_v60, %v1905_v60  ;;  %v1923_v13 = vmul.f32 %v1905_v60, %v3244_v43 }
  0x59   : > { %2866 = vmatmul.mubr.msk.f32.vlgmr.msra.gmra.mxu1 %vm828_vm1, %v1655_v39  ;;  %2869 = vmatpush3.msra.mxu0 %v1776_v41  ;;  %v1921_v10 = vmul.f32 %v1908_v62, %v3252_v45  ;;  %v1924_v49 = vmul.f32 %v1907_v61, %v3248_v44  ;;  %v1934_v3 = vcombine.low %v1918_v59, %v1919_v63 }
  0x5a   : > { %2873 = vmatprep.subr.mxu0 %v1776_v41  ;;  %v1925_v29 = vmul.f32 %v1909_v4, %v3260_v51  ;;  %v1936_v12 = vcombine.low %v1922_v58, %v1923_v13  ;;  %v885_v51 = vand.u32 127, %v882_v1  ;;  %v3483_v1 = vld [vmem:[%s3671_s8] ss:$0 sm:$0xff] }
  0x5b   : > { %v1935_v11 = vcombine.low %v1920_v26, %v1921_v10  ;;  %v1944_v20 = vrot.slane %v1934_v3, %v3202_v9 }
  0x5c   : > { %v1937_v0 = vcombine.low %v1924_v49, %v1925_v29  ;;  %v1958_v38 = vrot.slane %v1936_v12, %v3202_v9  ;;  %vm887_vm2 = vcmp.eq.s32.totalorder %v885_v51, %v3185_v5  ;;  %vm886_vm3 = vcmp.lt.s32.totalorder %v885_v51, %v3185_v5 }
  0x5d   : > { %v1951_v37 = vrot.slane %v1935_v11, %v3202_v9 }
  0x5e   : > { %v1965_v36 = vrot.slane %v1937_v0, %v3202_v9 }
  0x5f   : > { %v1966_v42 = vcombine.low %v1944_v20, %v1951_v37 }
  0x60   : > { %v1967_v45 = vcombine.low %v1958_v38, %v1965_v36 }
  0x61   : > { %v1974_v43 = vrot.slane %v1966_v42, %v3202_v9 }
  0x62   : > { %v1981_v44 = vrot.slane %v1967_v45, %v3202_v9 }
  0x64   : > { %v1982_v6 = vcombine.low %v1974_v43, %v1981_v44 }
  0x78   : > { %1984 = vxpose.xlu0.b32.start.end [1/1] (short) (narrow) %v1982_v6, 64 }
  0xbd   : > { %875 = vbcast.lane.b32.xlu0 %v3483_v1, 312 }
  0xd4   : > { %v1522_v14 = vpop.xlane.xlu0 %1521 }
  0xd5   : > { %v1523_v22 = vsel %vm887_vm2, %v1522_v14, 0.0  ;;  %v894_v14 = vld [vmem:[%s760_s21] sm:$0xf]  ;;  %s2424_s21 = sshll.u32 %s3514_s27, 4  ;;  %s3577_s21 = int_to_ptr.vmem [resolvable:$true] %s2424_s21 }
  0xd6   : > { %s2959_s5 = scalar_lea.vmem %s3577_s21, 512  ;;  %p2966_p1 = scmp.lt.s32.totalorder %s3577_s21, %s2964_s16 }
  0xd7   : > { %p2960_p12 = scmp.ne.s32.totalorder %s3577_s21, %s2959_s5 }
  0xd9   : > { %p2961_p13 = pnand %p2960_p12, %p3160_p4 }
  0xdb   : > { %p2962_p0 = pneg %p2961_p13 }
  0xf4   : > { %v2000_v31 = vpop.trf.xlu0 }
  0xf8   : > { %v2001_v16 = vpop.trf.xlu0 }
  0xfc   : > { %v2002_v25 = vpop.trf.xlu0 }
 0x100   : > { %v2003_v33 = vpop.trf.xlu0 }
 0x101   : > { %v1379_v23 = vpop.f32.mrf.mxu1 }
 0x102   : > { %v1383_v24 = vsel %vm886_vm3, %v1379_v23, 0.0 }
 0x103   : > { %v1524_v27 = vadd.f32 %v1523_v22, %v1383_v24  ;;  %v2848_v28 = vpop.f32.mrf.mxu1  ;;  %v895_v22 = vunpack.c.l.bf16 %v894_v14 }
 0x104   : > { %v2004_v34 = vpop.trf.xlu0 }
 0x105   : > { %2871 = vmatmul.mubr.msk.f32.vlgmr.msra.gmra.mxu0 %vm1778_vm4, %v1524_v27  ;;  %v2248_v23 = vsub.f32 0.0, %v895_v22 }
 0x106   : > { %2874 = vmatpush3.msra.mxu0 %v1776_v41  ;;  %2875 = vmatprep.mubr.msk.f32.mxu0 %vm1778_vm4, %v2000_v31 }
 0x107   : > { %v2249_v24 = vmul.f32 1.442695, %v2248_v23 }
 0x108   : > { %v2005_v35 = vpop.trf.xlu0 }
 0x109   : > { %2876 = vmatmul.mubr.msk.f32.vlgmr.msra.gmra.mxu0 %vm1778_vm4, %v2001_v16  ;;  %2953 = vpow2.f32 %v2249_v24 }
 0x10a   : > { %2878 = vmatprep.mubr.msk.f32.mxu0 %vm1778_vm4, %v2002_v25 }
 0x10c   : > { %v2006_v39 = vpop.trf.xlu0 }
 0x10d   : > { %2879 = vmatmul.mubr.msk.f32.gmra.mxu0 %vm1778_vm4, %v2003_v33  ;;  %v3040_v33 = vmov 1983009808  }
 0x10e   : > { %2881 = vmatprep.mubr.msk.f32.mxu0 %vm1778_vm4, %v2004_v34  ;;  %v2177_v34 = vunpack.c.l.s4 %v3040_v33 }
 0x110   : > { %v2007_v40 = vpop.trf.xlu0 }
 0x111   : > { %2882 = vmatmul.mubr.msk.f32.gmra.mxu0 %vm1778_vm4, %v2005_v35 }
 0x112   : > { %2884 = vmatprep.mubr.msk.f32.mxu0 %vm1778_vm4, %v2006_v39  ;;  %v3041_v39 = vmov 1934713408  }
 0x115   : > { %2885 = vmatmul.mubr.msk.f32.gmra.mxu0 %vm1778_vm4, %v2007_v40  ;;  %v2192_v40 = vunpack.c.l.s4 %v3041_v39 }
 0x116   : > { %v2954_v27 = vpop.eup %2953 }
 0x117   : > { %v2251_v28 = vadd.f32 1.0, %v2954_v27 }
 0x119   : > { %v1724_v30 = vpop.f32.mrf.mxu1  ;;  %2955 = vrcp.f32 %v2251_v28 }
 0x11b   : > { %v2867_v9 = vpop.f32.mrf.mxu1 }
 0x12f   : > { %v876_v42 = vpop.permute.xlu0 %875 }
 0x130   : > { %v1859_v45 = vmul.f32 %v3379_v7, %v876_v42 }
 0x1c5   : > { %v1848_v41 = vpop.f32.mrf.mxu0 }
 0x1c6   : > { %v1849_v46 = vadd.f32 %v1848_v41, %v1724_v30 }
 0x1c7   : > { %v2872_v47 = vpop.f32.mrf.mxu0 }
 0x1c8   : > { %v2161_v48 = vsel %vm828_vm1, %v1849_v46, 0.0 }
 0x1c9   : > { %2162 = vadd.xlane.f32.xlu1 %v2161_v48  ;;  %v2877_v52 = vpop.f32.mrf.mxu0  ;;  %v2178_v48 = vunpack.c.0.s8 %v2177_v34 }
 0x1cb   : > { %v2106_v56 = vpop.f32.mrf.mxu0 }
 0x1cd   : > { %v2880_v63 = vpop.f32.mrf.mxu0 }
 0x1cf   : > { %v2116_v10 = vpop.f32.mrf.mxu0 }
 0x1d1   : > { %v2883_v38 = vpop.f32.mrf.mxu0 }
 0x1d3   : > { %v2126_v36 = vpop.f32.mrf.mxu0 }
 0x1d5   : > { %v2886_v43 = vpop.f32.mrf.mxu0 }
 0x1d6   : > { %v2152_v44 = vadd.f32 %v2886_v43, %v1859_v45 }
 0x1d7   : > { %v2136_v47 = vpop.f32.mrf.mxu0 }
 0x1d8   : > { %2160 = vst.msk [vmem:[#allocation2 + $0x38] sm:$0xff] %vm828_vm1, %v2152_v44 }
 0x1da   : > { %847 = vbcast.lane.b32.xlu1 %v3483_v1, 256 }
 0x1de   : > { %851 = vbcast.lane.b32.xlu1 %v3483_v1, 264 }
 0x1df   : > { %v2354_v6 = vld [vmem:[#allocation2 + $0x38] sm:$0xff] }
 0x1e0   : > { %v2801_v51 = vpack.c.bf16 %v2354_v6, %v2354_v6 }
 0x1e2   : > { %855 = vbcast.lane.b32.xlu1 %v3483_v1, 272  ;;  %2394 = vst.msk [vmem:[%s3514_s27 + $0x1c] sm:$0xf] %vm2342_vm5, %v2801_v51 }
 0x1e6   : > { %859 = vbcast.lane.b32.xlu1 %v3483_v1, 280 }
 0x252   : > { %v2163_v50 = vpop.xlane.xlu1 %2162 }
 0x253   : > { %v2165_v53 = vmul.f32 0.015625, %v2163_v50 }
 0x255   : > { %v3499_v54 = vsub.f32 %v1849_v46, %v2165_v53 }
 0x256   : > { %v848_v55 = vpop.permute.xlu1 %847 }
 0x257   : > { %v2167_v57 = vmul.f32 %v3499_v54, %v3499_v54  ;;  %v1852_v59 = vmul.f32 %v3446_v32, %v848_v55 }
 0x259   : > { %v2168_v60 = vsel %vm828_vm1, %v2167_v57, 0.0  ;;  %v2145_v61 = vadd.f32 %v2106_v56, %v1852_v59  ;;  %v880_v56 = vld [vmem:[%s3674_s11] sm:$0x1]  ;;  %v2181_v57 = vsub.s32 %v2178_v48, %v3185_v5 }
 0x25a   : > { %2169 = vadd.xlane.f32.xlu1 %v2168_v60  ;;  %v852_v62 = vpop.permute.xlu1 %851 }
 0x25b   : > { %2153 = vst.msk [vmem:[#allocation2] sm:$0xff] %vm828_vm1, %v2145_v61  ;;  %v1853_v26 = vmul.f32 %v3402_v21, %v852_v62  ;;  %v2226_v61 = vsub.s32 0, %v3185_v5 }
 0x25d   : > { %v2146_v58 = vadd.f32 %v2877_v52, %v1853_v26  ;;  %v2193_v52 = vunpack.c.0.s8 %v2192_v40 }
 0x25e   : > { %v856_v4 = vpop.permute.xlu1 %855 }
 0x25f   : > { %2154 = vst.msk [vmem:[#allocation2 + $0x8] sm:$0xff] %vm828_vm1, %v2146_v58  ;;  %v1854_v13 = vmul.f32 %v3398_v19, %v856_v4  ;;  %v881_v58 = vunpack.c.l.bf16 %v880_v56 }
 0x261   : > { %v2147_v32 = vadd.f32 %v2116_v10, %v1854_v13 }
 0x262   : > { %v2347_v49 = vld [vmem:[#allocation2] sm:$0xff]  ;;  %v860_v3 = vpop.permute.xlu1 %859 }
 0x263   : > { %v2794_v29 = vpack.c.bf16 %v2347_v49, %v2347_v49  ;;  %2155 = vst.msk [vmem:[#allocation2 + $0x10] sm:$0xff] %vm828_vm1, %v2147_v32  ;;  %v1855_v11 = vmul.f32 %v3394_v18, %v860_v3 }
 0x265   : > { %v2148_v21 = vadd.f32 %v2880_v63, %v1855_v11  ;;  %2387 = vst.msk [vmem:[%s3514_s27] sm:$0xf] %vm2342_vm5, %v2794_v29  ;;  %v2196_v63 = vsub.s32 %v2193_v52, %v3185_v5 }
 0x266   : > { %v2348_v19 = vld [vmem:[#allocation2 + $0x8] sm:$0xff] }
 0x267   : > { %v2795_v12 = vpack.c.bf16 %v2348_v19, %v2348_v19  ;;  %2156 = vst.msk [vmem:[#allocation2 + $0x18] sm:$0xff] %vm828_vm1, %v2148_v21 }
 0x269   : > { %2388 = vst.msk [vmem:[%s3514_s27 + $0x4] sm:$0xf] %vm2342_vm5, %v2795_v12 }
 0x26a   : > { %v2349_v20 = vld [vmem:[#allocation2 + $0x10] sm:$0xff] }
 0x26b   : > { %863 = vbcast.lane.b32.xlu1 %v3483_v1, 288  ;;  %v2796_v0 = vpack.c.bf16 %v2349_v20, %v2349_v20 }
 0x26d   : > { %2389 = vst.msk [vmem:[%s3514_s27 + $0x8] sm:$0xf] %vm2342_vm5, %v2796_v0 }
 0x26e   : > { %v2350_v18 = vld [vmem:[#allocation2 + $0x18] sm:$0xff] }
 0x26f   : > { %867 = vbcast.lane.b32.xlu1 %v3483_v1, 296  ;;  %v2797_v37 = vpack.c.bf16 %v2350_v18, %v2350_v18 }
 0x271   : > { %2390 = vst.msk [vmem:[%s3514_s27 + $0xc] sm:$0xf] %vm2342_vm5, %v2797_v37 }
 0x273   : > { %871 = vbcast.lane.b32.xlu1 %v3483_v1, 304 }
 0x2e3   : > { %v2170_v7 = vpop.xlane.xlu1 %2169 }
 0x2e4   : > { %v2171_v30 = vmul.f32 0.015625, %v2170_v7 }
 0x2e6   : > { %v2172_v9 = vadd.f32 0.00064, %v2171_v30 }
 0x2e7   : > { %v864_v31 = vpop.permute.xlu1 %863 }
 0x2e8   : > { %2957 = vrsqrt.f32 %v2172_v9  ;;  %v1856_v1 = vmul.f32 %v3390_v17, %v864_v31  ;;  %v878_v17 = vld [vmem:[%s3673_s10] sm:$0x1] }
 0x2e9   : > { %v879_v60 = vunpack.c.l.bf16 %v878_v17 }
 0x2ea   : > { %v2149_v16 = vadd.f32 %v2126_v36, %v1856_v1 }
 0x2eb   : > { %v868_v25 = vpop.permute.xlu1 %867  ;;  %v3557_v49 = vrot.slane %v879_v60, %v2226_v61 }
 0x2ec   : > { %v1857_v35 = vmul.f32 %v3386_v15, %v868_v25  ;;  %2157 = vst.msk [vmem:[#allocation2 + $0x20] sm:$0xff] %vm828_vm1, %v2149_v16  ;;  %v2956_v15 = vpop.eup %2955 }
 0x2ed   : > { %v3550_v62 = vmul.f32 %v2956_v15, %v895_v22 }
 0x2ee   : > { %v2150_v41 = vadd.f32 %v2883_v38, %v1857_v35 }
 0x2ef   : > { %v872_v46 = vpop.permute.xlu1 %871  ;;  %v2256_v3 = vrot.slane %v3550_v62, 1  ;;  %v2257_v21 = vrot.slane %v3550_v62, 2  ;;  %v2258_v19 = vrot.slane %v3550_v62, 3  ;;  %v2259_v12 = vrot.slane %v3550_v62, 4 }
 0x2f0   : > { %2158 = vst.msk [vmem:[#allocation2 + $0x28] sm:$0xff] %vm828_vm1, %v2150_v41  ;;  %v1858_v50 = vmul.f32 %v3381_v8, %v872_v46  ;;  %v2260_v36 = vrot.slane %v3550_v62, 5  ;;  %v2261_v42 = vrot.slane %v3550_v62, 6  ;;  %v2262_v22 = vrot.slane %v3550_v62, 7 }
 0x2f2   : > { %v2151_v53 = vadd.f32 %v2136_v47, %v1858_v50 }
 0x2f3   : > { %v2351_v55 = vld [vmem:[#allocation2 + $0x20] sm:$0xff] }
 0x2f4   : > { %v2798_v59 = vpack.c.bf16 %v2351_v55, %v2351_v55  ;;  %2159 = vst.msk [vmem:[#allocation2 + $0x30] sm:$0xff] %vm828_vm1, %v2151_v53 }
 0x2f5   : > { %v2958_v8 = vpop.eup %2957 }
 0x2f6   : > { %v2174_v26 = vmul.f32 %v2958_v8, %v3499_v54  ;;  %2391 = vst.msk [vmem:[%s3514_s27 + $0x10] sm:$0xf] %vm2342_vm5, %v2798_v59  ;;  %v3565_v54 = vrot.slane %v881_v58, %v2226_v61 }
 0x2f7   : > { %v2352_v4 = vld [vmem:[#allocation2 + $0x28] sm:$0xff] }
 0x2f8   : > { %v2175_v10 = vcombine.high %v2174_v26, %v3037_v2  ;;  %v2182_v13 = vrot.slane %v2174_v26, %v2181_v57  ;;  %v2799_v32 = vpack.c.bf16 %v2352_v4, %v2352_v4 }
 0x2fa   : > { %v2189_v29 = vrot.slane %v2175_v10, %v2181_v57  ;;  %v2190_v11 = vcombine.high %v2182_v13, %v3037_v2  ;;  %v2197_v5 = vrot.slane %v2182_v13, %v2196_v63  ;;  %2392 = vst.msk [vmem:[%s3514_s27 + $0x14] sm:$0xf] %vm2342_vm5, %v2799_v32 }
 0x2fb   : > { %v2353_v20 = vld [vmem:[#allocation2 + $0x30] sm:$0xff] }
 0x2fc   : > { %v2204_v0 = vrot.slane %v2190_v11, %v2196_v63  ;;  %v2205_v18 = vcombine.high %v2189_v29, %v3037_v2  ;;  %v2212_v37 = vrot.slane %v2189_v29, %v2196_v63  ;;  %v2220_v38 = vcombine.high %v2197_v5, %v3037_v2 }
 0x2fd   : > { %v2228_v45 = vmul.f32 %v3557_v49, %v2197_v5  ;;  %v2800_v43 = vpack.c.bf16 %v2353_v20, %v2353_v20 }
 0x2fe   : > { %v2219_v44 = vrot.slane %v2205_v18, %v2196_v63  ;;  %v2221_v6 = vcombine.high %v2204_v0, %v3037_v2  ;;  %v2222_v51 = vcombine.high %v2212_v37, %v3037_v2  ;;  %v2229_v14 = vmul.f32 %v3557_v49, %v2220_v38 }
 0x2ff   : > { %v2230_v23 = vmul.f32 %v3557_v49, %v2204_v0  ;;  %v2232_v24 = vmul.f32 %v3557_v49, %v2212_v37  ;;  %v2240_v27 = vadd.f32 %v3565_v54, %v2228_v45  ;;  %2393 = vst.msk [vmem:[%s3514_s27 + $0x18] sm:$0xf] %vm2342_vm5, %v2800_v43  ;;  %s2965_s27 = scalar_lea.vmem %s2964_s16, 1024 }
 0x300   : > { %v2223_v28 = vcombine.high %v2219_v44, %v3037_v2  ;;  %v2231_v7 = vmul.f32 %v3557_v49, %v2221_v6  ;;  %v2233_v30 = vmul.f32 %v3557_v49, %v2222_v51  ;;  %v2234_v9 = vmul.f32 %v3557_v49, %v2219_v44  ;;  %p2967_p2 = scmp.lt.s32.totalorder %s2965_s27, %s2959_s5 }
 0x302   : > { %p2968_p3 = por %p2967_p2, %p2966_p1 }
 0x304   : > { %p2969_p5 = pnand %p2968_p3, %p2962_p0 }
 0x306   : > { %2972 = shalt.err (!%p2969_p5)
}
 0x307   : > { %s2973_s20 = scalar_lea.hbm %s3575_s28, 512  ;;  %s2977_s17 = scalar_lea.hbm %s3677_s14, 1024 }
 0x308   : > { %p2974_p6 = scmp.ne.s32.totalorder %s3575_s28, %s2973_s20  ;;  %p2978_p10 = scmp.lt.s32.totalorder %s3575_s28, %s3677_s14 }
 0x309   : > { %p2979_p11 = scmp.lt.s32.totalorder %s2977_s17, %s2973_s20 }
 0x30a   : > { %p2975_p7 = pnand %p2974_p6, %p3160_p4 }
 0x30b   : > { %p2980_p12 = por %p2979_p11, %p2978_p10 }
 0x30c   : > { %p2976_p9 = pneg %p2975_p7 }
 0x30e   : > { %p2981_p13 = pnand %p2980_p12, %p2976_p9 }
 0x310   : > { %2984 = shalt.err (!%p2981_p13)
}
 0x311   : > { %s3043_s5 = smov 64   ;;  %s3044_s16 = smov 4   ;;  %v2241_v2 = vadd.f32 %v3565_v54, %v2229_v14  ;;  %v2242_v31 = vadd.f32 %v3565_v54, %v2230_v23  ;;  %v2244_v1 = vadd.f32 %v3565_v54, %v2232_v24  ;;  %v2271_v16 = vmul.f32 %v3550_v62, %v2240_v27 }
 0x312   : > { %2887 = dma.vmem_to_hbm [thread:$0]  (%p3160_p4), %s3577_s21, 512, %s3575_s28, %s3597_s22, %s3043_s5, %s3043_s5, %s3044_s16   ;;  %v2235_v25 = vmul.f32 %v3557_v49, %v2223_v28  ;;  %v2243_v33 = vadd.f32 %v3565_v54, %v2231_v7  ;;  %v2245_v34 = vadd.f32 %v3565_v54, %v2233_v30  ;;  %v2246_v35 = vadd.f32 %v3565_v54, %v2234_v9 }
 0x313   : > { %v2272_v39 = vmul.f32 %v2256_v3, %v2241_v2  ;;  %v2273_v40 = vmul.f32 %v2257_v21, %v2242_v31  ;;  %v2275_v41 = vmul.f32 %v2259_v12, %v2244_v1  ;;  %v2786_v17 = vpack.c.bf16 %v2271_v16, %v2271_v16  ;;  %s807_s2 = scalar_lea.vmem %s3676_s13, %s3195_s24 }
 0x314   : > { %v2247_v46 = vadd.f32 %v3565_v54, %v2235_v25  ;;  %v2274_v47 = vmul.f32 %v2258_v19, %v2243_v33  ;;  %v2276_v48 = vmul.f32 %v2260_v36, %v2245_v34  ;;  %v2277_v50 = vmul.f32 %v2261_v42, %v2246_v35 }
 0x315   : > { %v2787_v52 = vpack.c.bf16 %v2272_v39, %v2272_v39  ;;  %v2788_v53 = vpack.c.bf16 %v2273_v40, %v2273_v40  ;;  %v2790_v15 = vpack.c.bf16 %v2275_v41, %v2275_v41  ;;  %vm2320_vm6 = vcmask 1041409  }
 0x316   : > { %v2278_v55 = vmul.f32 %v2262_v22, %v2247_v46  ;;  %v2789_v56 = vpack.c.bf16 %v2274_v47, %v2274_v47  ;;  %v2791_v57 = vpack.c.bf16 %v2276_v48, %v2276_v48  ;;  %v2792_v59 = vpack.c.bf16 %v2277_v50, %v2277_v50 }
 0x317   : > { %v2312_v8 = vunpack.c.l.b16 %v2787_v52  ;;  %v2313_v60 = vunpack.c.l.b16 %v2788_v53  ;;  %vm2323_vm7 = vcmask 1042434   ;;  %v2315_v26 = vunpack.c.l.b16 %v2790_v15 }
 0x318   : > { %v2793_v61 = vpack.c.bf16 %v2278_v55, %v2278_v55  ;;  %v2314_v63 = vunpack.c.l.b16 %v2789_v56  ;;  %v2311_v58 = vunpack.c.l.b16 %v2786_v17  ;;  %v2316_v62 = vunpack.c.l.b16 %v2791_v57 }
 0x319   : > { %v2319_v4 = vrot.slane %v2312_v8, 7  ;;  %v2322_v10 = vrot.slane %v2313_v60, 6  ;;  %vm2326_vm8 = vcmask 1043459   ;;  %v2317_v13 = vunpack.c.l.b16 %v2792_v59 }
 0x31a   : > { %v2325_v32 = vrot.slane %v2314_v63, 5  ;;  %vm2329_vm9 = vcmask 1044484   ;;  %v2318_v49 = vunpack.c.l.b16 %v2793_v61  ;;  %vm2332_vm10 = vcmask 1045509  }
 0x31b   : > { %v2321_v3 = vsel %vm2320_vm6, %v2319_v4, %v2311_v58  ;;  %v2328_v11 = vrot.slane %v2315_v26, 4  ;;  %vm2335_vm11 = vcmask 1046534   ;;  %v2331_v54 = vrot.slane %v2316_v62, 3 }
 0x31c   : > { %v2324_v29 = vsel %vm2323_vm7, %v2322_v10, %v2321_v3  ;;  %vm2338_vm12 = vcmask 1047559   ;;  %v2334_v19 = vrot.slane %v2317_v13, 2  ;;  %v2337_v20 = vrot.slane %v2318_v49, 1 }
 0x31d   : > { %v2327_v5 = vsel %vm2326_vm8, %v2325_v32, %v2324_v29 }
 0x31e   : > { %v2330_v21 = vsel %vm2329_vm9, %v2328_v11, %v2327_v5 }
 0x31f   : > { %v2333_v12 = vsel %vm2332_vm10, %v2331_v54, %v2330_v21 }
 0x320   : > { %v2336_v0 = vsel %vm2335_vm11, %v2334_v19, %v2333_v12 }
 0x321   : > { %v2339_v18 = vsel %vm2338_vm12, %v2337_v20, %v2336_v0 }
 0x322   : > { %v2340_v37 = vpack.c.b16 %v2339_v18, %v2339_v18 }
 0x324   : > { %2343 = vst.msk [vmem:[%s807_s2] sm:$0xf] %vm2342_vm5, %v2340_v37 }
 0x325 PF: > { %p2893_p4 = scmp.ge.s32.totalorder %s3035_s18, 2  ;;  %s2452_s23 = sand.u32 1, %s3015_s29  }
 0x326   : > { %s2453_s21 = scalar_lea.sflag [#allocation4], %s2452_s23 }
 0x327   : > { %p2890_p0 = pnand %p2893_p4, %p3167_p8 }
 0x329   : > { %p2891_p1 = pneg %p2890_p0 }
 0x32b   : > { %3010 = dma.done.wait (%p2891_p1), %s2453_s21, 512  }
 0x32c   : > { %3012 = vsyncadd (%p2891_p1), %s2453_s21, 4294966784  ;;  %s28_s18 = sadd.s32 1, %s3035_s18   ;;  %s3692_s16 = sld [smem:[#allocation6_spill]] }
 0x32d   : > { %p25_p2 = scmp.ge.s32.totalorder %s28_s18, 4   ;;  %s3693_s17 = sld [smem:[#allocation7_spill]] }
 0x32e   : > { %s3694_s29 = smov %s3019_s30  ;;  %s3695_s30 = smov %s3023_s15 }
 0x32f   : > { %s3696_s15 = smov %s3173_s26  ;;  %27 = sbr.rel (!%p25_p2) target bundleno = 9 (0x9), region = 163 }
 0x334   :  { %2458 = vsyncpa [#allocation4], 1 }
 0x335   :  { %2460 = vsyncpa [#allocation4 + $0x1], 1 }

// kernel: rwkv5_forward.25
= control target key start
LH: loop header
LB: loop body
LE: loop exit
PB: predicated region body
PF: predicated region fallthrough
CT: control target
= control target key end

     0   :  { %s854_s15 = smov 0   ;;  %s856_s16 = smov 0   ;;  %s924_s0 = inlined_call_operand.vmem [shape: bf16[2,8,64], index: 0, kind: input, shape index: {}]   ;;  %s925_s1 = inlined_call_operand.vmem [shape: bf16[2,1,1,64], index: 1, kind: input, shape index: {}]   ;;  %s926_s2 = inlined_call_operand.vmem [shape: bf16[1,1,64], index: 2, kind: input, shape index: {}]   ;;  %s927_s3 = inlined_call_operand.vmem [shape: bf16[1,64,224], index: 3, kind: input, shape index: {}]   ;;  %s928_s4 = inlined_call_operand.vmem [shape: bf16[1,2,8,224], index: 4, kind: output, shape index: {}]  }
   0x1   :  { %s858_s17 = smov 0  }
   0x2 LB: > { %s43_s18 = sadd.s32 1, %s821_s16  ;;  %p745_p0 = scmp.ge.s32.totalorder %s825_s17, 1  ;;  %s825_s17 = sphi %s858_s17, %s14_s17   ;;  %s821_s16 = sphi %s856_s16, %s930_s16   ;;  %s817_s15 = sphi %s854_s15, %s929_s15  }
   0x3   : > { %p45_p1 = scmp.ge.s32.totalorder %s43_s18, 2  ;;  %p266_p2 = scmp.lt.s32.totalorder %s825_s17, 3 }
   0x5   : > { %s932_s18 = smov (%p45_p1, %s43_s18), 0  ;;  %p267_p3 = pnand %p745_p0, %p266_p2 }
   0x6   : > { %p338_p4 = scmp.lt.s32.totalorder (!%p267_p3), %s817_s15, 1 }
   0x7   : > { %270 = sbr.rel (%p267_p3) target bundleno = 244 (0xf4), region = 36 }
   0xc   : > { %v790_v0 = vld [vmem:[%s927_s3 + $0x34] ss:$8 sps:$4 sm:$0xff]   ;;  %v792_v1 = vld [vmem:[%s927_s3 + $0x30] ss:$8 sps:$4 sm:$0xff]   ;;  %v827_v2 = vmov 0   ;;  %s934_s15 = smov (!%p338_p4, %s817_s15), 1  ;;  %v427_v4 = vlaneseq }
   0xd   : > { %519 = vmatprep.mubr.bf16.mxu0 %v827_v2  ;;  %495 = vmatprep.subr.bf16.mxu0 %v790_v0  ;;  %v793_v3 = vld [vmem:[%s927_s3 + $0x24] ss:$8 sps:$4 sm:$0xff]   ;;  %v795_v5 = vld [vmem:[%s927_s3 + $0x20] ss:$8 sps:$4 sm:$0xff]   ;;  %v796_v6 = vld [vmem:[%s927_s3 + $0x14] ss:$8 sps:$4 sm:$0xff]   ;;  %s356_s19 = scalar_lea.vmem %s925_s1, %s934_s15 }
   0xe   : > { %496 = vmatpush1.bf16.msra.mxu0 %v792_v1  ;;  %s746_s29 = sshll.u32 %s934_s15, 2  ;;  %v428_v8 = vshrl.u32 %v427_v4, 7  ;;  %v798_v9 = vld [vmem:[%s927_s3 + $0x10] ss:$8 sps:$4 sm:$0xff]   ;;  %v422_v11 = vld [vmem:[%s926_s2] sm:$0x1] }
   0xf   : > { %497 = vmatprep.subr.bf16.mxu0 %v793_v3  ;;  %s347_s6 = scalar_lea.vmem %s924_s0, %s746_s29  ;;  %vm403_vm0 = vcmask 785408   ;;  %v799_v12 = vld [vmem:[%s927_s3 + $0x4] ss:$8 sps:$4 sm:$0xff]   ;;  %v828_v13 = vmov 0.0   ;;  %vm418_vm1 = vcmask 1040384   ;;  %v425_v16 = vpack.i.b16 %v422_v11, %v422_v11  ;;  %s762_s22 = sshll.u32 %s934_s15, 3 }
  0x10   : > { %v405_v7 = vld [vmem:[%s347_s6] sm:$0xf]  ;;  %404 = vst.msk [vmem:[#allocation2 + $0x8] sm:$0xff] %vm403_vm0, %v828_v13  ;;  %vm419_vm2 = vsmask.f32 256  ;;  %v429_v17 = vsub.s32 0, %v428_v8  ;;  %s395_s25 = scalar_lea.vmem %s928_s4, %s762_s22 }
  0x11   : > { %v749_v10 = vcombine.low %v405_v7, %v405_v7  ;;  %v801_v18 = vld [vmem:[%s927_s3] ss:$8 sps:$4 sm:$0xff]   ;;  %vm420_vm3 = vmand %vm418_vm1, %vm419_vm2  ;;  %vm483_vm4 = vcmask 523264   ;;  %vm550_vm5 = vcmask 1043456   ;;  %vm551_vm6 = vcmask 785412  }
  0x12   : > { %498 = vmatpush1.bf16.msra.mxu0 %v795_v5  ;;  %v406_v20 = vld [vmem:[%s356_s19] sm:$0x1]  ;;  %v430_v22 = vrot.slane %v425_v16, %v429_v17  ;;  %vm552_vm7 = vmor %vm551_vm6, %vm550_vm5 }
  0x13   : > { %499 = vmatprep.subr.bf16.mxu0 %v796_v6  ;;  %v411_v14 = vshrl.u32 %v749_v10, 16  ;;  %v414_v15 = vshll.u32 %v749_v10, 16 }
  0x15   : > { %v413_v19 = vrot.slane %v411_v14, 7 }
  0x16   : > { %500 = vmatpush1.bf16.msra.mxu0 %v798_v9 }
  0x17   : > { %501 = vmatprep.subr.bf16.mxu0 %v799_v12  ;;  %v416_v21 = vor.u32 %v414_v15, %v413_v19  ;;  %v434_v28 = vld [vmem:[#allocation2 + $0x8] sm:$0xff] }
  0x19   : > { %v421_v23 = vsel %vm420_vm3, %v406_v20, %v416_v21 }
  0x1a   : > { %502 = vmatpush1.bf16.msra.mxu0 %v801_v18  ;;  %v423_v24 = vsub.bf16 %v405_v7, %v421_v23 }
  0x1c   : > { %v431_v25 = vmul.bf16 %v430_v22, %v423_v24 }
  0x1e   : > { %v432_v26 = vadd.bf16 %v431_v25, %v421_v23 }
  0x20   : > { %758 = vmatmul.mubr.msk.bf16.vlgmr.msra.gmra.mxu0 %vm483_vm4, %v432_v26 }
  0xe0   : > { %v521_v27 = vpop.f32.mrf.mxu0 }
  0xe1   : > { %v538_v33 = vmax.f32 %v521_v27, 0.0 }
  0xe2   : > { %v523_v29 = vpop.f32.mrf.mxu0 }
  0xe3   : > { %v529_v30 = vadd.f32 %v523_v29, %v434_v28  ;;  %v540_v36 = vmul.f32 %v538_v33, %v538_v33 }
  0xe4   : > { %v525_v31 = vpop.f32.mrf.mxu0 }
  0xe5   : > { %532 = vst.msk [vmem:[#allocation2 + $0x8] sm:$0xff] %vm403_vm0, %v529_v30 }
  0xe6   : > { %v526_v32 = vpop.f32.mrf.mxu0 }
  0xec   : > { %v537_v34 = vld [vmem:[#allocation2 + $0x8] sm:$0xff] }
  0xed   : > { %v539_v35 = vmax.f32 %v537_v34, 0.0 }
  0xef   : > { %v541_v37 = vmul.f32 %v539_v35, %v539_v35 }
  0xf1   : > { %v763_v38 = vpack.c.bf16 %v541_v37, %v540_v36 }
  0xf3   : > { %553 = vst.msk [vmem:[%s395_s25] sm:$0xff] %vm552_vm7, %v763_v38 }
  0xf4 PF: > { %s14_s17 = sadd.s32 1, %s825_s17   ;;  %s929_s15 = smov %s821_s16 }
  0xf5   : > { %p11_p5 = scmp.ge.s32.totalorder %s14_s17, 4   ;;  %s930_s16 = smov %s932_s18 }
  0xf7   :  { %13 = sbr.rel (!%p11_p5) target bundleno = 2 (0x2), region = 83 }

// kernel: rwkv5_forward.27
= control target key start
LH: loop header
LB: loop body
LE: loop exit
PB: predicated region body
PF: predicated region fallthrough
CT: control target
= control target key end

     0   :  { %vm19_vm0 = vcmask 523264   ;;  %v267_v0 = vmov 0   ;;  %v268_v2 = vmov 0.0   ;;  %vm147_vm1 = vcmask 785408   ;;  %s350_s1 = inlined_call_operand.vmem [shape: bf16[224,64], index: 1, kind: input, shape index: {}]   ;;  %s351_s0 = inlined_call_operand.vmem [shape: bf16[16,224], index: 0, kind: input, shape index: {}]   ;;  %s352_s2 = inlined_call_operand.vmem [shape: bf16[16,64], index: 2, kind: input, shape index: {}]   ;;  %s353_s3 = inlined_call_operand.vmem [shape: bf16[16,64], index: 3, kind: output, shape index: {}]  }
   0x1   :  { %151 = vmatprep.subr.bf16.mxu0 %v267_v0  ;;  %v250_v1 = vld [vmem:[%s350_s1 + $0x38] sm:$0xff]   ;;  %20 = vst.msk [vmem:[#allocation2] sm:$0xff] %vm19_vm0, %v268_v2  ;;  %21 = vst.msk [vmem:[#allocation2 + $0x8] sm:$0xff] %vm19_vm0, %v268_v2  ;;  %v251_v3 = vld [vmem:[%s350_s1 + $0x30] sm:$0xff]   ;;  %vm216_vm2 = vcmask 519168  }
   0x2   :  { %152 = vmatpush1.bf16.msra.mxu0 %v250_v1  ;;  %v252_v4 = vld [vmem:[%s350_s1 + $0x28] sm:$0xff]   ;;  %v253_v5 = vld [vmem:[%s350_s1 + $0x20] sm:$0xff]   ;;  %v254_v6 = vld [vmem:[%s350_s1 + $0x18] sm:$0xff]  }
   0x3   :  { %153 = vmatprep.subr.bf16.mxu0 %v267_v0  ;;  %v266_v7 = vld [vmem:[%s351_s0 + $0x4] ss:$8 sps:$4 sm:$0xff]   ;;  %v255_v8 = vld [vmem:[%s350_s1 + $0x10] sm:$0xff]   ;;  %v260_v13 = vld [vmem:[%s350_s1 + $0x58] sm:$0xff]  }
   0x4   :  { %239 = vmatprep.mubr.msk.bf16.mxu0 %vm147_vm1, %v266_v7  ;;  %v256_v9 = vld [vmem:[%s350_s1 + $0x8] sm:$0xff]   ;;  %v257_v10 = vld [vmem:[%s350_s1] sm:$0xff]   ;;  %v261_v14 = vld [vmem:[%s350_s1 + $0x50] sm:$0xff]  }
   0x5   :  { %v258_v11 = vld [vmem:[%s350_s1 + $0x68] sm:$0xff]   ;;  %v259_v12 = vld [vmem:[%s350_s1 + $0x60] sm:$0xff]  }
   0x6   :  { %154 = vmatpush1.bf16.msra.mxu0 %v251_v3  ;;  %v262_v15 = vld [vmem:[%s350_s1 + $0x48] sm:$0xff]   ;;  %v263_v16 = vld [vmem:[%s350_s1 + $0x40] sm:$0xff]  }
   0x7   :  { %155 = vmatprep.subr.bf16.mxu0 %v267_v0  ;;  %v264_v17 = vld [vmem:[%s351_s0] ss:$8 sps:$4 sm:$0xff]  }
   0x8   :  { %v22_v18 = vld [vmem:[#allocation2] sm:$0xff]  ;;  %v23_v22 = vld [vmem:[#allocation2 + $0x8] sm:$0xff] }
   0x9   :  { %v245_v23 = vld [vmem:[%s352_s2] sm:$0xff]  }
   0xa   :  { %156 = vmatpush1.bf16.msra.mxu0 %v252_v4  ;;  %v246_v27 = vunpack.c.l.bf16 %v245_v23  ;;  %v247_v30 = vunpack.c.h.bf16 %v245_v23 }
   0xb   :  { %157 = vmatprep.subr.bf16.mxu0 %v267_v0 }
   0xe   :  { %158 = vmatpush1.bf16.msra.mxu0 %v253_v5 }
   0xf   :  { %159 = vmatprep.subr.bf16.mxu0 %v267_v0 }
  0x12   :  { %160 = vmatpush1.bf16.msra.mxu0 %v254_v6 }
  0x13   :  { %161 = vmatprep.subr.bf16.mxu0 %v267_v0 }
  0x16   :  { %162 = vmatpush1.bf16.msra.mxu0 %v255_v8 }
  0x17   :  { %163 = vmatprep.subr.bf16.mxu0 %v267_v0 }
  0x1a   :  { %164 = vmatpush1.bf16.msra.mxu0 %v256_v9 }
  0x1b   :  { %165 = vmatprep.subr.bf16.mxu0 %v267_v0 }
  0x1e   :  { %166 = vmatpush1.bf16.msra.mxu0 %v257_v10 }
  0x1f   :  { %171 = vmatprep.subr.bf16.mxu0 %v267_v0 }
  0x22   :  { %172 = vmatpush2.bf16.msra.mxu0 %v258_v11 }
  0x23   :  { %173 = vmatprep.subr.bf16.mxu0 %v267_v0 }
  0x26   :  { %174 = vmatpush2.bf16.msra.mxu0 %v259_v12 }
  0x27   :  { %175 = vmatprep.subr.bf16.mxu0 %v267_v0 }
  0x2a   :  { %176 = vmatpush2.bf16.msra.mxu0 %v260_v13 }
  0x2b   :  { %177 = vmatprep.subr.bf16.mxu0 %v267_v0 }
  0x2e   :  { %178 = vmatpush2.bf16.msra.mxu0 %v261_v14 }
  0x2f   :  { %179 = vmatprep.subr.bf16.mxu0 %v267_v0 }
  0x32   :  { %180 = vmatpush2.bf16.msra.mxu0 %v262_v15 }
  0x33   :  { %181 = vmatprep.subr.bf16.mxu0 %v267_v0 }
  0x36   :  { %182 = vmatpush2.bf16.msra.mxu0 %v263_v16 }
  0x39   :  { %184 = vmatmul.mubr.bf16.vlgmr.msra.gmra.mxu0 %v264_v17 }
  0xf9   :  { %v185_v19 = vpop.f32.mrf.mxu0 }
  0xfa   :  { %v192_v20 = vadd.f32 %v185_v19, %v22_v18 }
  0xfb   :  { %v187_v21 = vpop.f32.mrf.mxu0 }
  0xfc   :  { %195 = vst.msk [vmem:[#allocation2] sm:$0xff] %vm19_vm0, %v192_v20 }
  0xfd   :  { %v188_v24 = vpop.f32.mrf.mxu0 }
  0xfe   :  { %v193_v25 = vadd.f32 %v188_v24, %v23_v22 }
  0xff   :  { %v190_v26 = vpop.f32.mrf.mxu0 }
 0x100   :  { %196 = vst.msk [vmem:[#allocation2 + $0x8] sm:$0xff] %vm19_vm0, %v193_v25 }
 0x103   :  { %v200_v28 = vld [vmem:[#allocation2] sm:$0xff] }
 0x104   :  { %v206_v29 = vmul.f32 %v246_v27, %v200_v28 }
 0x106   :  { %v242_v31 = vpack.c.bf16 %v206_v29, %v206_v29 }
 0x107   :  { %v201_v32 = vld [vmem:[#allocation2 + $0x8] sm:$0xff] }
 0x108   :  { %217 = vst.msk [vmem:[%s353_s3] sm:$0xf] %vm216_vm2, %v242_v31  ;;  %v207_v33 = vmul.f32 %v247_v30, %v201_v32 }
 0x10a   :  { %v243_v34 = vpack.c.bf16 %v207_v33, %v207_v33 }
 0x10c   :  { %218 = vst.msk [vmem:[%s353_s3 + $0x4] sm:$0xf] %vm216_vm2, %v243_v34 }

// kernel: rwkv5_forward.37
= control target key start
LH: loop header
LB: loop body
LE: loop exit
PB: predicated region body
PF: predicated region fallthrough
CT: control target
= control target key end

     0   :  { %v225_v2 = vmov 0   ;;  %s274_s0 = inlined_call_operand.vmem [shape: bf16[16,64], index: 0, kind: input, shape index: {}]   ;;  %s275_s1 = inlined_call_operand.vmem [shape: bf16[64,256], index: 1, kind: input, shape index: {}]   ;;  %s276_s2 = inlined_call_operand.hbm [shape: bf16[16,256], index: 2, kind: output, shape index: {}]  }
   0x1   :  { %v190_v0 = vld [vmem:[%s275_s1 + $0x34] ss:$8 sps:$4 sm:$0xff]   ;;  %v192_v1 = vld [vmem:[%s275_s1 + $0x30] ss:$8 sps:$4 sm:$0xff]   ;;  %116 = vmatprep.mubr.bf16.mxu0 %v225_v2  ;;  %v193_v3 = vld [vmem:[%s275_s1 + $0x24] ss:$8 sps:$4 sm:$0xff]  }
   0x2   :  { %92 = vmatprep.subr.bf16.mxu0 %v190_v0  ;;  %v195_v4 = vld [vmem:[%s275_s1 + $0x20] ss:$8 sps:$4 sm:$0xff]   ;;  %v196_v5 = vld [vmem:[%s275_s1 + $0x14] ss:$8 sps:$4 sm:$0xff]  }
   0x3   :  { %93 = vmatpush1.bf16.msra.mxu0 %v192_v1 }
   0x4   :  { %94 = vmatprep.subr.bf16.mxu0 %v193_v3 }
   0x5   :  { %7 = vsyncpa [#allocation4], 0  ;;  %v198_v6 = vld [vmem:[%s275_s1 + $0x10] ss:$8 sps:$4 sm:$0xff]   ;;  %v199_v7 = vld [vmem:[%s275_s1 + $0x4] ss:$8 sps:$4 sm:$0xff]  }
   0x6   :  { %v201_v8 = vld [vmem:[%s275_s1] ss:$8 sps:$4 sm:$0xff]   ;;  %vm80_vm0 = vcmask 523264   ;;  %s226_s27 = smov [#allocation3]  }
   0x7   :  { %95 = vmatpush1.bf16.msra.mxu0 %v195_v4  ;;  %v202_v9 = vld [vmem:[%s274_s0] sm:$0xff]   ;;  %s161_s28 = sshll.u32 %s226_s27, 4  ;;  %s162_s28 = int_to_ptr.vmem [resolvable:$true] %s161_s28 }
   0x8   :  { %96 = vmatprep.subr.bf16.mxu0 %v196_v5  ;;  %s203_s1 = scalar_lea.vmem %s162_s28, 256  ;;  %p208_p1 = scmp.lt.s32.totalorder %s162_s28, %s162_s28 }
   0x9   :  { %p204_p0 = scmp.ne.s32.totalorder %s162_s28, %s203_s1  ;;  %p209_p2 = scmp.lt.s32.totalorder %s203_s1, %s203_s1 }
   0xb   :  { %97 = vmatpush1.bf16.msra.mxu0 %v198_v6  ;;  %p210_p3 = por %p209_p2, %p208_p1 }
   0xc   :  { %98 = vmatprep.subr.bf16.mxu0 %v199_v7 }
   0xd   :  { %p211_p4 = pnand %p210_p3, %p204_p0 }
   0xf   :  { %99 = vmatpush1.bf16.msra.mxu0 %v201_v8 }
  0x12   :  { %181 = vmatmul.mubr.msk.bf16.vlgmr.msra.gmra.mxu0 %vm80_vm0, %v202_v9 }
  0xd2   :  { %v118_v10 = vpop.f32.mrf.mxu0 }
  0xd4   :  { %v120_v11 = vpop.f32.mrf.mxu0 }
  0xd5   :  { %v184_v12 = vpack.c.bf16 %v120_v11, %v118_v10 }
  0xd6   :  { %v122_v13 = vpop.f32.mrf.mxu0 }
  0xd7   :  { %154 = vst [vmem:[#allocation3] sm:$0xff] %v184_v12 }
  0xd8   :  { %v124_v14 = vpop.f32.mrf.mxu0 }
  0xd9   :  { %v185_v15 = vpack.c.bf16 %v124_v14, %v122_v13 }
  0xdb   :  { %155 = vst [vmem:[#allocation3 + $0x8] sm:$0xff] %v185_v15 }
  0xdc   :  { %214 = shalt.err (!%p211_p4)
}
  0xdd   :  { %s227_s0 = smov 128   ;;  %s228_s29 = smov 8  }
  0xde   :  { %167 = dma.vmem_to_hbm [thread:$0]  %s162_s28, 256, %s276_s2, [#allocation4], %s227_s0, %s227_s0, %s228_s29  }
  0xdf   :  { %223 = dma.done.wait [#allocation4], 256  }
  0xe0   :  { %224 = vsyncadd [#allocation4], 4294967040 }
  0xe1   :  { %171 = vsyncpa [#allocation4], 1 }

</bundles_post_ra>
